<compile_context>
chip_gen: v5e
topology: v5e:2x2
jax: 0.10.0
libtpu: 0.0.40
codegen_flags: <defaults>
</compile_context>

<pallas_src>
import functools

import jax
import jax.numpy as jnp
from jax.experimental import pallas as pl
from jax.experimental.pallas import tpu as pltpu


def _round_up(x, m):
    return ((x + m - 1) // m) * m


def _gated_attn_kernel(x_ref, wab_ref, bab_ref, wct_ref, bct_ref, at_ref):
    # x_ref:   (tm, L)    tile of input rows (native dtype, streamed from HBM)
    # wab_ref: (L, 2D)    fused [Wa | Wb] weight, bf16 (resident across grid)
    # bab_ref: (1, 2D)    fused [ba | bb] bias, f32
    # wct_ref: (C, D)     Wc pre-transposed, bf16 (resident)
    # bct_ref: (C, 1)     bc as a column, f32
    # at_ref:  (C, tm)    lane-dense transposed output tile, f32
    d = wct_ref.shape[1]

    # bf16 MXU operands (cast in VMEM, free under the matmul), f32 accumulate.
    x = x_ref[...].astype(wab_ref.dtype)
    h = jnp.dot(x, wab_ref[...],
                preferred_element_type=jnp.float32) + bab_ref[...]

    # Gating in f32 (EUP transcendentals + VPU multiply).  Slices are
    # lane-aligned because D is a multiple of 128.
    a = jnp.tanh(h[:, :d])
    b = jax.nn.sigmoid(h[:, d:])
    ab = (a * b).astype(wct_ref.dtype)             # (tm, D) bf16 for the MXU

    # Transposed final projection: contract D of Wc^T (C, D) with D of ab
    # (tm, D) -> (C, tm).  Lane-dense output for small C (e.g. C = 1).
    a_t = jax.lax.dot_general(
        wct_ref[...], ab,
        dimension_numbers=(((1,), (1,)), ((), ())),
        preferred_element_type=jnp.float32)

    at_ref[...] = (a_t + bct_ref[...]).astype(at_ref.dtype)


def _vmem_budget():
    """Generation-aware VMEM limit + tile budget (v5e/v6e: 128 MiB physical,
    v7x: 64 MiB per TensorCore).  Conservative fallback if query fails."""
    cap = 64 * 1024 * 1024
    try:
        info = pltpu.get_tpu_info()
        cap = int(getattr(info, "vmem_capacity_bytes", cap))
    except Exception:
        pass
    vmem_limit = min((cap * 3) // 4, 96 * 1024 * 1024)
    tile_budget = max(8 * 1024 * 1024, vmem_limit - 6 * 1024 * 1024)
    return vmem_limit, tile_budget


def _fit_tm(tm, N, L, D, C, x_itemsize, w_itemsize, budget):
    """Row tile: multiple of 128, <= 128-padded N, at least 2 grid steps when
    possible (megacore / pipeline overlap), and fits the VMEM budget including
    double-buffered specs and the kernel's f32 intermediates."""
    n128 = _round_up(N, 128)
    tm = max(128, min((tm // 128) * 128, n128))
    if n128 >= 256:  # ensure >= 2 grid steps so v7x's 2 TCs and the
        tm = min(tm, max(128, ((n128 // 2) // 128) * 128))  # pipeline engage

    # Resident weights/biases get 2 VMEM buffers each by default even with a
    # constant index_map — count them honestly.
    weights = 2 * (L * 2 * D + C * D) * w_itemsize + 2 * (2 * D + C) * 4

    while tm > 128:
        per_tile = (2 * tm * L * x_itemsize      # double-buffered x tile
                    + 2 * C * tm * 4             # double-buffered out tile
                    + tm * L * w_itemsize        # bf16 cast of x tile
                    + tm * 2 * D * 4             # h (f32)
                    + 3 * tm * D * 4             # a, b, a*b (f32)
                    + tm * D * w_itemsize)       # bf16 cast of a*b
        if weights + per_tile <= budget:
            break
        tm -= 128
    return tm


def prepare_params(wa, ba, wb, bb, wc, bc, compute_dtype=jnp.bfloat16):
    """Fuse/transpose/cast the weights ONCE (hoist out of the hot path).

    Weights are stored (in_features, out_features) so the kernel computes
    x @ W + b directly on the MXU.  Biases stay f32 (exact add on the f32
    accumulator)."""
    D = wa.shape[1]
    C = wc.shape[1]
    wab = jnp.concatenate([wa, wb], axis=1).astype(compute_dtype)   # (L, 2D)
    bab = jnp.concatenate([ba, bb], axis=0).reshape(1, 2 * D).astype(jnp.float32)
    wct = wc.T.astype(compute_dtype)                                # (C, D)
    bct = bc.reshape(C, 1).astype(jnp.float32)
    return wab, bab, wct, bct


@functools.partial(jax.jit, static_argnames=("tm",))
def attn_net_gated_prepared(x, wab, bab, wct, bct, *, tm=1024):
    """Gated attention forward on pre-fused params. Returns (A, x)."""
    N, L = x.shape
    D = wct.shape[1]
    C = wct.shape[0]

    vmem_limit, tile_budget = _vmem_budget()
    tm = _fit_tm(tm, N, L, D, C, x.dtype.itemsize, wab.dtype.itemsize,
                 tile_budget)
    grid = (pl.cdiv(N, tm),)   # no jnp.pad copy: partial last block is masked

    w_bytes = (L * 2 * D + C * D) * wab.dtype.itemsize + (2 * D + C) * 4
    cost = pl.CostEstimate(
        flops=2 * N * L * (2 * D) + 2 * N * D * C,
        transcendentals=2 * N * D,
        bytes_accessed=N * L * x.dtype.itemsize + w_bytes + C * N * 4,
    )

    a_t = pl.pallas_call(
        _gated_attn_kernel,
        out_shape=jax.ShapeDtypeStruct((C, N), jnp.float32),
        grid_spec=pltpu.PrefetchScalarGridSpec(
            num_scalar_prefetch=0,
            grid=grid,
            in_specs=[
                pl.BlockSpec((tm, L), lambda i: (i, 0)),        # x row tile
                pl.BlockSpec((L, 2 * D), lambda i: (0, 0)),     # fused Wa|Wb
                pl.BlockSpec((1, 2 * D), lambda i: (0, 0)),     # fused ba|bb
                pl.BlockSpec((C, D), lambda i: (0, 0)),         # Wc^T
                pl.BlockSpec((C, 1), lambda i: (0, 0)),         # bc
            ],
            out_specs=pl.BlockSpec((C, tm), lambda i: (0, i)),  # lane-dense
        ),
        compiler_params=pltpu.CompilerParams(
            dimension_semantics=("parallel",),
            vmem_limit_bytes=vmem_limit),
        cost_estimate=cost,
    )(x, wab, bab, wct, bct)

    A = a_t.T                        # (N, C), f32
    # The module returns the input x unchanged as its second output.
    return A, x


def attn_net_gated(x, wa, ba, wb, bb, wc, bc, *, tm=1024,
                   compute_dtype=jnp.bfloat16):
    """Convenience wrapper: fuses params then runs the kernel."""
    wab, bab, wct, bct = prepare_params(wa, ba, wb, bb, wc, bc, compute_dtype)
    return attn_net_gated_prepared(x, wab, bab, wct, bct, tm=tm)


def init_params(key, L, D, n_classes, dtype=jnp.float32):
    """Deterministic synthetic init mirroring nn.Linear shapes ((in, out))."""
    k = jax.random.split(key, 6)
    lim_a = 1.0 / jnp.sqrt(L)
    lim_c = 1.0 / jnp.sqrt(D)
    wa = jax.random.uniform(k[0], (L, D), dtype, -lim_a, lim_a)
    ba = jax.random.uniform(k[1], (D,), dtype, -lim_a, lim_a)
    wb = jax.random.uniform(k[2], (L, D), dtype, -lim_a, lim_a)
    bb = jax.random.uniform(k[3], (D,), dtype, -lim_a, lim_a)
    wc = jax.random.uniform(k[4], (D, n_classes), dtype, -lim_c, lim_c)
    bc = jax.random.uniform(k[5], (n_classes,), dtype, -lim_c, lim_c)
    return wa, ba, wb, bb, wc, bc


def reference(x, wa, ba, wb, bb, wc, bc):
    a = jnp.tanh(x.astype(jnp.float32) @ wa + ba)
    b = jax.nn.sigmoid(x.astype(jnp.float32) @ wb + bb)
    A = (a * b) @ wc + bc
    return A, x


if __name__ == "__main__":
    # Module defaults: L=1024 input dim, D=256 hidden, n_classes=1.
    # N = number of instances (small for the test; yields a 2-step grid).
    N, L, D, C = 256, 1024, 256, 1
    key = jax.random.PRNGKey(0)
    kx, kp = jax.random.split(key)
    x = jax.random.normal(kx, (N, L), jnp.float32)
    wa, ba, wb, bb, wc, bc = init_params(kp, L, D, C)

    # TODO(synk): dropout=True path (p=0.25) would use pltpu.prng_seed +
    # pltpu.stateful_bernoulli on the a/b branches; module default is False.
    wab, bab, wct, bct = prepare_params(wa, ba, wb, bb, wc, bc)  # hoisted once
    A, x_out = attn_net_gated_prepared(x, wab, bab, wct, bct)
    jax.block_until_ready(A)
    jax.block_until_ready(x_out)

    A_ref, _ = reference(x, wa, ba, wb, bb, wc, bc)
    assert A.shape == (N, C), A.shape
    assert x_out.shape == (N, L), x_out.shape
    # bf16 MXU operands (f32 accumulate) vs the pure-f32 reference.
    err = float(jnp.max(jnp.abs(A - A_ref)))
    assert err < 2e-2, f"mismatch vs reference, max abs err {err}"
    assert jnp.array_equal(x_out, x), "x passthrough mismatch"
    print("KERNEL_OK")
</pallas_src>

<mosaic_0001>
module attributes {stable_mosaic.version = 11 : i64} {
  func.func @_gated_attn_kernel(%arg0: i32, %arg1: memref<128x1024xf32, #tpu.memory_space<vmem>>, %arg2: memref<1024x512xbf16, #tpu.memory_space<vmem>>, %arg3: memref<1x512xf32, #tpu.memory_space<vmem>>, %arg4: memref<1x256xbf16, #tpu.memory_space<vmem>>, %arg5: memref<1x1xf32, #tpu.memory_space<vmem>>, %arg6: memref<1x128xf32, #tpu.memory_space<vmem>>) attributes {dimension_semantics = [#tpu.dimension_semantics<parallel>], iteration_bounds = array<i64: 2>, scalar_prefetch = 0 : i64, scratch_operands = 0 : i64, tpu.core_type = #tpu.core_type<tc>, window_params = [{transform_indices = @transform_0, window_bounds = array<i64: 128, 1024>}, {pipeline_mode = #tpu.pipeline_mode<synchronous>, transform_indices = @transform_1, window_bounds = array<i64: 1024, 512>}, {pipeline_mode = #tpu.pipeline_mode<synchronous>, transform_indices = @transform_2, window_bounds = array<i64: 1, 512>}, {pipeline_mode = #tpu.pipeline_mode<synchronous>, transform_indices = @transform_3, window_bounds = array<i64: 1, 256>}, {pipeline_mode = #tpu.pipeline_mode<synchronous>, transform_indices = @transform_4, window_bounds = array<i64: 1, 1>}, {transform_indices = @transform_5, window_bounds = array<i64: 1, 128>}]} {
    %c0 = arith.constant 0 : index
    %c0_0 = arith.constant 0 : index
    %0 = vector.load %arg1[%c0, %c0_0] : memref<128x1024xf32, #tpu.memory_space<vmem>>, vector<128x1024xf32>
    %1 = arith.truncf %0 : vector<128x1024xf32> to vector<128x1024xbf16>
    %c0_1 = arith.constant 0 : index
    %c0_2 = arith.constant 0 : index
    %2 = vector.load %arg2[%c0_1, %c0_2] : memref<1024x512xbf16, #tpu.memory_space<vmem>>, vector<1024x512xbf16>
    %cst = arith.constant dense<0.000000e+00> : vector<128x512xf32>
    %3 = tpu.matmul %1, %2, %cst {dimension_numbers = #tpu.dot_dimension_numbers<[1], [0], [0], [1], [0, 0, 1, 1], [], []>} : vector<128x1024xbf16>, vector<1024x512xbf16>, vector<128x512xf32> -> vector<128x512xf32>
    %c0_3 = arith.constant 0 : index
    %c0_4 = arith.constant 0 : index
    %4 = vector.load %arg3[%c0_3, %c0_4] : memref<1x512xf32, #tpu.memory_space<vmem>>, vector<1x512xf32>
    %5 = vector.broadcast %4 : vector<1x512xf32> to vector<128x512xf32>
    %6 = arith.addf %3, %5 : vector<128x512xf32>
    %7 = vector.extract_strided_slice %6 {offsets = [0, 0], sizes = [128, 256], strides = [1, 1]} : vector<128x512xf32> to vector<128x256xf32>
    %8 = math.tanh %7 : vector<128x256xf32>
    %9 = vector.extract_strided_slice %6 {offsets = [0, 256], sizes = [128, 256], strides = [1, 1]} : vector<128x512xf32> to vector<128x256xf32>
    %10 = arith.negf %9 : vector<128x256xf32>
    %11 = math.exp %10 : vector<128x256xf32>
    %cst_5 = arith.constant 1.000000e+00 : f32
    %12 = vector.broadcast %cst_5 : f32 to vector<128x256xf32>
    %13 = arith.addf %12, %11 : vector<128x256xf32>
    %14 = arith.divf %12, %13 : vector<128x256xf32>
    %15 = arith.mulf %8, %14 : vector<128x256xf32>
    %16 = arith.truncf %15 : vector<128x256xf32> to vector<128x256xbf16>
    %c0_6 = arith.constant 0 : index
    %c0_7 = arith.constant 0 : index
    %17 = vector.load %arg4[%c0_6, %c0_7] : memref<1x256xbf16, #tpu.memory_space<vmem>>, vector<1x256xbf16>
    %cst_8 = arith.constant dense<0.000000e+00> : vector<1x128xf32>
    %18 = tpu.matmul %17, %16, %cst_8 {dimension_numbers = #tpu.dot_dimension_numbers<[1], [1], [0], [0], [0, 0, 1, 0], [], []>} : vector<1x256xbf16>, vector<128x256xbf16>, vector<1x128xf32> -> vector<1x128xf32>
    %c0_9 = arith.constant 0 : index
    %c0_10 = arith.constant 0 : index
    %19 = vector.load %arg5[%c0_9, %c0_10] : memref<1x1xf32, #tpu.memory_space<vmem>>, vector<1x1xf32>
    %20 = vector.broadcast %19 : vector<1x1xf32> to vector<1x128xf32>
    %21 = arith.addf %18, %20 : vector<1x128xf32>
    %c0_11 = arith.constant 0 : index
    %c0_12 = arith.constant 0 : index
    %22 = vector.load %arg6[%c0_11, %c0_12] : memref<1x128xf32, #tpu.memory_space<vmem>>, vector<1x128xf32>
    tpu.vector_store %arg6[%c0_11, %c0_12], %21 {strides = array<i32>} : memref<1x128xf32, #tpu.memory_space<vmem>>, vector<1x128xf32>,
    return
  }
  func.func @transform_0(%arg0: i32) -> (i32, i32) {
    %c0_i32 = arith.constant 0 : i32
    %c0_i32_0 = arith.constant 0 : i32
    return %arg0, %c0_i32 : i32, i32
  }
  func.func @transform_1(%arg0: i32) -> (i32, i32) {
    %c0_i32 = arith.constant 0 : i32
    %c0_i32_0 = arith.constant 0 : i32
    %c0_i32_1 = arith.constant 0 : i32
    return %c0_i32, %c0_i32_0 : i32, i32
  }
  func.func @transform_2(%arg0: i32) -> (i32, i32) {
    %c0_i32 = arith.constant 0 : i32
    %c0_i32_0 = arith.constant 0 : i32
    %c0_i32_1 = arith.constant 0 : i32
    return %c0_i32, %c0_i32_0 : i32, i32
  }
  func.func @transform_3(%arg0: i32) -> (i32, i32) {
    %c0_i32 = arith.constant 0 : i32
    %c0_i32_0 = arith.constant 0 : i32
    %c0_i32_1 = arith.constant 0 : i32
    return %c0_i32, %c0_i32_0 : i32, i32
  }
  func.func @transform_4(%arg0: i32) -> (i32, i32) {
    %c0_i32 = arith.constant 0 : i32
    %c0_i32_0 = arith.constant 0 : i32
    %c0_i32_1 = arith.constant 0 : i32
    return %c0_i32, %c0_i32_0 : i32, i32
  }
  func.func @transform_5(%arg0: i32) -> (i32, i32) {
    %c0_i32 = arith.constant 0 : i32
    %c0_i32_0 = arith.constant 0 : i32
    return %c0_i32, %arg0 : i32, i32
  }
}

</mosaic_0001>

<bundles_post_ra>
// kernel: attn_net_gated_prepared.1
= control target key start
LH: loop header
LB: loop body
LE: loop exit
PB: predicated region body
PF: predicated region fallthrough
CT: control target
= control target key end

     0   :  { %s7611_s0 = inlined_call_operand.hbm [shape: f32[256,1024], index: 0, kind: input, shape index: {}]   ;;  %s7612_s1 = inlined_call_operand.hbm [shape: bf16[1024,512], index: 1, kind: input, shape index: {}]   ;;  %s7613_s2 = inlined_call_operand.hbm [shape: f32[1,512], index: 2, kind: input, shape index: {}]   ;;  %s7614_s3 = inlined_call_operand.vmem [shape: bf16[1,256], index: 3, kind: input, shape index: {}]   ;;  %s7615_s4 = inlined_call_operand.<no memory space> [shape: f32[1,1], index: 4, kind: input, shape index: {}]   ;;  %s7616_s5 = inlined_call_operand.hbm [shape: f32[1,256], index: 5, kind: output, shape index: {}]  }
   0x1   :  { %v10_v0 = vstv %s7615_s4 }
   0x2   :  { %11 = vst [vmem:[#allocation2] sm:$0x1] %v10_v0 }
   0x3   :  { %12 = vsyncpa [#allocation4], 0 }
   0x4   :  { %14 = vsyncpa [#allocation4 + $0x1], 0 }
   0x5   :  { %15 = vsyncpa [#allocation7], 0 }
   0x6   :  { %16 = vsyncpa [#allocation5], 0 }
   0x7   :  { %18 = vsyncpa [#allocation5 + $0x1], 0  ;;  %s6211_s20 = smov 0   ;;  %s6213_s21 = smov 0  }
   0x8   :  { %s6215_s22 = smov 0   ;;  %s6217_s23 = smov 0  }
   0x9 LB: > { %s6232_s4 = sadd.s32 4294967295, %s6169_s23   ;;  %s4412_s24 = sadd.s32 4294967294, %s6169_s23   ;;  %s6169_s23 = sphi %s6217_s23, %s7918_s23   ;;  %s6165_s22 = sphi %s6215_s22, %s7917_s22   ;;  %s6161_s21 = sphi %s6213_s21, %s7916_s21   ;;  %s6157_s20 = sphi %s6211_s20, %s7915_s20  }
   0xa   : > { %p44_p0 = scmp.ne.s32.totalorder %s6161_s21, %s6157_s20  ;;  %p45_p1 = scmp.eq.s32.totalorder %s6232_s4, 0 }
   0xb   : > { %p152_p2 = scmp.eq.s32.totalorder %s6232_s4, 1  ;;  %p158_p3 = scmp.eq.s32.totalorder %s4412_s24, 1 }
   0xc   : > { %p6241_p4 = por %p45_p1, %p44_p0  ;;  %p4413_p5 = scmp.ge.s32.totalorder %s6169_s23, 1 }
   0xd   : > { %p6246_p6 = por %p158_p3, %p44_p0  ;;  %p165_p7 = scmp.lt.s32.totalorder %s6169_s23, 3 }
   0xe   : > { %s176_s29 = sshll.u32 %s7612_s1, 4  ;;  %s6171_s6 = smov [#allocation6]   ;;  %s177_s29 = int_to_ptr.hbm [resolvable:$true] %s176_s29 }
   0xf   : > { %p6254_p8 = pnand %p4413_p5, %p165_p7  ;;  %s178_s7 = sshll.u32 %s6171_s6, 4  ;;  %s179_s7 = int_to_ptr.vmem [resolvable:$true] %s178_s7 }
  0x10   : > { %s191_s10 = sshll.u32 %s7613_s2, 4  ;;  %s6172_s11 = smov 256   ;;  %s192_s10 = int_to_ptr.hbm [resolvable:$true] %s191_s10 }
  0x11   : > { %p5753_p9 = pneg %p6254_p8  ;;  %s6173_s12 = smov 16  }
  0x12   : > { %s6174_s13 = smov [#allocation8]   ;;  %s6267_s15 = sadd.s32 1, %s6169_s23  }
  0x13   : > { %p5754_p10 = pnand %p5753_p9, %p45_p1  ;;  %s193_s14 = sshll.u32 %s6174_s13, 4  ;;  %s194_s14 = int_to_ptr.vmem [resolvable:$true] %s193_s14 }
  0x14   : > { %s31_s16 = sadd.s32 1, %s6165_s22  ;;  %s28_s17 = ssub.s32 %s6169_s23, %s6267_s15 }
  0x15   : > { %5756 = dma.hbm_to_vmem [thread:$0]  (!%p5754_p10), %s177_s29, 32768, %s179_s7, [#allocation7], %s6172_s11, %s6172_s11, %s6173_s12  }
  0x16   : > { %5759 = dma.hbm_to_vmem [thread:$0]  (!%p5754_p10), %s192_s10, 64, %s194_s14, [#allocation7]  }
  0x17   : > { %p38_p12 = scmp.ne.s32.totalorder %s6165_s22, %s6161_s21  ;;  %p29_p13 = scmp.eq.s32.totalorder %s28_s17, 0 }
  0x18   : > { %p39_p0 = scmp.eq.s32.totalorder %s6169_s23, 0  ;;  %p5770_p5 = scmp.lt.s32.totalorder %s6169_s23, 2 }
  0x19   : > { %p6277_p3 = por %p152_p2, %p38_p12  ;;  %s210_s24 = sand.u32 1, %s6165_s22  }
  0x1a   : > { %s6283_s19 = scalar_select %p29_p13, %s6165_s22, %s31_s16  }
  0x1b   : > { %p40_p7 = por %p39_p0, %p38_p12  ;;  %s4417_s27 = sshll.u32 %s210_s24, 10 }
  0x1c   : > { %s5484_s28 = sshll.u32 %s6169_s23, 10  ;;  %s214_s8 = scalar_lea.vmem [#allocation3], %s4417_s27 }
  0x1d   : > { %s220_s7 = scalar_lea.hbm %s7611_s0, %s5484_s28  ;;  %s223_s9 = sshll.u32 %s214_s8, 4  ;;  %s224_s9 = int_to_ptr.vmem [resolvable:$true] %s223_s9 }
  0x1e   : > { %s221_s10 = sshll.u32 %s220_s7, 4  ;;  %p6290_p2 = pnand %p5770_p5, %p40_p7  ;;  %s222_s10 = int_to_ptr.hbm [resolvable:$true] %s221_s10 }
  0x1f   : > { %s211_s12 = scalar_lea.sflag [#allocation4], %s210_s24  ;;  %s6069_s13 = sshra.s32 %s222_s10, 4  ;;  %s6070_s13 = int_to_ptr.hbm [resolvable:$true] %s6069_s13 }
  0x20   : > { %s6071_s14 = scalar_lea.hbm %s6070_s13, 1024  ;;  %p6073_p10 = pneg %p6290_p2 }
  0x21   : > { %p6072_p9 = scmp.ne.s32.totalorder %s6070_s13, %s6071_s14  ;;  %s6076_s27 = scalar_lea.hbm %s7611_s0, 2048 }
  0x22   : > { %p6077_p0 = scmp.lt.s32.totalorder %s6070_s13, %s7611_s0  ;;  %p6078_p5 = scmp.lt.s32.totalorder %s6076_s27, %s6071_s14 }
  0x23   : > { %p6074_p12 = pnand %p6073_p10, %p6072_p9 }
  0x24   : > { %p6079_p7 = por %p6078_p5, %p6077_p0 }
  0x25   : > { %p6075_p13 = pneg %p6074_p12 }
  0x27   : > { %p6080_p11 = pnand %p6079_p7, %p6075_p13 }
  0x29   : > { %6083 = shalt.err (!%p6080_p11)
}
  0x2a   : > { %s6175_s24 = smov 1024   ;;  %s6176_s6 = smov 64  }
  0x2b   : > { %5763 = dma.hbm_to_vmem [thread:$0]  (!%p6290_p2), %s222_s10, 16384, %s224_s9, %s211_s12, %s6175_s24, %s6175_s24, %s6176_s6  }
  0x2c   : > { %235 = sbr.rel (%p6254_p8) target bundleno = 1472 (0x5c0), region = 40 }
  0x31   : > { %s6307_s7 = sand.u32 1, %s6161_s21  }
  0x32   : > { %s4422_s8 = sshll.u32 %s6307_s7, 10  ;;  %s238_s13 = scalar_lea.sflag [#allocation4], %s6307_s7 }
  0x33   : > { %s6311_s14 = scalar_lea.vmem [#allocation3], %s4422_s8 }
  0x34   : > { %6144 = dma.done.wait (%p6241_p4), %s238_s13, 16384  }
  0x35   : > { %6146 = vsyncadd (%p6241_p4), %s238_s13, 4294950912 }
  0x36   : > { %6148 = dma.done.wait (%p45_p1), [#allocation7], 32832  }
  0x37   : > { %6150 = vsyncadd (%p45_p1), [#allocation7], 4294934464  ;;  %v4539_v1 = vld [vmem:[#allocation6 + $0xe0] sm:$0xf]  ;;  %v5515_v2 = vld [vmem:[#allocation6 + $0xec] sm:$0xf0]  ;;  %s4323_s11 = scalar_lea.hbm %s7616_s5, %s6232_s4 }
  0x38   : > { %v4667_v3 = vld [vmem:[#allocation6 + $0x1e0] sm:$0xf]  ;;  %v4540_v4 = vor.u32 %v5515_v2, %v4539_v1  ;;  %v5547_v5 = vld [vmem:[#allocation6 + $0x1ec] sm:$0xf0]  ;;  %s277_s12 = scalar_lea.vmem [#allocation9], %s6307_s7  ;;  %s4327_s17 = sshll.u32 %s4323_s11, 4  ;;  %s4328_s17 = int_to_ptr.hbm [resolvable:$true] %s4327_s17 }
  0x39   : > { %v4795_v6 = vld [vmem:[#allocation6 + $0x2e0] sm:$0xf]  ;;  %v5579_v7 = vld [vmem:[#allocation6 + $0x2ec] sm:$0xf0]  ;;  %v4668_v8 = vor.u32 %v5547_v5, %v4667_v3  ;;  %s4325_s16 = sshll.u32 %s277_s12, 4  ;;  %s4315_s27 = scalar_lea.sflag [#allocation5], %s6307_s7  ;;  %s4326_s16 = int_to_ptr.vmem [resolvable:$true] %s4325_s16 }
  0x3a   : > { %v4796_v9 = vor.u32 %v5579_v7, %v4795_v6  ;;  %v4923_v10 = vld [vmem:[#allocation6 + $0x3e0] sm:$0xf]  ;;  %v5611_v11 = vld [vmem:[#allocation6 + $0x3ec] sm:$0xf0]  ;;  %2017 = vmatpush.bf16.msra.mxu0 %v4540_v4  ;;  %s6113_s28 = sshra.s32 %s4328_s17, 4  ;;  %s6119_s4 = scalar_lea.hbm %s7616_s5, 2  ;;  %s6114_s28 = int_to_ptr.hbm [resolvable:$true] %s6113_s28 }
  0x3b   : > { %v4523_v12 = vld [vmem:[#allocation6 + $0xc0] sm:$0xf]  ;;  %v4924_v13 = vor.u32 %v5611_v11, %v4923_v10  ;;  %v5511_v14 = vld [vmem:[#allocation6 + $0xcc] sm:$0xf0]  ;;  %2066 = vmatpush.bf16.msra.mxu1 %v4668_v8  ;;  %s6115_s29 = scalar_lea.hbm %s6114_s28, 1  ;;  %p6120_p11 = scmp.lt.s32.totalorder %s6114_s28, %s7616_s5 }
  0x3c   : > { %v4651_v15 = vld [vmem:[#allocation6 + $0x1c0] sm:$0xf]  ;;  %v5543_v16 = vld [vmem:[#allocation6 + $0x1cc] sm:$0xf0]  ;;  %2115 = vmatpush.bf16.msra.mxu2 %v4796_v9  ;;  %v4524_v17 = vor.u32 %v5511_v14, %v4523_v12  ;;  %p6116_p1 = scmp.ne.s32.totalorder %s6114_s28, %s6115_s29  ;;  %p6121_p2 = scmp.lt.s32.totalorder %s6119_s4, %s6115_s29 }
  0x3d   : > { %v4652_v18 = vor.u32 %v5543_v16, %v4651_v15  ;;  %v4779_v19 = vld [vmem:[#allocation6 + $0x2c0] sm:$0xf]  ;;  %v5575_v20 = vld [vmem:[#allocation6 + $0x2cc] sm:$0xf0]  ;;  %2164 = vmatpush.bf16.msra.mxu3 %v4924_v13 }
  0x3e   : > { %v4907_v21 = vld [vmem:[#allocation6 + $0x3c0] sm:$0xf]  ;;  %v4780_v22 = vor.u32 %v5575_v20, %v4779_v19  ;;  %v5607_v23 = vld [vmem:[#allocation6 + $0x3cc] sm:$0xf0]  ;;  %2018 = vmatpush.bf16.msra.mxu0 %v4524_v17  ;;  %p6117_p4 = pnand %p6116_p1, %p6277_p3  ;;  %p6122_p9 = por %p6121_p2, %p6120_p11 }
  0x3f   : > { %v4507_v24 = vld [vmem:[#allocation6 + $0xa0] sm:$0xf]  ;;  %v5507_v25 = vld [vmem:[#allocation6 + $0xac] sm:$0xf0]  ;;  %v4908_v26 = vor.u32 %v5607_v23, %v4907_v21  ;;  %2067 = vmatpush.bf16.msra.mxu1 %v4652_v18 }
  0x40   : > { %v4635_v27 = vld [vmem:[#allocation6 + $0x1a0] sm:$0xf]  ;;  %v5539_v28 = vld [vmem:[#allocation6 + $0x1ac] sm:$0xf0]  ;;  %v4508_v30 = vor.u32 %v5507_v25, %v4507_v24  ;;  %2116 = vmatpush.bf16.msra.mxu2 %v4780_v22  ;;  %p6118_p8 = pneg %p6117_p4 }
  0x41   : > { %v4763_v29 = vld [vmem:[#allocation6 + $0x2a0] sm:$0xf]  ;;  %v5571_v31 = vld [vmem:[#allocation6 + $0x2ac] sm:$0xf0]  ;;  %v4636_v34 = vor.u32 %v5539_v28, %v4635_v27  ;;  %2165 = vmatpush.bf16.msra.mxu3 %v4908_v26 }
  0x42   : > { %v4891_v32 = vld [vmem:[#allocation6 + $0x3a0] sm:$0xf]  ;;  %v5603_v33 = vld [vmem:[#allocation6 + $0x3ac] sm:$0xf0]  ;;  %v4764_v35 = vor.u32 %v5571_v31, %v4763_v29  ;;  %2019 = vmatpush.bf16.msra.mxu0 %v4508_v30  ;;  %p6123_p10 = pnand %p6122_p9, %p6118_p8 }
  0x43   : > { %v4491_v36 = vld [vmem:[#allocation6 + $0x80] sm:$0xf]  ;;  %v5503_v37 = vld [vmem:[#allocation6 + $0x8c] sm:$0xf0]  ;;  %v4892_v39 = vor.u32 %v5603_v33, %v4891_v32  ;;  %2068 = vmatpush.bf16.msra.mxu1 %v4636_v34  ;;  %v280_v32 = vld [vmem:[%s6311_s14 + $0x8] sm:$0xff] }
  0x44   : > { %v4619_v38 = vld [vmem:[#allocation6 + $0x180] sm:$0xf]  ;;  %v5535_v40 = vld [vmem:[#allocation6 + $0x18c] sm:$0xf0]  ;;  %v4492_v45 = vor.u32 %v5503_v37, %v4491_v36  ;;  %2117 = vmatpush.bf16.msra.mxu2 %v4764_v35  ;;  %v288_v35 = vld [vmem:[%s6311_s14 + $0x48] sm:$0xff] }
  0x45   : > { %v4747_v41 = vld [vmem:[#allocation6 + $0x280] sm:$0xf]  ;;  %v5567_v42 = vld [vmem:[#allocation6 + $0x28c] sm:$0xf0]  ;;  %v4620_v46 = vor.u32 %v5535_v40, %v4619_v38  ;;  %2166 = vmatpush.bf16.msra.mxu3 %v4892_v39  ;;  %v282_v39 = vld [vmem:[%s6311_s14 + $0x18] sm:$0xff] }
  0x46   : > { %v4875_v43 = vld [vmem:[#allocation6 + $0x380] sm:$0xf]  ;;  %v5599_v44 = vld [vmem:[#allocation6 + $0x38c] sm:$0xf0]  ;;  %v4748_v47 = vor.u32 %v5567_v42, %v4747_v41  ;;  %2020 = vmatpush.bf16.msra.mxu0 %v4492_v45  ;;  %v290_v40 = vld [vmem:[%s6311_s14 + $0x58] sm:$0xff]  ;;  %v6331_v42 = vpack.c.bf16 %v288_v35, %v280_v32 }
  0x47   : > { %v4475_v48 = vld [vmem:[#allocation6 + $0x60] sm:$0xf]  ;;  %v5499_v49 = vld [vmem:[#allocation6 + $0x6c] sm:$0xf0]  ;;  %v4876_v51 = vor.u32 %v5599_v44, %v4875_v43  ;;  %2069 = vmatpush.bf16.msra.mxu1 %v4620_v46  ;;  %v6335_v44 = vpack.c.bf16 %v290_v40, %v282_v39 }
  0x48   : > { %v4603_v50 = vld [vmem:[#allocation6 + $0x160] sm:$0xf]  ;;  %v5531_v52 = vld [vmem:[#allocation6 + $0x16c] sm:$0xf0]  ;;  %v4476_v57 = vor.u32 %v5499_v49, %v4475_v48  ;;  %2118 = vmatpush.bf16.msra.mxu2 %v4748_v47  ;;  %v296_v47 = vld [vmem:[%s6311_s14 + $0x88] sm:$0xff] }
  0x49   : > { %v4731_v53 = vld [vmem:[#allocation6 + $0x260] sm:$0xf]  ;;  %v5563_v54 = vld [vmem:[#allocation6 + $0x26c] sm:$0xf0]  ;;  %v4604_v58 = vor.u32 %v5531_v52, %v4603_v50  ;;  %2167 = vmatpush.bf16.msra.mxu3 %v4876_v51  ;;  %v304_v48 = vld [vmem:[%s6311_s14 + $0xc8] sm:$0xff] }
  0x4a   : > { %v4859_v55 = vld [vmem:[#allocation6 + $0x360] sm:$0xf]  ;;  %v5595_v56 = vld [vmem:[#allocation6 + $0x36c] sm:$0xf0]  ;;  %v4732_v59 = vor.u32 %v5563_v54, %v4731_v53  ;;  %2021 = vmatpush.bf16.msra.mxu0 %v4476_v57  ;;  %v298_v51 = vld [vmem:[%s6311_s14 + $0x98] sm:$0xff]  ;;  %v6351_v54 = vpack.c.bf16 %v304_v48, %v296_v47 }
  0x4b   : > { %v4459_v60 = vld [vmem:[#allocation6 + $0x40] sm:$0xf]  ;;  %v5495_v61 = vld [vmem:[#allocation6 + $0x4c] sm:$0xf0]  ;;  %v4860_v63 = vor.u32 %v5595_v56, %v4859_v55  ;;  %2070 = vmatpush.bf16.msra.mxu1 %v4604_v58  ;;  %v306_v52 = vld [vmem:[%s6311_s14 + $0xd8] sm:$0xff] }
  0x4c   : > { %v4587_v62 = vld [vmem:[#allocation6 + $0x140] sm:$0xf]  ;;  %v5527_v0 = vld [vmem:[#allocation6 + $0x14c] sm:$0xf0]  ;;  %v4460_v5 = vor.u32 %v5495_v61, %v4459_v60  ;;  %2119 = vmatpush.bf16.msra.mxu2 %v4732_v59  ;;  %v6355_v56 = vpack.c.bf16 %v306_v52, %v298_v51  ;;  %v312_v59 = vld [vmem:[%s6311_s14 + $0x108] sm:$0xff] }
  0x4d   : > { %v4715_v1 = vld [vmem:[#allocation6 + $0x240] sm:$0xf]  ;;  %v5559_v2 = vld [vmem:[#allocation6 + $0x24c] sm:$0xf0]  ;;  %v4588_v6 = vor.u32 %v5527_v0, %v4587_v62  ;;  %2168 = vmatpush.bf16.msra.mxu3 %v4860_v63  ;;  %v320_v60 = vld [vmem:[%s6311_s14 + $0x148] sm:$0xff] }
  0x4e   : > { %v4843_v3 = vld [vmem:[#allocation6 + $0x340] sm:$0xf]  ;;  %v5591_v4 = vld [vmem:[#allocation6 + $0x34c] sm:$0xf0]  ;;  %v4716_v7 = vor.u32 %v5559_v2, %v4715_v1  ;;  %2022 = vmatpush.bf16.msra.mxu0 %v4460_v5  ;;  %v314_v63 = vld [vmem:[%s6311_s14 + $0x118] sm:$0xff]  ;;  %v6371_v2 = vpack.c.bf16 %v320_v60, %v312_v59 }
  0x4f   : > { %v4443_v8 = vld [vmem:[#allocation6 + $0x20] sm:$0xf]  ;;  %v5491_v9 = vld [vmem:[#allocation6 + $0x2c] sm:$0xf0]  ;;  %v4844_v11 = vor.u32 %v5591_v4, %v4843_v3  ;;  %2071 = vmatpush.bf16.msra.mxu1 %v4588_v6  ;;  %v322_v0 = vld [vmem:[%s6311_s14 + $0x158] sm:$0xff] }
  0x50   : > { %v4571_v10 = vld [vmem:[#allocation6 + $0x120] sm:$0xf]  ;;  %v5523_v12 = vld [vmem:[#allocation6 + $0x12c] sm:$0xf0]  ;;  %v4444_v17 = vor.u32 %v5491_v9, %v4443_v8  ;;  %2120 = vmatpush.bf16.msra.mxu2 %v4716_v7  ;;  %v6375_v4 = vpack.c.bf16 %v322_v0, %v314_v63  ;;  %v344_v47 = vld [vmem:[%s6311_s14 + $0x208] sm:$0xff] }
  0x51   : > { %v4699_v13 = vld [vmem:[#allocation6 + $0x220] sm:$0xf]  ;;  %v5555_v14 = vld [vmem:[#allocation6 + $0x22c] sm:$0xf0]  ;;  %v4572_v18 = vor.u32 %v5523_v12, %v4571_v10  ;;  %2169 = vmatpush.bf16.msra.mxu3 %v4844_v11  ;;  %v352_v48 = vld [vmem:[%s6311_s14 + $0x248] sm:$0xff] }
  0x52   : > { %v4827_v15 = vld [vmem:[#allocation6 + $0x320] sm:$0xf]  ;;  %v5587_v16 = vld [vmem:[#allocation6 + $0x32c] sm:$0xf0]  ;;  %v4700_v19 = vor.u32 %v5555_v14, %v4699_v13  ;;  %2023 = vmatpush.bf16.msra.mxu0 %v4444_v17  ;;  %v346_v51 = vld [vmem:[%s6311_s14 + $0x218] sm:$0xff] }
  0x53   : > { %v4427_v20 = vld [vmem:[#allocation6] sm:$0xf]  ;;  %v5487_v21 = vld [vmem:[#allocation6 + $0xc] sm:$0xf0]  ;;  %v4828_v23 = vor.u32 %v5587_v16, %v4827_v15  ;;  %2072 = vmatpush.bf16.msra.mxu1 %v4572_v18  ;;  %v354_v52 = vld [vmem:[%s6311_s14 + $0x258] sm:$0xff] }
  0x54   : > { %v4555_v22 = vld [vmem:[#allocation6 + $0x100] sm:$0xf]  ;;  %v5519_v24 = vld [vmem:[#allocation6 + $0x10c] sm:$0xf0]  ;;  %v4428_v29 = vor.u32 %v5487_v21, %v4427_v20  ;;  %2121 = vmatpush.bf16.msra.mxu2 %v4700_v19  ;;  %v328_v19 = vld [vmem:[%s6311_s14 + $0x188] sm:$0xff]  ;;  %v6415_v60 = vpack.c.bf16 %v354_v52, %v346_v51 }
  0x55   : > { %v4683_v25 = vld [vmem:[#allocation6 + $0x200] sm:$0xf]  ;;  %v5551_v26 = vld [vmem:[#allocation6 + $0x20c] sm:$0xf0]  ;;  %v4556_v33 = vor.u32 %v5519_v24, %v4555_v22  ;;  %2170 = vmatpush.bf16.msra.mxu3 %v4828_v23  ;;  %v336_v20 = vld [vmem:[%s6311_s14 + $0x1c8] sm:$0xff] }
  0x56   : > { %v4811_v27 = vld [vmem:[#allocation6 + $0x300] sm:$0xf]  ;;  %v5583_v28 = vld [vmem:[#allocation6 + $0x30c] sm:$0xf0]  ;;  %v4684_v34 = vor.u32 %v5551_v26, %v4683_v25  ;;  %2024 = vmatpush.bf16.msra.mxu0 %v4428_v29  ;;  %v330_v23 = vld [vmem:[%s6311_s14 + $0x198] sm:$0xff]  ;;  %v6391_v26 = vpack.c.bf16 %v336_v20, %v328_v19 }
  0x57   : > { %v279_v30 = vld [vmem:[%s6311_s14] sm:$0xff]  ;;  %v281_v36 = vld [vmem:[%s6311_s14 + $0x10] sm:$0xff]  ;;  %v4812_v38 = vor.u32 %v5583_v28, %v4811_v27  ;;  %2073 = vmatpush.bf16.msra.mxu1 %v4556_v33  ;;  %v338_v24 = vld [vmem:[%s6311_s14 + $0x1d8] sm:$0xff] }
  0x58   : > { %v287_v31 = vld [vmem:[%s6311_s14 + $0x40] sm:$0xff]  ;;  %v289_v37 = vld [vmem:[%s6311_s14 + $0x50] sm:$0xff]  ;;  %2122 = vmatpush.bf16.msra.mxu2 %v4684_v34  ;;  %v6395_v28 = vpack.c.bf16 %v338_v24, %v330_v23 }
  0x59   : > { %v6329_v41 = vpack.c.bf16 %v287_v31, %v279_v30  ;;  %v6333_v43 = vpack.c.bf16 %v289_v37, %v281_v36  ;;  %2171 = vmatpush.bf16.msra.mxu3 %v4812_v38  ;;  %v295_v45 = vld [vmem:[%s6311_s14 + $0x80] sm:$0xff]  ;;  %v297_v49 = vld [vmem:[%s6311_s14 + $0x90] sm:$0xff] }
  0x5a   : > { %2074 = vmatmul.bf16.vlgmr.msra.gmra.mxu1 %v6331_v42  ;;  %v303_v46 = vld [vmem:[%s6311_s14 + $0xc0] sm:$0xff]  ;;  %v305_v50 = vld [vmem:[%s6311_s14 + $0xd0] sm:$0xff] }
  0x5b   : > { %2025 = vmatmul.bf16.vlgmr.msra.gmra.mxu0 %v6329_v41  ;;  %2123 = vmatmul.bf16.vlgmr.msra.gmra.mxu2 %v6333_v43  ;;  %v6349_v53 = vpack.c.bf16 %v303_v46, %v295_v45  ;;  %v6353_v55 = vpack.c.bf16 %v305_v50, %v297_v49  ;;  %v311_v57 = vld [vmem:[%s6311_s14 + $0x100] sm:$0xff]  ;;  %v313_v61 = vld [vmem:[%s6311_s14 + $0x110] sm:$0xff] }
  0x5c   : > { %2172 = vmatmul.bf16.vlgmr.msra.gmra.mxu3 %v6335_v44  ;;  %v319_v58 = vld [vmem:[%s6311_s14 + $0x140] sm:$0xff]  ;;  %v321_v62 = vld [vmem:[%s6311_s14 + $0x150] sm:$0xff] }
  0x5d   : > { %v6369_v1 = vpack.c.bf16 %v319_v58, %v311_v57  ;;  %v6373_v3 = vpack.c.bf16 %v321_v62, %v313_v61  ;;  %v5307_v5 = vld [vmem:[#allocation6 + $0x6e0] sm:$0xf]  ;;  %v5707_v6 = vld [vmem:[#allocation6 + $0x6ec] sm:$0xf0]  ;;  %v6411_v58 = vpack.c.bf16 %v352_v48, %v344_v47 }
  0x5e   : > { %v5051_v7 = vld [vmem:[#allocation6 + $0x4e0] sm:$0xf]  ;;  %v5308_v8 = vor.u32 %v5707_v6, %v5307_v5  ;;  %v5643_v9 = vld [vmem:[#allocation6 + $0x4ec] sm:$0xf0] }
  0x5f   : > { %v5435_v10 = vld [vmem:[#allocation6 + $0x7e0] sm:$0xf]  ;;  %v5739_v11 = vld [vmem:[#allocation6 + $0x7ec] sm:$0xf0]  ;;  %v5052_v12 = vor.u32 %v5643_v9, %v5051_v7 }
  0x60   : > { %v5436_v13 = vor.u32 %v5739_v11, %v5435_v10  ;;  %v5179_v14 = vld [vmem:[#allocation6 + $0x5e0] sm:$0xf]  ;;  %v5675_v15 = vld [vmem:[#allocation6 + $0x5ec] sm:$0xf0]  ;;  %2311 = vmatpush.bf16.msrb.mxu2 %v5308_v8 }
  0x61   : > { %v5180_v16 = vor.u32 %v5675_v15, %v5179_v14  ;;  %2213 = vmatpush.bf16.msrb.mxu0 %v5052_v12  ;;  %v327_v17 = vld [vmem:[%s6311_s14 + $0x180] sm:$0xff]  ;;  %v329_v21 = vld [vmem:[%s6311_s14 + $0x190] sm:$0xff] }
  0x62   : > { %2360 = vmatpush.bf16.msrb.mxu3 %v5436_v13  ;;  %v335_v18 = vld [vmem:[%s6311_s14 + $0x1c0] sm:$0xff]  ;;  %v337_v22 = vld [vmem:[%s6311_s14 + $0x1d0] sm:$0xff] }
  0x63   : > { %2262 = vmatpush.bf16.msrb.mxu1 %v5180_v16  ;;  %v6389_v25 = vpack.c.bf16 %v335_v18, %v327_v17  ;;  %v6393_v27 = vpack.c.bf16 %v337_v22, %v329_v21  ;;  %v5291_v29 = vld [vmem:[#allocation6 + $0x6c0] sm:$0xf]  ;;  %v5703_v30 = vld [vmem:[#allocation6 + $0x6cc] sm:$0xf0] }
  0x64   : > { %v5035_v31 = vld [vmem:[#allocation6 + $0x4c0] sm:$0xf]  ;;  %v5292_v32 = vor.u32 %v5703_v30, %v5291_v29  ;;  %v5639_v33 = vld [vmem:[#allocation6 + $0x4cc] sm:$0xf0] }
  0x65   : > { %v5419_v34 = vld [vmem:[#allocation6 + $0x7c0] sm:$0xf]  ;;  %v5735_v35 = vld [vmem:[#allocation6 + $0x7cc] sm:$0xf0]  ;;  %v5036_v36 = vor.u32 %v5639_v33, %v5035_v31  ;;  %v360_v31 = vld [vmem:[%s6311_s14 + $0x288] sm:$0xff] }
  0x66   : > { %v5420_v37 = vor.u32 %v5735_v35, %v5419_v34  ;;  %v5163_v38 = vld [vmem:[#allocation6 + $0x5c0] sm:$0xf]  ;;  %v5671_v39 = vld [vmem:[#allocation6 + $0x5cc] sm:$0xf0]  ;;  %2312 = vmatpush.bf16.msrb.mxu2 %v5292_v32  ;;  %v368_v32 = vld [vmem:[%s6311_s14 + $0x2c8] sm:$0xff] }
  0x67   : > { %v5164_v40 = vor.u32 %v5671_v39, %v5163_v38  ;;  %2214 = vmatpush.bf16.msrb.mxu0 %v5036_v36  ;;  %v343_v45 = vld [vmem:[%s6311_s14 + $0x200] sm:$0xff]  ;;  %v345_v49 = vld [vmem:[%s6311_s14 + $0x210] sm:$0xff]  ;;  %v362_v35 = vld [vmem:[%s6311_s14 + $0x298] sm:$0xff]  ;;  %v6431_v38 = vpack.c.bf16 %v368_v32, %v360_v31 }
  0x68   : > { %2361 = vmatpush.bf16.msrb.mxu3 %v5420_v37  ;;  %v351_v46 = vld [vmem:[%s6311_s14 + $0x240] sm:$0xff]  ;;  %v353_v50 = vld [vmem:[%s6311_s14 + $0x250] sm:$0xff]  ;;  %v370_v36 = vld [vmem:[%s6311_s14 + $0x2d8] sm:$0xff] }
  0x69   : > { %2263 = vmatpush.bf16.msrb.mxu1 %v5164_v40  ;;  %v6409_v57 = vpack.c.bf16 %v351_v46, %v343_v45  ;;  %v6413_v59 = vpack.c.bf16 %v353_v50, %v345_v49  ;;  %v5275_v61 = vld [vmem:[#allocation6 + $0x6a0] sm:$0xf]  ;;  %v5699_v62 = vld [vmem:[#allocation6 + $0x6ac] sm:$0xf0]  ;;  %7695 = vst [vmem:[#allocation14_spill] sm:$0xff] %v6431_v38  ;;  %v6435_v40 = vpack.c.bf16 %v370_v36, %v362_v35  ;;  %v376_v32 = vld [vmem:[%s6311_s14 + $0x308] sm:$0xff] }
  0x6a   : > { %2079 = vmatmul.bf16.gmra.mxu1 %v6351_v54  ;;  %v5019_v63 = vld [vmem:[#allocation6 + $0x4a0] sm:$0xf]  ;;  %v5276_v0 = vor.u32 %v5699_v62, %v5275_v61  ;;  %v5635_v5 = vld [vmem:[#allocation6 + $0x4ac] sm:$0xf0]  ;;  %v384_v35 = vld [vmem:[%s6311_s14 + $0x348] sm:$0xff] }
  0x6b   : > { %2030 = vmatmul.bf16.gmra.mxu0 %v6349_v53  ;;  %2128 = vmatmul.bf16.gmra.mxu2 %v6353_v55  ;;  %v5403_v6 = vld [vmem:[#allocation6 + $0x7a0] sm:$0xf]  ;;  %v5731_v7 = vld [vmem:[#allocation6 + $0x7ac] sm:$0xf0]  ;;  %v5020_v8 = vor.u32 %v5635_v5, %v5019_v63  ;;  %7697 = vst [vmem:[#allocation16_spill] sm:$0xff] %v6435_v40 }
  0x6c   : > { %2177 = vmatmul.bf16.gmra.mxu3 %v6355_v56  ;;  %v5404_v9 = vor.u32 %v5731_v7, %v5403_v6  ;;  %v5147_v10 = vld [vmem:[#allocation6 + $0x5a0] sm:$0xf]  ;;  %v5667_v11 = vld [vmem:[#allocation6 + $0x5ac] sm:$0xf0]  ;;  %2313 = vmatpush.bf16.msrb.mxu2 %v5276_v0 }
  0x6d   : > { %v5003_v12 = vld [vmem:[#allocation6 + $0x480] sm:$0xf]  ;;  %v5148_v13 = vor.u32 %v5667_v11, %v5147_v10  ;;  %v5631_v14 = vld [vmem:[#allocation6 + $0x48c] sm:$0xf0]  ;;  %2215 = vmatpush.bf16.msrb.mxu0 %v5020_v8 }
  0x6e   : > { %v5131_v15 = vld [vmem:[#allocation6 + $0x580] sm:$0xf]  ;;  %v5663_v16 = vld [vmem:[#allocation6 + $0x58c] sm:$0xf0]  ;;  %2362 = vmatpush.bf16.msrb.mxu3 %v5404_v9  ;;  %v5004_v17 = vor.u32 %v5631_v14, %v5003_v12 }
  0x6f   : > { %v5259_v18 = vld [vmem:[#allocation6 + $0x680] sm:$0xf]  ;;  %v5695_v19 = vld [vmem:[#allocation6 + $0x68c] sm:$0xf0]  ;;  %2264 = vmatpush.bf16.msrb.mxu1 %v5148_v13  ;;  %v5132_v21 = vor.u32 %v5663_v16, %v5131_v15 }
  0x70   : > { %v5387_v20 = vld [vmem:[#allocation6 + $0x780] sm:$0xf]  ;;  %v5260_v22 = vor.u32 %v5695_v19, %v5259_v18  ;;  %v5727_v23 = vld [vmem:[#allocation6 + $0x78c] sm:$0xf0] }
  0x71   : > { %v5388_v24 = vor.u32 %v5727_v23, %v5387_v20  ;;  %v359_v29 = vld [vmem:[%s6311_s14 + $0x280] sm:$0xff]  ;;  %v361_v33 = vld [vmem:[%s6311_s14 + $0x290] sm:$0xff]  ;;  %2216 = vmatpush.bf16.msrb.mxu0 %v5004_v17 }
  0x72   : > { %v367_v30 = vld [vmem:[%s6311_s14 + $0x2c0] sm:$0xff]  ;;  %2314 = vmatpush.bf16.msrb.mxu2 %v5260_v22  ;;  %v369_v34 = vld [vmem:[%s6311_s14 + $0x2d0] sm:$0xff] }
  0x73   : > { %2363 = vmatpush.bf16.msrb.mxu3 %v5388_v24  ;;  %2265 = vmatpush.bf16.msrb.mxu1 %v5132_v21  ;;  %v6429_v37 = vpack.c.bf16 %v367_v30, %v359_v29  ;;  %v6433_v39 = vpack.c.bf16 %v369_v34, %v361_v33  ;;  %v4987_v45 = vld [vmem:[#allocation6 + $0x460] sm:$0xf]  ;;  %v5627_v46 = vld [vmem:[#allocation6 + $0x46c] sm:$0xf0] }
  0x74   : > { %v5115_v47 = vld [vmem:[#allocation6 + $0x560] sm:$0xf]  ;;  %v4988_v48 = vor.u32 %v5627_v46, %v4987_v45  ;;  %v5659_v49 = vld [vmem:[#allocation6 + $0x56c] sm:$0xf0] }
  0x75   : > { %7694 = vst [vmem:[#allocation13_spill] sm:$0xff] %v6429_v37  ;;  %v5243_v50 = vld [vmem:[#allocation6 + $0x660] sm:$0xf]  ;;  %v5691_v51 = vld [vmem:[#allocation6 + $0x66c] sm:$0xf0]  ;;  %v5116_v52 = vor.u32 %v5659_v49, %v5115_v47  ;;  %v378_v47 = vld [vmem:[%s6311_s14 + $0x318] sm:$0xff] }
  0x76   : > { %7696 = vst [vmem:[#allocation15_spill] sm:$0xff] %v6433_v39  ;;  %v5244_v61 = vor.u32 %v5691_v51, %v5243_v50  ;;  %v5371_v62 = vld [vmem:[#allocation6 + $0x760] sm:$0xf]  ;;  %v5723_v63 = vld [vmem:[#allocation6 + $0x76c] sm:$0xf0]  ;;  %2217 = vmatpush.bf16.msrb.mxu0 %v4988_v48  ;;  %v386_v48 = vld [vmem:[%s6311_s14 + $0x358] sm:$0xff] }
  0x77   : > { %v4971_v0 = vld [vmem:[#allocation6 + $0x440] sm:$0xf]  ;;  %v5372_v5 = vor.u32 %v5723_v63, %v5371_v62  ;;  %v5623_v6 = vld [vmem:[#allocation6 + $0x44c] sm:$0xf0]  ;;  %2266 = vmatpush.bf16.msrb.mxu1 %v5116_v52 }
  0x78   : > { %v5099_v7 = vld [vmem:[#allocation6 + $0x540] sm:$0xf]  ;;  %v5655_v8 = vld [vmem:[#allocation6 + $0x54c] sm:$0xf0]  ;;  %2315 = vmatpush.bf16.msrb.mxu2 %v5244_v61  ;;  %v4972_v9 = vor.u32 %v5623_v6, %v4971_v0  ;;  %v6451_v61 = vpack.c.bf16 %v384_v35, %v376_v32  ;;  %v6455_v6 = vpack.c.bf16 %v386_v48, %v378_v47  ;;  %v284_v32 = vld [vmem:[%s6311_s14 + $0x28] sm:$0xff] }
  0x79   : > { %v5100_v10 = vor.u32 %v5655_v8, %v5099_v7  ;;  %v5227_v11 = vld [vmem:[#allocation6 + $0x640] sm:$0xf]  ;;  %v5687_v12 = vld [vmem:[#allocation6 + $0x64c] sm:$0xf0]  ;;  %2364 = vmatpush.bf16.msrb.mxu3 %v5372_v5 }
  0x7a   : > { %2084 = vmatmul.bf16.gmra.mxu1 %v6371_v2  ;;  %v5355_v13 = vld [vmem:[#allocation6 + $0x740] sm:$0xf]  ;;  %v5228_v14 = vor.u32 %v5687_v12, %v5227_v11  ;;  %v5719_v15 = vld [vmem:[#allocation6 + $0x74c] sm:$0xf0]  ;;  %2218 = vmatpush.bf16.msrb.mxu0 %v4972_v9  ;;  %7699 = vst [vmem:[#allocation18_spill] sm:$0xff] %v6451_v61 }
  0x7b   : > { %2035 = vmatmul.bf16.gmra.mxu0 %v6369_v1  ;;  %2133 = vmatmul.bf16.gmra.mxu2 %v6373_v3  ;;  %v4955_v16 = vld [vmem:[#allocation6 + $0x420] sm:$0xf]  ;;  %v5619_v17 = vld [vmem:[#allocation6 + $0x42c] sm:$0xf0]  ;;  %v5356_v18 = vor.u32 %v5719_v15, %v5355_v13  ;;  %7701 = vst [vmem:[#allocation20_spill] sm:$0xff] %v6455_v6  ;;  %v392_v15 = vld [vmem:[%s6311_s14 + $0x388] sm:$0xff] }
  0x7c   : > { %2182 = vmatmul.bf16.gmra.mxu3 %v6375_v4  ;;  %v5083_v19 = vld [vmem:[#allocation6 + $0x520] sm:$0xf]  ;;  %v5651_v20 = vld [vmem:[#allocation6 + $0x52c] sm:$0xf0]  ;;  %v4956_v22 = vor.u32 %v5619_v17, %v4955_v16  ;;  %2267 = vmatpush.bf16.msrb.mxu1 %v5100_v10  ;;  %v400_v16 = vld [vmem:[%s6311_s14 + $0x3c8] sm:$0xff] }
  0x7d   : > { %v5211_v21 = vld [vmem:[#allocation6 + $0x620] sm:$0xf]  ;;  %v5683_v23 = vld [vmem:[#allocation6 + $0x62c] sm:$0xf0]  ;;  %2316 = vmatpush.bf16.msrb.mxu2 %v5228_v14  ;;  %v5084_v33 = vor.u32 %v5651_v20, %v5083_v19  ;;  %2365 = vmatpush.bf16.msrb.mxu3 %v5356_v18  ;;  %v394_v19 = vld [vmem:[%s6311_s14 + $0x398] sm:$0xff] }
  0x7e   : > { %v5339_v24 = vld [vmem:[#allocation6 + $0x720] sm:$0xf]  ;;  %v5715_v29 = vld [vmem:[#allocation6 + $0x72c] sm:$0xf0]  ;;  %v5212_v34 = vor.u32 %v5683_v23, %v5211_v21  ;;  %2219 = vmatpush.bf16.msrb.mxu0 %v4956_v22  ;;  %v402_v20 = vld [vmem:[%s6311_s14 + $0x3d8] sm:$0xff]  ;;  %v6471_v22 = vpack.c.bf16 %v400_v16, %v392_v15 }
  0x7f   : > { %v375_v30 = vld [vmem:[%s6311_s14 + $0x300] sm:$0xff]  ;;  %v377_v36 = vld [vmem:[%s6311_s14 + $0x310] sm:$0xff]  ;;  %v5340_v46 = vor.u32 %v5715_v29, %v5339_v24  ;;  %v6475_v24 = vpack.c.bf16 %v402_v20, %v394_v19 }
  0x80   : > { %v383_v31 = vld [vmem:[%s6311_s14 + $0x340] sm:$0xff]  ;;  %v385_v45 = vld [vmem:[%s6311_s14 + $0x350] sm:$0xff]  ;;  %2268 = vmatpush.bf16.msrb.mxu1 %v5084_v33  ;;  %7703 = vst [vmem:[#allocation22_spill] sm:$0xff] %v6471_v22 }
  0x81   : > { %v6449_v49 = vpack.c.bf16 %v383_v31, %v375_v30  ;;  %v4939_v50 = vld [vmem:[#allocation6 + $0x400] sm:$0xf]  ;;  %v5615_v51 = vld [vmem:[#allocation6 + $0x40c] sm:$0xf0]  ;;  %v6453_v62 = vpack.c.bf16 %v385_v45, %v377_v36  ;;  %2317 = vmatpush.bf16.msrb.mxu2 %v5212_v34  ;;  %2366 = vmatpush.bf16.msrb.mxu3 %v5340_v46  ;;  %7705 = vst [vmem:[#allocation24_spill] sm:$0xff] %v6475_v24  ;;  %v292_v34 = vld [vmem:[%s6311_s14 + $0x68] sm:$0xff] }
  0x82   : > { %v5067_v52 = vld [vmem:[#allocation6 + $0x500] sm:$0xf]  ;;  %v5647_v63 = vld [vmem:[#allocation6 + $0x50c] sm:$0xf0]  ;;  %v4940_v7 = vor.u32 %v5615_v51, %v4939_v50  ;;  %v286_v45 = vld [vmem:[%s6311_s14 + $0x38] sm:$0xff]  ;;  %v6493_v50 = vpack.c.bf16 %v292_v34, %v284_v32 }
  0x83   : > { %7698 = vst [vmem:[#allocation17_spill] sm:$0xff] %v6449_v49  ;;  %v5195_v0 = vld [vmem:[#allocation6 + $0x600] sm:$0xf]  ;;  %v5679_v5 = vld [vmem:[#allocation6 + $0x60c] sm:$0xf0]  ;;  %v5068_v10 = vor.u32 %v5647_v63, %v5067_v52  ;;  %v294_v46 = vld [vmem:[%s6311_s14 + $0x78] sm:$0xff] }
  0x84   : > { %7700 = vst [vmem:[#allocation19_spill] sm:$0xff] %v6453_v62  ;;  %v5323_v8 = vld [vmem:[#allocation6 + $0x700] sm:$0xf]  ;;  %v5711_v9 = vld [vmem:[#allocation6 + $0x70c] sm:$0xf0]  ;;  %v5196_v11 = vor.u32 %v5679_v5, %v5195_v0  ;;  %2220 = vmatpush.bf16.msrb.mxu0 %v4940_v7  ;;  %v6498_v0 = vpack.c.bf16 %v294_v46, %v286_v45 }
  0x85   : > { %v5324_v12 = vor.u32 %v5711_v9, %v5323_v8  ;;  %2269 = vmatpush.bf16.msrb.mxu1 %v5068_v10  ;;  %v391_v13 = vld [vmem:[%s6311_s14 + $0x380] sm:$0xff]  ;;  %v393_v17 = vld [vmem:[%s6311_s14 + $0x390] sm:$0xff]  ;;  %7707 = vst [vmem:[#allocation26_spill] sm:$0xff] %v6493_v50 }
  0x86   : > { %2318 = vmatpush.bf16.msrb.mxu2 %v5196_v11  ;;  %v399_v14 = vld [vmem:[%s6311_s14 + $0x3c0] sm:$0xff]  ;;  %v401_v18 = vld [vmem:[%s6311_s14 + $0x3d0] sm:$0xff]  ;;  %7709 = vst [vmem:[#allocation28_spill] sm:$0xff] %v6498_v0 }
  0x87   : > { %2367 = vmatpush.bf16.msrb.mxu3 %v5324_v12  ;;  %v6469_v21 = vpack.c.bf16 %v399_v14, %v391_v13  ;;  %v6473_v23 = vpack.c.bf16 %v401_v18, %v393_v17  ;;  %v727_v29 = vld [vmem:[#allocation8] sm:$0xf]  ;;  %v285_v35 = vld [vmem:[%s6311_s14 + $0x30] sm:$0xff]  ;;  %v300_v17 = vld [vmem:[%s6311_s14 + $0xa8] sm:$0xff] }
  0x88   : > { %v283_v30 = vld [vmem:[%s6311_s14 + $0x20] sm:$0xff]  ;;  %v6484_v33 = vperm.slane %v727_v29, 0  ;;  %v293_v36 = vld [vmem:[%s6311_s14 + $0x70] sm:$0xff]  ;;  %v308_v18 = vld [vmem:[%s6311_s14 + $0xe8] sm:$0xff] }
  0x89   : > { %7702 = vst [vmem:[#allocation21_spill] sm:$0xff] %v6469_v21  ;;  %v291_v31 = vld [vmem:[%s6311_s14 + $0x60] sm:$0xff]  ;;  %v6495_v51 = vpack.c.bf16 %v293_v36, %v285_v35  ;;  %v301_v19 = vld [vmem:[%s6311_s14 + $0xb0] sm:$0xff]  ;;  %v302_v29 = vld [vmem:[%s6311_s14 + $0xb8] sm:$0xff]  ;;  %v6517_v45 = vpack.c.bf16 %v308_v18, %v300_v17 }
  0x8a   : > { %2089 = vmatmul.bf16.gmra.mxu1 %v6391_v26  ;;  %7704 = vst [vmem:[#allocation23_spill] sm:$0xff] %v6473_v23  ;;  %v6491_v47 = vpack.c.bf16 %v291_v31, %v283_v30  ;;  %v299_v15 = vld [vmem:[%s6311_s14 + $0xa0] sm:$0xff]  ;;  %v309_v20 = vld [vmem:[%s6311_s14 + $0xf0] sm:$0xff]  ;;  %v310_v30 = vld [vmem:[%s6311_s14 + $0xf8] sm:$0xff] }
  0x8b   : > { %2040 = vmatmul.bf16.gmra.mxu0 %v6389_v25  ;;  %2138 = vmatmul.bf16.gmra.mxu2 %v6393_v27  ;;  %7708 = vst [vmem:[#allocation27_spill] sm:$0xff] %v6495_v51  ;;  %v307_v16 = vld [vmem:[%s6311_s14 + $0xe0] sm:$0xff]  ;;  %v6519_v46 = vpack.c.bf16 %v309_v20, %v301_v19  ;;  %v316_v19 = vld [vmem:[%s6311_s14 + $0x128] sm:$0xff] }
  0x8c   : > { %2187 = vmatmul.bf16.gmra.mxu3 %v6395_v28  ;;  %7706 = vst [vmem:[#allocation25_spill] sm:$0xff] %v6491_v47  ;;  %v6515_v32 = vpack.c.bf16 %v307_v16, %v299_v15  ;;  %v315_v17 = vld [vmem:[%s6311_s14 + $0x120] sm:$0xff]  ;;  %v324_v20 = vld [vmem:[%s6311_s14 + $0x168] sm:$0xff] }
  0x8d   : > { %7711 = vst [vmem:[#allocation30_spill] sm:$0xff] %v6517_v45  ;;  %v323_v18 = vld [vmem:[%s6311_s14 + $0x160] sm:$0xff] }
  0x8e   : > { %7710 = vst [vmem:[#allocation29_spill] sm:$0xff] %v6515_v32 }
  0x8f   : > { %7712 = vst [vmem:[#allocation31_spill] sm:$0xff] %v6519_v46 }
  0x9a   : > { %2094 = vmatmul.bf16.gmra.mxu1 %v6411_v58 }
  0x9b   : > { %2045 = vmatmul.bf16.gmra.mxu0 %v6409_v57  ;;  %2143 = vmatmul.bf16.gmra.mxu2 %v6413_v59 }
  0x9c   : > { %2192 = vmatmul.bf16.gmra.mxu3 %v6415_v60 }
  0xaa   : > { %2099 = vmatmul.bf16.gmra.mxu1 %v6431_v38 }
  0xab   : > { %2050 = vmatmul.bf16.gmra.mxu0 %v6429_v37  ;;  %2148 = vmatmul.bf16.gmra.mxu2 %v6433_v39 }
  0xac   : > { %2197 = vmatmul.bf16.gmra.mxu3 %v6435_v40 }
  0xba   : > { %2104 = vmatmul.bf16.gmra.mxu1 %v6451_v61 }
  0xbb   : > { %2055 = vmatmul.bf16.gmra.mxu0 %v6449_v49  ;;  %2153 = vmatmul.bf16.gmra.mxu2 %v6453_v62  ;;  %v4877_v62 = vld [vmem:[#allocation6 + $0x390] sm:$0xf0]  ;;  %v5485_v49 = vld [vmem:[#allocation6 + $0x4] sm:$0xf] }
  0xbc   : > { %2202 = vmatmul.bf16.gmra.mxu3 %v6455_v6  ;;  %v5597_v6 = vld [vmem:[#allocation6 + $0x384] sm:$0xf] }
  0xca   : > { %2109 = vmatmul.bf16.gmra.mxu1 %v6471_v22 }
  0xcb   : > { %2060 = vmatmul.bf16.gmra.mxu0 %v6469_v21  ;;  %2158 = vmatmul.bf16.gmra.mxu2 %v6473_v23 }
  0xcc   : > { %2207 = vmatmul.bf16.gmra.mxu3 %v6475_v24 }
  0xd7   : > { %v2075_v63 = vpop.f32.mrf.mxu1 }
  0xd8   : > { %v2026_v48 = vpop.f32.mrf.mxu0 }
  0xd9   : > { %v2027_v52 = vadd.f32 %v2026_v48, %v6484_v33 }
  0xda   : > { %2270 = vmatmul.bf16.vlgmr.msrb.gmra.mxu1 %v6493_v50 }
  0xdb   : > { %v2076_v5 = vadd.f32 %v2075_v63, %v2027_v52  ;;  %2221 = vmatmul.bf16.vlgmr.msrb.gmra.mxu0 %v6491_v47  ;;  %2319 = vmatmul.bf16.vlgmr.msrb.gmra.mxu2 %v6495_v51  ;;  %v6522_v63 = vpack.c.bf16 %v310_v30, %v302_v29  ;;  %v317_v29 = vld [vmem:[%s6311_s14 + $0x130] sm:$0xff] }
  0xdc   : > { %2368 = vmatmul.bf16.vlgmr.msrb.gmra.mxu3 %v6498_v0  ;;  %v325_v30 = vld [vmem:[%s6311_s14 + $0x170] sm:$0xff] }
  0xdd   : > { %7713 = vst [vmem:[#allocation32_spill] sm:$0xff] %v6522_v63 }
  0xde   : > { %v2124_v7 = vpop.f32.mrf.mxu2 }
  0xdf   : > { %v2125_v8 = vadd.f32 %v2124_v7, %v2076_v5  ;;  %v2173_v9 = vpop.f32.mrf.mxu3  ;;  %v2077_v12 = vpop.f32.mrf.mxu1 }
  0xe0   : > { %v2028_v10 = vpop.f32.mrf.mxu0 }
  0xe1   : > { %v2029_v11 = vadd.f32 %v2028_v10, %v6484_v33  ;;  %v6505_v13 = vadd.f32 %v2173_v9, %v2125_v8 }
  0xe3   : > { %v2078_v14 = vadd.f32 %v2077_v12, %v2029_v11 }
  0xe6   : > { %v2126_v31 = vpop.f32.mrf.mxu2 }
  0xe7   : > { %v2127_v34 = vadd.f32 %v2126_v31, %v2078_v14  ;;  %v2175_v35 = vpop.f32.mrf.mxu3  ;;  %v2080_v52 = vpop.f32.mrf.mxu1  ;;  %v318_v31 = vld [vmem:[%s6311_s14 + $0x138] sm:$0xff] }
  0xe8   : > { %v2031_v36 = vpop.f32.mrf.mxu0 }
  0xe9   : > { %v2032_v48 = vadd.f32 %v2031_v36, %v6484_v33  ;;  %v6524_v5 = vadd.f32 %v2175_v35, %v2127_v34  ;;  %v326_v34 = vld [vmem:[%s6311_s14 + $0x178] sm:$0xff]  ;;  %v6541_v36 = vpack.c.bf16 %v323_v18, %v315_v17  ;;  %v4797_v17 = vld [vmem:[#allocation6 + $0x2f0] sm:$0xf0] }
  0xea   : > { %2275 = vmatmul.bf16.gmra.mxu1 %v6517_v45 }
  0xeb   : > { %v2081_v7 = vadd.f32 %v2080_v52, %v2032_v48  ;;  %2226 = vmatmul.bf16.gmra.mxu0 %v6515_v32  ;;  %2324 = vmatmul.bf16.gmra.mxu2 %v6519_v46  ;;  %7714 = vst [vmem:[#allocation33_spill] sm:$0xff] %v6541_v36  ;;  %v342_v46 = vld [vmem:[%s6311_s14 + $0x1f8] sm:$0xff] }
  0xec   : > { %2373 = vmatmul.bf16.gmra.mxu3 %v6522_v63 }
  0xee   : > { %v2129_v8 = vpop.f32.mrf.mxu2 }
  0xef   : > { %v2130_v9 = vadd.f32 %v2129_v8, %v2081_v7  ;;  %v2178_v10 = vpop.f32.mrf.mxu3  ;;  %v2082_v14 = vpop.f32.mrf.mxu1  ;;  %v6543_v8 = vpack.c.bf16 %v324_v20, %v316_v19 }
  0xf0   : > { %v2033_v11 = vpop.f32.mrf.mxu0 }
  0xf1   : > { %v2034_v12 = vadd.f32 %v2033_v11, %v6484_v33  ;;  %v6531_v15 = vadd.f32 %v2178_v10, %v2130_v9  ;;  %7715 = vst [vmem:[#allocation34_spill] sm:$0xff] %v6543_v8  ;;  %v6545_v11 = vpack.c.bf16 %v325_v30, %v317_v29 }
  0xf3   : > { %v2083_v16 = vadd.f32 %v2082_v14, %v2034_v12  ;;  %7716 = vst [vmem:[#allocation35_spill] sm:$0xff] %v6545_v11  ;;  %v6548_v12 = vpack.c.bf16 %v326_v34, %v318_v31 }
  0xf5   : > { %7717 = vst [vmem:[#allocation36_spill] sm:$0xff] %v6548_v12 }
  0xf6   : > { %v2131_v35 = vpop.f32.mrf.mxu2 }
  0xf7   : > { %v2132_v48 = vadd.f32 %v2131_v35, %v2083_v16  ;;  %v2180_v52 = vpop.f32.mrf.mxu3  ;;  %v2085_v10 = vpop.f32.mrf.mxu1  ;;  %v5577_v16 = vld [vmem:[#allocation6 + $0x2e4] sm:$0xf] }
  0xf8   : > { %v2036_v7 = vpop.f32.mrf.mxu0  ;;  %v4800_v18 = vor.u32 %v5577_v16, %v4797_v17  ;;  %v5545_v16 = vld [vmem:[#allocation6 + $0x1e4] sm:$0xf]  ;;  %v4669_v17 = vld [vmem:[#allocation6 + $0x1f0] sm:$0xf0] }
  0xf9   : > { %v2037_v9 = vadd.f32 %v2036_v7, %v6484_v33  ;;  %v6550_v14 = vadd.f32 %v2180_v52, %v2132_v48  ;;  %v5513_v48 = vld [vmem:[#allocation6 + $0xe4] sm:$0xf]  ;;  %v4541_v52 = vld [vmem:[#allocation6 + $0xf0] sm:$0xf0] }
  0xfa   : > { %2280 = vmatmul.bf16.gmra.mxu1 %v6543_v8  ;;  %2507 = vmatpush.bf16.msra.mxu2 %v4800_v18  ;;  %v5609_v7 = vld [vmem:[#allocation6 + $0x3e4] sm:$0xf]  ;;  %v340_v8 = vld [vmem:[%s6311_s14 + $0x1e8] sm:$0xff] }
  0xfb   : > { %v2086_v63 = vadd.f32 %v2085_v10, %v2037_v9  ;;  %2231 = vmatmul.bf16.gmra.mxu0 %v6541_v36  ;;  %2329 = vmatmul.bf16.gmra.mxu2 %v6545_v11  ;;  %v4925_v10 = vld [vmem:[#allocation6 + $0x3f0] sm:$0xf0]  ;;  %v339_v18 = vld [vmem:[%s6311_s14 + $0x1e0] sm:$0xff]  ;;  %v4672_v11 = vor.u32 %v5545_v16, %v4669_v17 }
  0xfc   : > { %2378 = vmatmul.bf16.gmra.mxu3 %v6548_v12  ;;  %v332_v12 = vld [vmem:[%s6311_s14 + $0x1a8] sm:$0xff]  ;;  %v333_v36 = vld [vmem:[%s6311_s14 + $0x1b0] sm:$0xff] }
  0xfd   : > { %2458 = vmatpush.bf16.msra.mxu1 %v4672_v11 }
  0xfe   : > { %v2134_v19 = vpop.f32.mrf.mxu2 }
  0xff   : > { %v2135_v20 = vadd.f32 %v2134_v19, %v2086_v63  ;;  %v2183_v29 = vpop.f32.mrf.mxu3  ;;  %v2087_v34 = vpop.f32.mrf.mxu1  ;;  %v4544_v63 = vor.u32 %v5513_v48, %v4541_v52  ;;  %v331_v19 = vld [vmem:[%s6311_s14 + $0x1a0] sm:$0xff]  ;;  %v6569_v52 = vpack.c.bf16 %v340_v8, %v332_v12  ;;  %v4781_v8 = vld [vmem:[#allocation6 + $0x2d0] sm:$0xf0] }
 0x100   : > { %v2038_v30 = vpop.f32.mrf.mxu0  ;;  %v6567_v32 = vpack.c.bf16 %v339_v18, %v331_v19 }
 0x101   : > { %v2039_v31 = vadd.f32 %v2038_v30, %v6484_v33  ;;  %v6557_v35 = vadd.f32 %v2183_v29, %v2135_v20  ;;  %v4928_v30 = vor.u32 %v5609_v7, %v4925_v10  ;;  %v341_v20 = vld [vmem:[%s6311_s14 + $0x1f0] sm:$0xff]  ;;  %2409 = vmatpush.bf16.msra.mxu0 %v4544_v63  ;;  %v334_v29 = vld [vmem:[%s6311_s14 + $0x1b8] sm:$0xff]  ;;  %7719 = vst [vmem:[#allocation38_spill] sm:$0xff] %v6569_v52 }
 0x102   : > { %7718 = vst [vmem:[#allocation37_spill] sm:$0xff] %v6567_v32  ;;  %v6571_v0 = vpack.c.bf16 %v341_v20, %v333_v36  ;;  %v6574_v16 = vpack.c.bf16 %v342_v46, %v334_v29  ;;  %v5509_v20 = vld [vmem:[#allocation6 + $0xc4] sm:$0xf]  ;;  %v4525_v29 = vld [vmem:[#allocation6 + $0xd0] sm:$0xf0] }
 0x103   : > { %v2088_v9 = vadd.f32 %v2087_v34, %v2039_v31  ;;  %2556 = vmatpush.bf16.msra.mxu3 %v4928_v30 }
 0x104   : > { %7720 = vst [vmem:[#allocation39_spill] sm:$0xff] %v6571_v0 }
 0x105   : > { %7721 = vst [vmem:[#allocation40_spill] sm:$0xff] %v6574_v16 }
 0x106   : > { %v2136_v45 = vpop.f32.mrf.mxu2 }
 0x107   : > { %v2137_v31 = vadd.f32 %v2136_v45, %v2088_v9  ;;  %v2185_v34 = vpop.f32.mrf.mxu3  ;;  %v2090_v10 = vpop.f32.mrf.mxu1  ;;  %v5573_v45 = vld [vmem:[#allocation6 + $0x2c4] sm:$0xf] }
 0x108   : > { %v2041_v48 = vpop.f32.mrf.mxu0  ;;  %v4784_v36 = vor.u32 %v5573_v45, %v4781_v8  ;;  %v347_v45 = vld [vmem:[%s6311_s14 + $0x220] sm:$0xff] }
 0x109   : > { %v2042_v7 = vadd.f32 %v2041_v48, %v6484_v33  ;;  %v6576_v63 = vadd.f32 %v2185_v34, %v2137_v31  ;;  %v5605_v31 = vld [vmem:[#allocation6 + $0x3c4] sm:$0xf]  ;;  %v4528_v48 = vor.u32 %v5509_v20, %v4525_v29 }
 0x10a   : > { %2285 = vmatmul.bf16.gmra.mxu1 %v6569_v52  ;;  %2508 = vmatpush.bf16.msra.mxu2 %v4784_v36  ;;  %v355_v8 = vld [vmem:[%s6311_s14 + $0x260] sm:$0xff]  ;;  %v348_v36 = vld [vmem:[%s6311_s14 + $0x228] sm:$0xff]  ;;  %v358_v52 = vld [vmem:[%s6311_s14 + $0x278] sm:$0xff] }
 0x10b   : > { %v2091_v17 = vadd.f32 %v2090_v10, %v2042_v7  ;;  %2236 = vmatmul.bf16.gmra.mxu0 %v6567_v32  ;;  %2334 = vmatmul.bf16.gmra.mxu2 %v6571_v0  ;;  %v4909_v7 = vld [vmem:[#allocation6 + $0x3d0] sm:$0xf0]  ;;  %v5541_v10 = vld [vmem:[#allocation6 + $0x1c4] sm:$0xf]  ;;  %v6593_v51 = vpack.c.bf16 %v355_v8, %v347_v45 }
 0x10c   : > { %2383 = vmatmul.bf16.gmra.mxu3 %v6574_v16  ;;  %v356_v16 = vld [vmem:[%s6311_s14 + $0x268] sm:$0xff]  ;;  %v349_v0 = vld [vmem:[%s6311_s14 + $0x230] sm:$0xff]  ;;  %2410 = vmatpush.bf16.msra.mxu0 %v4528_v48 }
 0x10d   : > { %7722 = vst [vmem:[#allocation41_spill] sm:$0xff] %v6593_v51  ;;  %v6595_v29 = vpack.c.bf16 %v356_v16, %v348_v36  ;;  %v4765_v16 = vld [vmem:[#allocation6 + $0x2b0] sm:$0xf0] }
 0x10e   : > { %v2139_v11 = vpop.f32.mrf.mxu2 }
 0x10f   : > { %v2140_v12 = vadd.f32 %v2139_v11, %v2091_v17  ;;  %v2188_v46 = vpop.f32.mrf.mxu3  ;;  %v2092_v18 = vpop.f32.mrf.mxu1  ;;  %v4653_v17 = vld [vmem:[#allocation6 + $0x1d0] sm:$0xf0]  ;;  %v4912_v11 = vor.u32 %v5605_v31, %v4909_v7  ;;  %7723 = vst [vmem:[#allocation42_spill] sm:$0xff] %v6595_v29 }
 0x110   : > { %v2043_v9 = vpop.f32.mrf.mxu0 }
 0x111   : > { %v2044_v19 = vadd.f32 %v2043_v9, %v6484_v33  ;;  %v6583_v30 = vadd.f32 %v2188_v46, %v2140_v12  ;;  %v4656_v9 = vor.u32 %v5541_v10, %v4653_v17  ;;  %v357_v12 = vld [vmem:[%s6311_s14 + $0x270] sm:$0xff]  ;;  %v350_v46 = vld [vmem:[%s6311_s14 + $0x238] sm:$0xff]  ;;  %2557 = vmatpush.bf16.msra.mxu3 %v4912_v11 }
 0x112   : > { %v6597_v50 = vpack.c.bf16 %v357_v12, %v349_v0  ;;  %v6600_v10 = vpack.c.bf16 %v358_v52, %v350_v46  ;;  %v5505_v12 = vld [vmem:[#allocation6 + $0xa4] sm:$0xf]  ;;  %v4509_v46 = vld [vmem:[#allocation6 + $0xb0] sm:$0xf0] }
 0x113   : > { %v2093_v34 = vadd.f32 %v2092_v18, %v2044_v19  ;;  %2459 = vmatpush.bf16.msra.mxu1 %v4656_v9 }
 0x114   : > { %7724 = vst [vmem:[#allocation43_spill] sm:$0xff] %v6597_v50 }
 0x115   : > { %7725 = vst [vmem:[#allocation44_spill] sm:$0xff] %v6600_v10 }
 0x116   : > { %v2141_v32 = vpop.f32.mrf.mxu2 }
 0x117   : > { %v2142_v19 = vadd.f32 %v2141_v32, %v2093_v34  ;;  %v2190_v18 = vpop.f32.mrf.mxu3  ;;  %v2095_v7 = vpop.f32.mrf.mxu1  ;;  %v5569_v32 = vld [vmem:[#allocation6 + $0x2a4] sm:$0xf] }
 0x118   : > { %v2046_v20 = vpop.f32.mrf.mxu0  ;;  %v4768_v0 = vor.u32 %v5569_v32, %v4765_v16  ;;  %v363_v32 = vld [vmem:[%s6311_s14 + $0x2a0] sm:$0xff] }
 0x119   : > { %v2047_v31 = vadd.f32 %v2046_v20, %v6484_v33  ;;  %v6602_v48 = vadd.f32 %v2190_v18, %v2142_v19  ;;  %v5601_v19 = vld [vmem:[#allocation6 + $0x3a4] sm:$0xf]  ;;  %v4512_v20 = vor.u32 %v5505_v12, %v4509_v46 }
 0x11a   : > { %2290 = vmatmul.bf16.gmra.mxu1 %v6595_v29  ;;  %2509 = vmatpush.bf16.msra.mxu2 %v4768_v0  ;;  %v371_v16 = vld [vmem:[%s6311_s14 + $0x2e0] sm:$0xff]  ;;  %v364_v0 = vld [vmem:[%s6311_s14 + $0x2a8] sm:$0xff]  ;;  %v374_v29 = vld [vmem:[%s6311_s14 + $0x2f8] sm:$0xff] }
 0x11b   : > { %v2096_v17 = vadd.f32 %v2095_v7, %v2047_v31  ;;  %2241 = vmatmul.bf16.gmra.mxu0 %v6593_v51  ;;  %2339 = vmatmul.bf16.gmra.mxu2 %v6597_v50  ;;  %v4893_v31 = vld [vmem:[#allocation6 + $0x3b0] sm:$0xf0]  ;;  %v5537_v7 = vld [vmem:[#allocation6 + $0x1a4] sm:$0xf]  ;;  %v6619_v47 = vpack.c.bf16 %v371_v16, %v363_v32 }
 0x11c   : > { %2388 = vmatmul.bf16.gmra.mxu3 %v6600_v10  ;;  %v372_v10 = vld [vmem:[%s6311_s14 + $0x2e8] sm:$0xff]  ;;  %v365_v50 = vld [vmem:[%s6311_s14 + $0x2b0] sm:$0xff]  ;;  %2411 = vmatpush.bf16.msra.mxu0 %v4512_v20  ;;  %v5533_v12 = vld [vmem:[#allocation6 + $0x184] sm:$0xf] }
 0x11d   : > { %7726 = vst [vmem:[#allocation45_spill] sm:$0xff] %v6619_v47  ;;  %v6621_v22 = vpack.c.bf16 %v372_v10, %v364_v0  ;;  %v5565_v20 = vld [vmem:[#allocation6 + $0x284] sm:$0xf]  ;;  %v4880_v10 = vor.u32 %v5597_v6, %v4877_v62  ;;  %v4605_v0 = vld [vmem:[#allocation6 + $0x170] sm:$0xf0] }
 0x11e   : > { %v2144_v34 = vpop.f32.mrf.mxu2  ;;  %v4733_v62 = vld [vmem:[#allocation6 + $0x270] sm:$0xf0]  ;;  %v5593_v6 = vld [vmem:[#allocation6 + $0x364] sm:$0xf] }
 0x11f   : > { %v2145_v45 = vadd.f32 %v2144_v34, %v2096_v17  ;;  %v2193_v52 = vpop.f32.mrf.mxu3  ;;  %v2097_v11 = vpop.f32.mrf.mxu1  ;;  %v4637_v17 = vld [vmem:[#allocation6 + $0x1b0] sm:$0xf0]  ;;  %v4896_v34 = vor.u32 %v5601_v19, %v4893_v31  ;;  %7727 = vst [vmem:[#allocation46_spill] sm:$0xff] %v6621_v22 }
 0x120   : > { %v2048_v8 = vpop.f32.mrf.mxu0 }
 0x121   : > { %v2049_v36 = vadd.f32 %v2048_v8, %v6484_v33  ;;  %v6609_v9 = vadd.f32 %v2193_v52, %v2145_v45  ;;  %v4640_v8 = vor.u32 %v5537_v7, %v4637_v17  ;;  %v373_v45 = vld [vmem:[%s6311_s14 + $0x2f0] sm:$0xff]  ;;  %v366_v52 = vld [vmem:[%s6311_s14 + $0x2b8] sm:$0xff]  ;;  %2558 = vmatpush.bf16.msra.mxu3 %v4896_v34 }
 0x122   : > { %v6623_v19 = vpack.c.bf16 %v373_v45, %v365_v50  ;;  %v4621_v7 = vld [vmem:[#allocation6 + $0x190] sm:$0xf0]  ;;  %v6626_v21 = vpack.c.bf16 %v374_v29, %v366_v52  ;;  %v5529_v29 = vld [vmem:[#allocation6 + $0x164] sm:$0xf] }
 0x123   : > { %v2098_v18 = vadd.f32 %v2097_v11, %v2049_v36  ;;  %2460 = vmatpush.bf16.msra.mxu1 %v4640_v8  ;;  %v5501_v36 = vld [vmem:[#allocation6 + $0x84] sm:$0xf]  ;;  %v4493_v11 = vld [vmem:[#allocation6 + $0x90] sm:$0xf0]  ;;  %v4624_v32 = vor.u32 %v5533_v12, %v4621_v7  ;;  %v4608_v45 = vor.u32 %v5529_v29, %v4605_v0 }
 0x124   : > { %7728 = vst [vmem:[#allocation47_spill] sm:$0xff] %v6623_v19  ;;  %v4496_v31 = vor.u32 %v5501_v36, %v4493_v11  ;;  %v4749_v17 = vld [vmem:[#allocation6 + $0x290] sm:$0xf0]  ;;  %v5561_v52 = vld [vmem:[#allocation6 + $0x264] sm:$0xf] }
 0x125   : > { %7729 = vst [vmem:[#allocation48_spill] sm:$0xff] %v6626_v21  ;;  %v4752_v16 = vor.u32 %v5565_v20, %v4749_v17  ;;  %v4477_v50 = vld [vmem:[#allocation6 + $0x70] sm:$0xf0]  ;;  %2559 = vmatpush.bf16.msra.mxu3 %v4880_v10  ;;  %v4736_v11 = vor.u32 %v5561_v52, %v4733_v62  ;;  %v5557_v10 = vld [vmem:[#allocation6 + $0x244] sm:$0xf] }
 0x126   : > { %v2146_v51 = vpop.f32.mrf.mxu2  ;;  %2412 = vmatpush.bf16.msra.mxu0 %v4496_v31  ;;  %v4861_v12 = vld [vmem:[#allocation6 + $0x370] sm:$0xf0]  ;;  %v5589_v0 = vld [vmem:[#allocation6 + $0x344] sm:$0xf] }
 0x127   : > { %v2147_v46 = vadd.f32 %v2146_v51, %v2098_v18  ;;  %v2195_v24 = vpop.f32.mrf.mxu3  ;;  %v2100_v8 = vpop.f32.mrf.mxu1  ;;  %2461 = vmatpush.bf16.msra.mxu1 %v4624_v32  ;;  %2510 = vmatpush.bf16.msra.mxu2 %v4752_v16  ;;  %v4461_v31 = vld [vmem:[#allocation6 + $0x50] sm:$0xf0]  ;;  %v5525_v32 = vld [vmem:[#allocation6 + $0x144] sm:$0xf] }
 0x128   : > { %v2051_v23 = vpop.f32.mrf.mxu0  ;;  %v4589_v16 = vld [vmem:[#allocation6 + $0x150] sm:$0xf0] }
 0x129   : > { %v2052_v34 = vadd.f32 %v2051_v23, %v6484_v33  ;;  %v6628_v51 = vadd.f32 %v2195_v24, %v2147_v46  ;;  %v5497_v23 = vld [vmem:[#allocation6 + $0x64] sm:$0xf]  ;;  %v4592_v29 = vor.u32 %v5525_v32, %v4589_v16  ;;  %v4845_v52 = vld [vmem:[#allocation6 + $0x350] sm:$0xf0] }
 0x12a   : > { %2295 = vmatmul.bf16.gmra.mxu1 %v6621_v22  ;;  %v4480_v24 = vor.u32 %v5497_v23, %v4477_v50  ;;  %v5493_v46 = vld [vmem:[#allocation6 + $0x44] sm:$0xf]  ;;  %v389_v22 = vld [vmem:[%s6311_s14 + $0x370] sm:$0xff] }
 0x12b   : > { %v2101_v18 = vadd.f32 %v2100_v8, %v2052_v34  ;;  %2246 = vmatmul.bf16.gmra.mxu0 %v6619_v47  ;;  %2344 = vmatmul.bf16.gmra.mxu2 %v6623_v19  ;;  %v4864_v34 = vor.u32 %v5593_v6, %v4861_v12  ;;  %v4464_v8 = vor.u32 %v5493_v46, %v4461_v31  ;;  %v380_v46 = vld [vmem:[%s6311_s14 + $0x328] sm:$0xff]  ;;  %v5521_v32 = vld [vmem:[#allocation6 + $0x124] sm:$0xf]  ;;  %v4701_v19 = vld [vmem:[#allocation6 + $0x230] sm:$0xf0] }
 0x12c   : > { %2393 = vmatmul.bf16.gmra.mxu3 %v6626_v21  ;;  %2413 = vmatpush.bf16.msra.mxu0 %v4480_v24  ;;  %v379_v24 = vld [vmem:[%s6311_s14 + $0x320] sm:$0xff]  ;;  %v388_v31 = vld [vmem:[%s6311_s14 + $0x368] sm:$0xff]  ;;  %v381_v21 = vld [vmem:[%s6311_s14 + $0x330] sm:$0xff] }
 0x12d   : > { %2462 = vmatpush.bf16.msra.mxu1 %v4608_v45  ;;  %2511 = vmatpush.bf16.msra.mxu2 %v4736_v11  ;;  %v387_v45 = vld [vmem:[%s6311_s14 + $0x360] sm:$0xff]  ;;  %v4445_v11 = vld [vmem:[#allocation6 + $0x30] sm:$0xf0]  ;;  %v6647_v39 = vpack.c.bf16 %v388_v31, %v380_v46 }
 0x12e   : > { %v2149_v36 = vpop.f32.mrf.mxu2  ;;  %2560 = vmatpush.bf16.msra.mxu3 %v4864_v34  ;;  %v6645_v61 = vpack.c.bf16 %v387_v45, %v379_v24 }
 0x12f   : > { %v2150_v7 = vadd.f32 %v2149_v36, %v2101_v18  ;;  %v2198_v20 = vpop.f32.mrf.mxu3  ;;  %v2102_v50 = vpop.f32.mrf.mxu1  ;;  %v4717_v18 = vld [vmem:[#allocation6 + $0x250] sm:$0xf0]  ;;  %v4848_v36 = vor.u32 %v5589_v0, %v4845_v52  ;;  %v390_v0 = vld [vmem:[%s6311_s14 + $0x378] sm:$0xff] }
 0x130   : > { %v2053_v17 = vpop.f32.mrf.mxu0  ;;  %v4720_v6 = vor.u32 %v5557_v10, %v4717_v18  ;;  %2414 = vmatpush.bf16.msra.mxu0 %v4464_v8  ;;  %v5585_v18 = vld [vmem:[#allocation6 + $0x324] sm:$0xf]  ;;  %v4429_v8 = vld [vmem:[#allocation6 + $0x10] sm:$0xf0] }
 0x131   : > { %v2054_v23 = vadd.f32 %v2053_v17, %v6484_v33  ;;  %v6635_v62 = vadd.f32 %v2198_v20, %v2150_v7  ;;  %v5489_v17 = vld [vmem:[#allocation6 + $0x24] sm:$0xf]  ;;  %2463 = vmatpush.bf16.msra.mxu1 %v4592_v29  ;;  %v4573_v7 = vld [vmem:[#allocation6 + $0x130] sm:$0xf0]  ;;  %v4432_v45 = vor.u32 %v5485_v49, %v4429_v8 }
 0x132   : > { %v4448_v16 = vor.u32 %v5489_v17, %v4445_v11  ;;  %v5553_v20 = vld [vmem:[#allocation6 + $0x224] sm:$0xf]  ;;  %2512 = vmatpush.bf16.msra.mxu2 %v4720_v6  ;;  %v4576_v34 = vor.u32 %v5521_v32, %v4573_v7  ;;  %2561 = vmatpush.bf16.msra.mxu3 %v4848_v36  ;;  %v6649_v6 = vpack.c.bf16 %v389_v22, %v381_v21  ;;  %v4685_v7 = vld [vmem:[#allocation6 + $0x210] sm:$0xf0] }
 0x133   : > { %v2103_v12 = vadd.f32 %v2102_v50, %v2054_v23  ;;  %v4704_v10 = vor.u32 %v5553_v20, %v4701_v19  ;;  %v4829_v23 = vld [vmem:[#allocation6 + $0x330] sm:$0xf0]  ;;  %v382_v50 = vld [vmem:[%s6311_s14 + $0x338] sm:$0xff]  ;;  %v5517_v29 = vld [vmem:[#allocation6 + $0x104] sm:$0xf] }
 0x134   : > { %v4832_v52 = vor.u32 %v5585_v18, %v4829_v23  ;;  %2415 = vmatpush.bf16.msra.mxu0 %v4448_v16  ;;  %v4557_v19 = vld [vmem:[#allocation6 + $0x110] sm:$0xf0]  ;;  %v5549_v32 = vld [vmem:[#allocation6 + $0x204] sm:$0xf]  ;;  %v6652_v24 = vpack.c.bf16 %v390_v0, %v382_v50 }
 0x135   : > { %2464 = vmatpush.bf16.msra.mxu1 %v4576_v34  ;;  %v5581_v18 = vld [vmem:[#allocation6 + $0x304] sm:$0xf]  ;;  %v4560_v46 = vor.u32 %v5517_v29, %v4557_v19  ;;  %v4688_v21 = vor.u32 %v5549_v32, %v4685_v7  ;;  %v396_v29 = vld [vmem:[%s6311_s14 + $0x3a8] sm:$0xff]  ;;  %v405_v19 = vld [vmem:[%s6311_s14 + $0x3f0] sm:$0xff] }
 0x136   : > { %v2151_v47 = vpop.f32.mrf.mxu2  ;;  %2513 = vmatpush.bf16.msra.mxu2 %v4704_v10  ;;  %2562 = vmatpush.bf16.msra.mxu3 %v4832_v52  ;;  %v395_v52 = vld [vmem:[%s6311_s14 + $0x3a0] sm:$0xff]  ;;  %v398_v32 = vld [vmem:[%s6311_s14 + $0x3b8] sm:$0xff] }
 0x137   : > { %v2152_v17 = vadd.f32 %v2151_v47, %v2103_v12  ;;  %v2200_v11 = vpop.f32.mrf.mxu3  ;;  %v2105_v20 = vpop.f32.mrf.mxu1  ;;  %v4813_v47 = vld [vmem:[#allocation6 + $0x310] sm:$0xf0]  ;;  %v403_v8 = vld [vmem:[%s6311_s14 + $0x3e0] sm:$0xff]  ;;  %v406_v7 = vld [vmem:[%s6311_s14 + $0x3f8] sm:$0xff] }
 0x138   : > { %v2056_v40 = vpop.f32.mrf.mxu0  ;;  %v4816_v31 = vor.u32 %v5581_v18, %v4813_v47  ;;  %2416 = vmatpush.bf16.msra.mxu0 %v4432_v45 }
 0x139   : > { %v2057_v36 = vadd.f32 %v2056_v40, %v6484_v33  ;;  %v6654_v12 = vadd.f32 %v2200_v11, %v2152_v17  ;;  %2465 = vmatpush.bf16.msra.mxu1 %v4560_v46  ;;  %v404_v17 = vld [vmem:[%s6311_s14 + $0x3e8] sm:$0xff]  ;;  %v397_v11 = vld [vmem:[%s6311_s14 + $0x3b0] sm:$0xff] }
 0x13a   : > { %2300 = vmatmul.bf16.gmra.mxu1 %v6647_v39  ;;  %2514 = vmatpush.bf16.msra.mxu2 %v4688_v21  ;;  %v6673_v46 = vpack.c.bf16 %v404_v17, %v396_v29  ;;  %v6675_v21 = vpack.c.bf16 %v405_v19, %v397_v11 }
 0x13b   : > { %v2106_v22 = vadd.f32 %v2105_v20, %v2057_v36  ;;  %2251 = vmatmul.bf16.gmra.mxu0 %v6645_v61  ;;  %2349 = vmatmul.bf16.gmra.mxu2 %v6649_v6  ;;  %v6671_v20 = vpack.c.bf16 %v403_v8, %v395_v52 }
 0x13c   : > { %2398 = vmatmul.bf16.gmra.mxu3 %v6652_v24 }
 0x13d   : > { %2563 = vmatpush.bf16.msra.mxu3 %v4816_v31 }
 0x13e   : > { %v2154_v40 = vpop.f32.mrf.mxu2 }
 0x13f   : > { %v2155_v49 = vadd.f32 %v2154_v40, %v2106_v22  ;;  %v2203_v16 = vpop.f32.mrf.mxu3  ;;  %v2107_v23 = vpop.f32.mrf.mxu1  ;;  %v6678_v40 = vpack.c.bf16 %v406_v7, %v398_v32 }
 0x140   : > { %v2058_v34 = vpop.f32.mrf.mxu0 }
 0x141   : > { %v2059_v10 = vadd.f32 %v2058_v34, %v6484_v33  ;;  %v6661_v50 = vadd.f32 %v2203_v16, %v2155_v49 }
 0x143   : > { %v2108_v0 = vadd.f32 %v2107_v23, %v2059_v10 }
 0x146   : > { %v2156_v36 = vpop.f32.mrf.mxu2 }
 0x147   : > { %v2157_v45 = vadd.f32 %v2156_v36, %v2108_v0  ;;  %v2205_v18 = vpop.f32.mrf.mxu3  ;;  %v2110_v31 = vpop.f32.mrf.mxu1 }
 0x148   : > { %v2061_v47 = vpop.f32.mrf.mxu0 }
 0x149   : > { %v2062_v22 = vadd.f32 %v2061_v47, %v6484_v33  ;;  %v6680_v49 = vadd.f32 %v2205_v18, %v2157_v45 }
 0x14a   : > { %2305 = vmatmul.bf16.gmra.mxu1 %v6673_v46 }
 0x14b   : > { %v2111_v16 = vadd.f32 %v2110_v31, %v2062_v22  ;;  %2256 = vmatmul.bf16.gmra.mxu0 %v6671_v20  ;;  %2354 = vmatmul.bf16.gmra.mxu2 %v6675_v21 }
 0x14c   : > { %2403 = vmatmul.bf16.gmra.mxu3 %v6678_v40 }
 0x14e   : > { %v2159_v34 = vpop.f32.mrf.mxu2 }
 0x14f   : > { %v2160_v10 = vadd.f32 %v2159_v34, %v2111_v16  ;;  %v2208_v23 = vpop.f32.mrf.mxu3  ;;  %v2112_v8 = vpop.f32.mrf.mxu1 }
 0x150   : > { %v2063_v0 = vpop.f32.mrf.mxu0 }
 0x151   : > { %v2064_v52 = vadd.f32 %v2063_v0, %v6484_v33  ;;  %v6687_v29 = vadd.f32 %v2208_v23, %v2160_v10 }
 0x153   : > { %v2113_v17 = vadd.f32 %v2112_v8, %v2064_v52 }
 0x156   : > { %v2161_v11 = vpop.f32.mrf.mxu2 }
 0x157   : > { %v2162_v19 = vadd.f32 %v2161_v11, %v2113_v17  ;;  %v2210_v32 = vpop.f32.mrf.mxu3  ;;  %v2271_v45 = vpop.f32.mrf.mxu1 }
 0x158   : > { %v2222_v7 = vpop.f32.mrf.mxu0 }
 0x159   : > { %v2223_v36 = vadd.f32 %v2222_v7, %v6505_v13  ;;  %v6690_v18 = vadd.f32 %v2210_v32, %v2162_v19 }
 0x15a   : > { %2466 = vmatmul.bf16.vlgmr.msra.gmra.mxu1 %v6331_v42 }
 0x15b   : > { %v2272_v47 = vadd.f32 %v2271_v45, %v2223_v36  ;;  %2417 = vmatmul.bf16.vlgmr.msra.gmra.mxu0 %v6329_v41  ;;  %2515 = vmatmul.bf16.vlgmr.msra.gmra.mxu2 %v6333_v43 }
 0x15c   : > { %2564 = vmatmul.bf16.vlgmr.msra.gmra.mxu3 %v6335_v44 }
 0x15e   : > { %v2320_v33 = vpop.f32.mrf.mxu2 }
 0x15f   : > { %v2321_v22 = vadd.f32 %v2320_v33, %v2272_v47  ;;  %v2369_v31 = vpop.f32.mrf.mxu3  ;;  %v2273_v10 = vpop.f32.mrf.mxu1 }
 0x160   : > { %v2224_v16 = vpop.f32.mrf.mxu0 }
 0x161   : > { %v2225_v34 = vadd.f32 %v2224_v16, %v6524_v5  ;;  %v6697_v13 = vadd.f32 %v2369_v31, %v2321_v22 }
 0x163   : > { %7730 = vst [vmem:[#allocation49_spill] sm:$0xff] %v6697_v13  ;;  %v2274_v23 = vadd.f32 %v2273_v10, %v2225_v34 }
 0x166   : > { %v2322_v0 = vpop.f32.mrf.mxu2 }
 0x167   : > { %v2323_v52 = vadd.f32 %v2322_v0, %v2274_v23  ;;  %v2371_v8 = vpop.f32.mrf.mxu3  ;;  %v2276_v19 = vpop.f32.mrf.mxu1 }
 0x168   : > { %v2227_v17 = vpop.f32.mrf.mxu0 }
 0x169   : > { %v2228_v11 = vadd.f32 %v2227_v17, %v6531_v15  ;;  %v6700_v32 = vadd.f32 %v2371_v8, %v2323_v52 }
 0x16a   : > { %2471 = vmatmul.bf16.gmra.mxu1 %v6351_v54 }
 0x16b   : > { %7731 = vst [vmem:[#allocation50_spill] sm:$0xff] %v6700_v32  ;;  %v2277_v7 = vadd.f32 %v2276_v19, %v2228_v11  ;;  %2422 = vmatmul.bf16.gmra.mxu0 %v6349_v53  ;;  %2520 = vmatmul.bf16.gmra.mxu2 %v6353_v55  ;;  %v5309_v11 = vld [vmem:[#allocation6 + $0x6f0] sm:$0xf0]  ;;  %v7760_v32 = vld [vmem:[#allocation29_spill] sm:$0xff] }
 0x16c   : > { %2569 = vmatmul.bf16.gmra.mxu3 %v6355_v56 }
 0x16e   : > { %v2325_v5 = vpop.f32.mrf.mxu2 }
 0x16f   : > { %v2326_v36 = vadd.f32 %v2325_v5, %v2277_v7  ;;  %v2374_v45 = vpop.f32.mrf.mxu3  ;;  %v2278_v22 = vpop.f32.mrf.mxu1 }
 0x170   : > { %v2229_v47 = vpop.f32.mrf.mxu0 }
 0x171   : > { %v2230_v33 = vadd.f32 %v2229_v47, %v6550_v14  ;;  %v6707_v15 = vadd.f32 %v2374_v45, %v2326_v36  ;;  %v5705_v14 = vld [vmem:[#allocation6 + $0x6e4] sm:$0xf] }
 0x172   : > { %v5312_v19 = vor.u32 %v5705_v14, %v5309_v11 }
 0x173   : > { %7732 = vst [vmem:[#allocation51_spill] sm:$0xff] %v6707_v15  ;;  %v2279_v31 = vadd.f32 %v2278_v22, %v2230_v33  ;;  %v5681_v15 = vld [vmem:[#allocation6 + $0x624] sm:$0xf] }
 0x174   : > { %2703 = vmatpush.bf16.msrb.mxu2 %v5312_v19 }
 0x176   : > { %v2327_v16 = vpop.f32.mrf.mxu2 }
 0x177   : > { %v2328_v34 = vadd.f32 %v2327_v16, %v2279_v31  ;;  %v2376_v10 = vpop.f32.mrf.mxu3  ;;  %v2281_v52 = vpop.f32.mrf.mxu1  ;;  %v5641_v31 = vld [vmem:[#allocation6 + $0x4e4] sm:$0xf]  ;;  %v5053_v16 = vld [vmem:[#allocation6 + $0x4f0] sm:$0xf0] }
 0x178   : > { %v2232_v23 = vpop.f32.mrf.mxu0 }
 0x179   : > { %v2233_v0 = vadd.f32 %v2232_v23, %v6557_v35  ;;  %v6710_v8 = vadd.f32 %v2376_v10, %v2328_v34  ;;  %v5737_v34 = vld [vmem:[#allocation6 + $0x7e4] sm:$0xf]  ;;  %v5056_v10 = vor.u32 %v5641_v31, %v5053_v16  ;;  %v5437_v23 = vld [vmem:[#allocation6 + $0x7f0] sm:$0xf0] }
 0x17a   : > { %2476 = vmatmul.bf16.gmra.mxu1 %v6371_v2 }
 0x17b   : > { %7733 = vst [vmem:[#allocation52_spill] sm:$0xff] %v6710_v8  ;;  %v2282_v17 = vadd.f32 %v2281_v52, %v2233_v0  ;;  %2427 = vmatmul.bf16.gmra.mxu0 %v6369_v1  ;;  %2525 = vmatmul.bf16.gmra.mxu2 %v6373_v3  ;;  %v5673_v0 = vld [vmem:[#allocation6 + $0x5e4] sm:$0xf]  ;;  %v5181_v52 = vld [vmem:[#allocation6 + $0x5f0] sm:$0xf0]  ;;  %v5440_v8 = vor.u32 %v5737_v34, %v5437_v23 }
 0x17c   : > { %2574 = vmatmul.bf16.gmra.mxu3 %v6375_v4  ;;  %v5184_v14 = vor.u32 %v5673_v0, %v5181_v52  ;;  %2605 = vmatpush.bf16.msrb.mxu0 %v5056_v10  ;;  %v5637_v52 = vld [vmem:[#allocation6 + $0x4c4] sm:$0xf] }
 0x17d   : > { %2752 = vmatpush.bf16.msrb.mxu3 %v5440_v8 }
 0x17e   : > { %v2330_v7 = vpop.f32.mrf.mxu2  ;;  %2654 = vmatpush.bf16.msrb.mxu1 %v5184_v14  ;;  %v5037_v14 = vld [vmem:[#allocation6 + $0x4d0] sm:$0xf0] }
 0x17f   : > { %v2331_v5 = vadd.f32 %v2330_v7, %v2282_v17  ;;  %v2379_v36 = vpop.f32.mrf.mxu3  ;;  %v2283_v47 = vpop.f32.mrf.mxu1 }
 0x180   : > { %v2234_v45 = vpop.f32.mrf.mxu0 }
 0x181   : > { %v2235_v35 = vadd.f32 %v2234_v45, %v6576_v63  ;;  %v6717_v33 = vadd.f32 %v2379_v36, %v2331_v5 }
 0x183   : > { %7734 = vst [vmem:[#allocation53_spill] sm:$0xff] %v6717_v33  ;;  %v2284_v22 = vadd.f32 %v2283_v47, %v2235_v35  ;;  %v5701_v35 = vld [vmem:[#allocation6 + $0x6c4] sm:$0xf]  ;;  %v5293_v47 = vld [vmem:[#allocation6 + $0x6d0] sm:$0xf0] }
 0x184   : > { %v5229_v33 = vld [vmem:[#allocation6 + $0x650] sm:$0xf0] }
 0x186   : > { %v2332_v11 = vpop.f32.mrf.mxu2 }
 0x187   : > { %v2333_v17 = vadd.f32 %v2332_v11, %v2284_v22  ;;  %v2381_v7 = vpop.f32.mrf.mxu3  ;;  %v2286_v5 = vpop.f32.mrf.mxu1  ;;  %v5296_v22 = vor.u32 %v5701_v35, %v5293_v47  ;;  %v5733_v11 = vld [vmem:[#allocation6 + $0x7c4] sm:$0xf] }
 0x188   : > { %v2237_v19 = vpop.f32.mrf.mxu0 }
 0x189   : > { %v2238_v63 = vadd.f32 %v2237_v19, %v6583_v30  ;;  %v6720_v36 = vadd.f32 %v2381_v7, %v2333_v17  ;;  %2704 = vmatpush.bf16.msrb.mxu2 %v5296_v22  ;;  %v5040_v17 = vor.u32 %v5637_v52, %v5037_v14  ;;  %v5421_v7 = vld [vmem:[#allocation6 + $0x7d0] sm:$0xf0]  ;;  %v5669_v19 = vld [vmem:[#allocation6 + $0x5c4] sm:$0xf] }
 0x18a   : > { %2481 = vmatmul.bf16.gmra.mxu1 %v6391_v26 }
 0x18b   : > { %7735 = vst [vmem:[#allocation54_spill] sm:$0xff] %v6720_v36  ;;  %v2287_v45 = vadd.f32 %v2286_v5, %v2238_v63  ;;  %2432 = vmatmul.bf16.gmra.mxu0 %v6389_v25  ;;  %2530 = vmatmul.bf16.gmra.mxu2 %v6393_v27  ;;  %v5165_v63 = vld [vmem:[#allocation6 + $0x5d0] sm:$0xf0]  ;;  %v5424_v5 = vor.u32 %v5733_v11, %v5421_v7  ;;  %v5685_v36 = vld [vmem:[#allocation6 + $0x644] sm:$0xf] }
 0x18c   : > { %2579 = vmatmul.bf16.gmra.mxu3 %v6395_v28  ;;  %v5168_v35 = vor.u32 %v5669_v19, %v5165_v63  ;;  %2606 = vmatpush.bf16.msrb.mxu0 %v5040_v17 }
 0x18d   : > { %2753 = vmatpush.bf16.msrb.mxu3 %v5424_v5  ;;  %v5633_v5 = vld [vmem:[#allocation6 + $0x4a4] sm:$0xf] }
 0x18e   : > { %v2335_v31 = vpop.f32.mrf.mxu2  ;;  %2655 = vmatpush.bf16.msrb.mxu1 %v5168_v35  ;;  %v5021_v35 = vld [vmem:[#allocation6 + $0x4b0] sm:$0xf0] }
 0x18f   : > { %v2336_v8 = vadd.f32 %v2335_v31, %v2287_v45  ;;  %v2384_v16 = vpop.f32.mrf.mxu3  ;;  %v2288_v10 = vpop.f32.mrf.mxu1 }
 0x190   : > { %v2239_v34 = vpop.f32.mrf.mxu0 }
 0x191   : > { %v2240_v30 = vadd.f32 %v2239_v34, %v6602_v48  ;;  %v6727_v23 = vadd.f32 %v2384_v16, %v2336_v8 }
 0x193   : > { %7736 = vst [vmem:[#allocation55_spill] sm:$0xff] %v6727_v23  ;;  %v2289_v0 = vadd.f32 %v2288_v10, %v2240_v30  ;;  %v5697_v30 = vld [vmem:[#allocation6 + $0x6a4] sm:$0xf]  ;;  %v5277_v10 = vld [vmem:[#allocation6 + $0x6b0] sm:$0xf0] }
 0x194   : > { %v5101_v23 = vld [vmem:[#allocation6 + $0x550] sm:$0xf0] }
 0x196   : > { %v2337_v47 = vpop.f32.mrf.mxu2 }
 0x197   : > { %v2338_v45 = vadd.f32 %v2337_v47, %v2289_v0  ;;  %v2386_v31 = vpop.f32.mrf.mxu3  ;;  %v2291_v8 = vpop.f32.mrf.mxu1  ;;  %v5280_v0 = vor.u32 %v5697_v30, %v5277_v10  ;;  %v5729_v47 = vld [vmem:[#allocation6 + $0x7a4] sm:$0xf] }
 0x198   : > { %v2242_v22 = vpop.f32.mrf.mxu0  ;;  %v5629_v10 = vld [vmem:[#allocation6 + $0x484] sm:$0xf] }
 0x199   : > { %v2243_v48 = vadd.f32 %v2242_v22, %v6609_v9  ;;  %v6730_v16 = vadd.f32 %v2386_v31, %v2338_v45  ;;  %2705 = vmatpush.bf16.msrb.mxu2 %v5280_v0  ;;  %v5024_v45 = vor.u32 %v5633_v5, %v5021_v35  ;;  %v5405_v31 = vld [vmem:[#allocation6 + $0x7b0] sm:$0xf0]  ;;  %v5665_v22 = vld [vmem:[#allocation6 + $0x5a4] sm:$0xf] }
 0x19a   : > { %2486 = vmatmul.bf16.gmra.mxu1 %v6411_v58  ;;  %v5005_v0 = vld [vmem:[#allocation6 + $0x490] sm:$0xf0] }
 0x19b   : > { %7737 = vst [vmem:[#allocation56_spill] sm:$0xff] %v6730_v16  ;;  %v2292_v34 = vadd.f32 %v2291_v8, %v2243_v48  ;;  %2437 = vmatmul.bf16.gmra.mxu0 %v6409_v57  ;;  %2535 = vmatmul.bf16.gmra.mxu2 %v6413_v59  ;;  %v5149_v48 = vld [vmem:[#allocation6 + $0x5b0] sm:$0xf0]  ;;  %v5408_v8 = vor.u32 %v5729_v47, %v5405_v31  ;;  %v5725_v31 = vld [vmem:[#allocation6 + $0x784] sm:$0xf] }
 0x19c   : > { %2584 = vmatmul.bf16.gmra.mxu3 %v6415_v60  ;;  %v5152_v30 = vor.u32 %v5665_v22, %v5149_v48  ;;  %2607 = vmatpush.bf16.msrb.mxu0 %v5024_v45  ;;  %v5389_v45 = vld [vmem:[#allocation6 + $0x790] sm:$0xf0] }
 0x19d   : > { %2754 = vmatpush.bf16.msrb.mxu3 %v5408_v8  ;;  %v5392_v48 = vor.u32 %v5725_v31, %v5389_v45  ;;  %v5653_v31 = vld [vmem:[#allocation6 + $0x544] sm:$0xf] }
 0x19e   : > { %v2340_v52 = vpop.f32.mrf.mxu2  ;;  %2656 = vmatpush.bf16.msrb.mxu1 %v5152_v30  ;;  %v4989_v30 = vld [vmem:[#allocation6 + $0x470] sm:$0xf0] }
 0x19f   : > { %v2341_v14 = vadd.f32 %v2340_v52, %v2292_v34  ;;  %v2389_v11 = vpop.f32.mrf.mxu3  ;;  %v2293_v7 = vpop.f32.mrf.mxu1 }
 0x1a0   : > { %v2244_v17 = vpop.f32.mrf.mxu0 }
 0x1a1   : > { %v2245_v9 = vadd.f32 %v2244_v17, %v6628_v51  ;;  %v6737_v19 = vadd.f32 %v2389_v11, %v2341_v14  ;;  %v5661_v51 = vld [vmem:[#allocation6 + $0x584] sm:$0xf]  ;;  %v5008_v17 = vor.u32 %v5629_v10, %v5005_v0  ;;  %v7740_v10 = vld [vmem:[#allocation15_spill] sm:$0xff]  ;;  %2755 = vmatpush.bf16.msrb.mxu3 %v5392_v48  ;;  %v5232_v48 = vor.u32 %v5685_v36, %v5229_v33 }
 0x1a2   : > { %v5117_v0 = vld [vmem:[#allocation6 + $0x570] sm:$0xf0]  ;;  %v5713_v33 = vld [vmem:[#allocation6 + $0x724] sm:$0xf] }
 0x1a3   : > { %7738 = vst [vmem:[#allocation57_spill] sm:$0xff] %v6737_v19  ;;  %v2294_v63 = vadd.f32 %v2293_v7, %v2245_v9  ;;  %v5133_v9 = vld [vmem:[#allocation6 + $0x590] sm:$0xf0]  ;;  %v5693_v7 = vld [vmem:[#allocation6 + $0x684] sm:$0xf]  ;;  %2608 = vmatpush.bf16.msrb.mxu0 %v5008_v17 }
 0x1a4   : > { %v5261_v19 = vld [vmem:[#allocation6 + $0x690] sm:$0xf0]  ;;  %v5136_v16 = vor.u32 %v5661_v51, %v5133_v9  ;;  %v5721_v17 = vld [vmem:[#allocation6 + $0x764] sm:$0xf] }
 0x1a5   : > { %v5264_v47 = vor.u32 %v5693_v7, %v5261_v19  ;;  %v5689_v19 = vld [vmem:[#allocation6 + $0x664] sm:$0xf]  ;;  %v5245_v51 = vld [vmem:[#allocation6 + $0x670] sm:$0xf0] }
 0x1a6   : > { %v2342_v34 = vpop.f32.mrf.mxu2  ;;  %2657 = vmatpush.bf16.msrb.mxu1 %v5136_v16  ;;  %v5373_v9 = vld [vmem:[#allocation6 + $0x770] sm:$0xf0] }
 0x1a7   : > { %v2343_v52 = vadd.f32 %v2342_v34, %v2294_v63  ;;  %v2391_v14 = vpop.f32.mrf.mxu3  ;;  %v2296_v35 = vpop.f32.mrf.mxu1  ;;  %v5625_v63 = vld [vmem:[#allocation6 + $0x464] sm:$0xf]  ;;  %2706 = vmatpush.bf16.msrb.mxu2 %v5264_v47  ;;  %v5376_v16 = vor.u32 %v5721_v17, %v5373_v9  ;;  %v4957_v9 = vld [vmem:[#allocation6 + $0x430] sm:$0xf0] }
 0x1a8   : > { %v2247_v11 = vpop.f32.mrf.mxu0  ;;  %v5657_v34 = vld [vmem:[#allocation6 + $0x564] sm:$0xf]  ;;  %v5341_v36 = vld [vmem:[#allocation6 + $0x730] sm:$0xf0] }
 0x1a9   : > { %v2248_v5 = vadd.f32 %v2247_v11, %v6635_v62  ;;  %v6740_v22 = vadd.f32 %v2391_v14, %v2343_v52  ;;  %v4992_v62 = vor.u32 %v5625_v63, %v4989_v30  ;;  %v7741_v11 = vld [vmem:[#allocation16_spill] sm:$0xff]  ;;  %v5120_v52 = vor.u32 %v5657_v34, %v5117_v0  ;;  %2756 = vmatpush.bf16.msrb.mxu3 %v5376_v16 }
 0x1aa   : > { %2491 = vmatmul.bf16.gmra.mxu1 %v6431_v38  ;;  %v5248_v14 = vor.u32 %v5689_v19, %v5245_v51  ;;  %v5104_v0 = vor.u32 %v5653_v31, %v5101_v23  ;;  %v5357_v19 = vld [vmem:[#allocation6 + $0x750] sm:$0xf0]  ;;  %v5617_v17 = vld [vmem:[#allocation6 + $0x424] sm:$0xf]  ;;  %v5344_v31 = vor.u32 %v5713_v33, %v5341_v36  ;;  %v4723_v38 = vld [vmem:[#allocation6 + $0x248] sm:$0xf] }
 0x1ab   : > { %7739 = vst [vmem:[#allocation58_spill] sm:$0xff] %v6740_v22  ;;  %v2297_v8 = vadd.f32 %v2296_v35, %v2248_v5  ;;  %2442 = vmatmul.bf16.gmra.mxu0 %v6429_v37  ;;  %2540 = vmatmul.bf16.gmra.mxu2 %v7740_v10  ;;  %v5621_v5 = vld [vmem:[#allocation6 + $0x444] sm:$0xf]  ;;  %v4973_v35 = vld [vmem:[#allocation6 + $0x450] sm:$0xf0] }
 0x1ac   : > { %2589 = vmatmul.bf16.gmra.mxu3 %v7741_v11  ;;  %2609 = vmatpush.bf16.msrb.mxu0 %v4992_v62  ;;  %v4976_v22 = vor.u32 %v5621_v5, %v4973_v35  ;;  %v5717_v62 = vld [vmem:[#allocation6 + $0x744] sm:$0xf]  ;;  %v4960_v5 = vor.u32 %v5617_v17, %v4957_v9  ;;  %v5085_v35 = vld [vmem:[#allocation6 + $0x530] sm:$0xf0]  ;;  %v5528_v10 = vld [vmem:[#allocation6 + $0x154] sm:$0xf0] }
 0x1ad   : > { %2658 = vmatpush.bf16.msrb.mxu1 %v5120_v52  ;;  %2707 = vmatpush.bf16.msrb.mxu2 %v5248_v14  ;;  %v5360_v52 = vor.u32 %v5717_v62, %v5357_v19  ;;  %v5069_v62 = vld [vmem:[#allocation6 + $0x510] sm:$0xf0]  ;;  %v5677_v19 = vld [vmem:[#allocation6 + $0x604] sm:$0xf]  ;;  %v4707_v37 = vld [vmem:[#allocation6 + $0x228] sm:$0xf] }
 0x1ae   : > { %v2345_v7 = vpop.f32.mrf.mxu2  ;;  %v5197_v17 = vld [vmem:[#allocation6 + $0x610] sm:$0xf0] }
 0x1af   : > { %v2346_v45 = vadd.f32 %v2345_v7, %v2297_v8  ;;  %v2394_v63 = vpop.f32.mrf.mxu3  ;;  %v2298_v34 = vpop.f32.mrf.mxu1  ;;  %v5649_v7 = vld [vmem:[#allocation6 + $0x524] sm:$0xf]  ;;  %2757 = vmatpush.bf16.msrb.mxu3 %v5360_v52  ;;  %v5200_v52 = vor.u32 %v5677_v19, %v5197_v17  ;;  %v7745_v33 = vld [vmem:[#allocation18_spill] sm:$0xff]  ;;  %v7746_v36 = vld [vmem:[#allocation19_spill] sm:$0xff] }
 0x1b0   : > { %v2249_v30 = vpop.f32.mrf.mxu0  ;;  %2610 = vmatpush.bf16.msrb.mxu0 %v4976_v22  ;;  %v5088_v14 = vor.u32 %v5649_v7, %v5085_v35  ;;  %v5613_v22 = vld [vmem:[#allocation6 + $0x404] sm:$0xf]  ;;  %v7778_v11 = vld [vmem:[#allocation47_spill] sm:$0xff] }
 0x1b1   : > { %v2250_v47 = vadd.f32 %v2249_v30, %v6654_v12  ;;  %v6747_v51 = vadd.f32 %v2394_v63, %v2346_v45  ;;  %2659 = vmatpush.bf16.msrb.mxu1 %v5104_v0  ;;  %v5213_v12 = vld [vmem:[#allocation6 + $0x630] sm:$0xf0]  ;;  %2708 = vmatpush.bf16.msrb.mxu2 %v5232_v48  ;;  %v5645_v63 = vld [vmem:[#allocation6 + $0x504] sm:$0xf] }
 0x1b2   : > { %v5216_v23 = vor.u32 %v5681_v15, %v5213_v12  ;;  %v4941_v45 = vld [vmem:[#allocation6 + $0x410] sm:$0xf0]  ;;  %v5072_v9 = vor.u32 %v5645_v63, %v5069_v62  ;;  %v5709_v7 = vld [vmem:[#allocation6 + $0x704] sm:$0xf] }
 0x1b3   : > { %7742 = vst [vmem:[#allocation59_spill] sm:$0xff] %v6747_v51  ;;  %v2299_v8 = vadd.f32 %v2298_v34, %v2250_v47  ;;  %v4944_v0 = vor.u32 %v5613_v22, %v4941_v45  ;;  %2758 = vmatpush.bf16.msrb.mxu3 %v5344_v31 }
 0x1b4   : > { %2611 = vmatpush.bf16.msrb.mxu0 %v4960_v5  ;;  %v5325_v5 = vld [vmem:[#allocation6 + $0x710] sm:$0xf0] }
 0x1b5   : > { %2660 = vmatpush.bf16.msrb.mxu1 %v5088_v14  ;;  %2709 = vmatpush.bf16.msrb.mxu2 %v5216_v23  ;;  %v5328_v12 = vor.u32 %v5709_v7, %v5325_v5  ;;  %v7744_v14 = vld [vmem:[#allocation17_spill] sm:$0xff]  ;;  %v7751_v7 = vld [vmem:[#allocation22_spill] sm:$0xff]  ;;  %v7752_v5 = vld [vmem:[#allocation23_spill] sm:$0xff] }
 0x1b6   : > { %v2347_v16 = vpop.f32.mrf.mxu2 }
 0x1b7   : > { %v2348_v30 = vadd.f32 %v2347_v16, %v2299_v8  ;;  %v2396_v47 = vpop.f32.mrf.mxu3  ;;  %v2301_v15 = vpop.f32.mrf.mxu1  ;;  %2759 = vmatpush.bf16.msrb.mxu3 %v5328_v12 }
 0x1b8   : > { %v2252_v34 = vpop.f32.mrf.mxu0  ;;  %2612 = vmatpush.bf16.msrb.mxu0 %v4944_v0 }
 0x1b9   : > { %v2253_v48 = vadd.f32 %v2252_v34, %v6661_v50  ;;  %v6750_v35 = vadd.f32 %v2396_v47, %v2348_v30  ;;  %2661 = vmatpush.bf16.msrb.mxu1 %v5072_v9  ;;  %v7747_v50 = vld [vmem:[#allocation20_spill] sm:$0xff]  ;;  %2710 = vmatpush.bf16.msrb.mxu2 %v5200_v52  ;;  %v7750_v52 = vld [vmem:[#allocation21_spill] sm:$0xff] }
 0x1ba   : > { %2496 = vmatmul.bf16.gmra.mxu1 %v7745_v33  ;;  %v5536_v33 = vld [vmem:[#allocation6 + $0x194] sm:$0xf0] }
 0x1bb   : > { %7743 = vst [vmem:[#allocation60_spill] sm:$0xff] %v6750_v35  ;;  %v2302_v8 = vadd.f32 %v2301_v15, %v2253_v48  ;;  %2447 = vmatmul.bf16.gmra.mxu0 %v7744_v14  ;;  %2545 = vmatmul.bf16.gmra.mxu2 %v7746_v36  ;;  %v4755_v14 = vld [vmem:[#allocation6 + $0x288] sm:$0xf] }
 0x1bc   : > { %2594 = vmatmul.bf16.gmra.mxu3 %v7747_v50 }
 0x1be   : > { %v2350_v23 = vpop.f32.mrf.mxu2 }
 0x1bf   : > { %v2351_v16 = vadd.f32 %v2350_v23, %v2302_v8  ;;  %v2399_v22 = vpop.f32.mrf.mxu3  ;;  %v2303_v63 = vpop.f32.mrf.mxu1 }
 0x1c0   : > { %v2254_v45 = vpop.f32.mrf.mxu0 }
 0x1c1   : > { %v2255_v31 = vadd.f32 %v2254_v45, %v6680_v49  ;;  %v6757_v30 = vadd.f32 %v2399_v22, %v2351_v16  ;;  %v7753_v49 = vld [vmem:[#allocation24_spill] sm:$0xff] }
 0x1c3   : > { %7748 = vst [vmem:[#allocation61_spill] sm:$0xff] %v6757_v30  ;;  %v2304_v47 = vadd.f32 %v2303_v63, %v2255_v31  ;;  %v6006_v63 = vld [vmem:[#allocation8] sm:$0xf] }
 0x1c6   : > { %v2352_v34 = vpop.f32.mrf.mxu2 }
 0x1c7   : > { %v2353_v0 = vadd.f32 %v2352_v34, %v2304_v47  ;;  %v2401_v62 = vpop.f32.mrf.mxu3  ;;  %v2306_v48 = vpop.f32.mrf.mxu1  ;;  %v6769_v47 = vperm.slane %v6006_v63, 1 }
 0x1c8   : > { %v2257_v19 = vpop.f32.mrf.mxu0 }
 0x1c9   : > { %v2258_v17 = vadd.f32 %v2257_v19, %v6687_v29  ;;  %v6760_v15 = vadd.f32 %v2401_v62, %v2353_v0 }
 0x1ca   : > { %2501 = vmatmul.bf16.gmra.mxu1 %v7751_v7 }
 0x1cb   : > { %7749 = vst [vmem:[#allocation62_spill] sm:$0xff] %v6760_v15  ;;  %v2307_v9 = vadd.f32 %v2306_v48, %v2258_v17  ;;  %2452 = vmatmul.bf16.gmra.mxu0 %v7750_v52  ;;  %2550 = vmatmul.bf16.gmra.mxu2 %v7752_v5 }
 0x1cc   : > { %2599 = vmatmul.bf16.gmra.mxu3 %v7753_v49 }
 0x1ce   : > { %v2355_v12 = vpop.f32.mrf.mxu2 }
 0x1cf   : > { %v2356_v8 = vadd.f32 %v2355_v12, %v2307_v9  ;;  %v2404_v23 = vpop.f32.mrf.mxu3  ;;  %v2308_v45 = vpop.f32.mrf.mxu1  ;;  %v7756_v12 = vld [vmem:[#allocation25_spill] sm:$0xff] }
 0x1d0   : > { %v2259_v16 = vpop.f32.mrf.mxu0 }
 0x1d1   : > { %v2260_v22 = vadd.f32 %v2259_v16, %v6690_v18  ;;  %v6767_v29 = vadd.f32 %v2404_v23, %v2356_v8  ;;  %v7757_v18 = vld [vmem:[#allocation26_spill] sm:$0xff]  ;;  %v7758_v8 = vld [vmem:[#allocation27_spill] sm:$0xff]  ;;  %v7759_v23 = vld [vmem:[#allocation28_spill] sm:$0xff] }
 0x1d3   : > { %7754 = vst [vmem:[#allocation63_spill] sm:$0xff] %v6767_v29  ;;  %v2309_v31 = vadd.f32 %v2308_v45, %v2260_v22 }
 0x1d6   : > { %v2357_v34 = vpop.f32.mrf.mxu2 }
 0x1d7   : > { %v2358_v0 = vadd.f32 %v2357_v34, %v2309_v31  ;;  %v2406_v62 = vpop.f32.mrf.mxu3  ;;  %v2467_v48 = vpop.f32.mrf.mxu1 }
 0x1d8   : > { %v2418_v19 = vpop.f32.mrf.mxu0 }
 0x1d9   : > { %v2419_v17 = vadd.f32 %v2418_v19, %v6769_v47  ;;  %v6772_v15 = vadd.f32 %v2406_v62, %v2358_v0 }
 0x1da   : > { %2662 = vmatmul.bf16.vlgmr.msrb.gmra.mxu1 %v7757_v18  ;;  %v5612_v18 = vld [vmem:[#allocation6 + $0x3f4] sm:$0xf0] }
 0x1db   : > { %7755 = vst [vmem:[#allocation64_spill] sm:$0xff] %v6772_v15  ;;  %v2468_v9 = vadd.f32 %v2467_v48, %v2419_v17  ;;  %2613 = vmatmul.bf16.vlgmr.msrb.gmra.mxu0 %v7756_v12  ;;  %2711 = vmatmul.bf16.vlgmr.msrb.gmra.mxu2 %v7758_v8  ;;  %v5548_v12 = vld [vmem:[#allocation6 + $0x1f4] sm:$0xf0] }
 0x1dc   : > { %2760 = vmatmul.bf16.vlgmr.msrb.gmra.mxu3 %v7759_v23  ;;  %v7764_v23 = vld [vmem:[#allocation33_spill] sm:$0xff] }
 0x1de   : > { %v2516_v16 = vpop.f32.mrf.mxu2 }
 0x1df   : > { %v2517_v22 = vadd.f32 %v2516_v16, %v2468_v9  ;;  %v2565_v45 = vpop.f32.mrf.mxu3  ;;  %v2469_v34 = vpop.f32.mrf.mxu1  ;;  %v7761_v9 = vld [vmem:[#allocation30_spill] sm:$0xff]  ;;  %v7762_v16 = vld [vmem:[#allocation31_spill] sm:$0xff] }
 0x1e0   : > { %v2420_v31 = vpop.f32.mrf.mxu0 }
 0x1e1   : > { %v2421_v63 = vadd.f32 %v2420_v31, %v6769_v47  ;;  %v6779_v19 = vadd.f32 %v2565_v45, %v2517_v22  ;;  %v7763_v31 = vld [vmem:[#allocation32_spill] sm:$0xff] }
 0x1e3   : > { %v2470_v0 = vadd.f32 %v2469_v34, %v2421_v63 }
 0x1e6   : > { %v2518_v62 = vpop.f32.mrf.mxu2 }
 0x1e7   : > { %v2519_v17 = vadd.f32 %v2518_v62, %v2470_v0  ;;  %v2567_v48 = vpop.f32.mrf.mxu3  ;;  %v2472_v30 = vpop.f32.mrf.mxu1 }
 0x1e8   : > { %v2423_v15 = vpop.f32.mrf.mxu0 }
 0x1e9   : > { %v2424_v29 = vadd.f32 %v2423_v15, %v6769_v47  ;;  %v6782_v35 = vadd.f32 %v2567_v48, %v2519_v17 }
 0x1ea   : > { %2667 = vmatmul.bf16.gmra.mxu1 %v7761_v9 }
 0x1eb   : > { %v2473_v51 = vadd.f32 %v2472_v30, %v2424_v29  ;;  %2618 = vmatmul.bf16.gmra.mxu0 %v7760_v32  ;;  %2716 = vmatmul.bf16.gmra.mxu2 %v7762_v16 }
 0x1ec   : > { %2765 = vmatmul.bf16.gmra.mxu3 %v7763_v31 }
 0x1ee   : > { %v2521_v22 = vpop.f32.mrf.mxu2 }
 0x1ef   : > { %v2522_v45 = vadd.f32 %v2521_v22, %v2473_v51  ;;  %v2570_v63 = vpop.f32.mrf.mxu3  ;;  %v2474_v62 = vpop.f32.mrf.mxu1  ;;  %v7765_v51 = vld [vmem:[#allocation34_spill] sm:$0xff]  ;;  %v7766_v22 = vld [vmem:[#allocation35_spill] sm:$0xff] }
 0x1f0   : > { %v2425_v34 = vpop.f32.mrf.mxu0 }
 0x1f1   : > { %v2426_v0 = vadd.f32 %v2425_v34, %v6769_v47  ;;  %v6789_v15 = vadd.f32 %v2570_v63, %v2522_v45  ;;  %v7767_v34 = vld [vmem:[#allocation36_spill] sm:$0xff]  ;;  %v4803_v45 = vld [vmem:[#allocation6 + $0x2e8] sm:$0xf]  ;;  %v5580_v63 = vld [vmem:[#allocation6 + $0x2f4] sm:$0xf0] }
 0x1f3   : > { %v2475_v17 = vadd.f32 %v2474_v62, %v2426_v0  ;;  %v4804_v0 = vor.u32 %v5580_v63, %v4803_v45 }
 0x1f5   : > { %2899 = vmatpush.bf16.msra.mxu2 %v4804_v0 }
 0x1f6   : > { %v2523_v48 = vpop.f32.mrf.mxu2 }
 0x1f7   : > { %v2524_v30 = vadd.f32 %v2523_v48, %v2475_v17  ;;  %v2572_v29 = vpop.f32.mrf.mxu3  ;;  %v2477_v32 = vpop.f32.mrf.mxu1 }
 0x1f8   : > { %v2428_v13 = vpop.f32.mrf.mxu0 }
 0x1f9   : > { %v2429_v9 = vadd.f32 %v2428_v13, %v6769_v47  ;;  %v6792_v16 = vadd.f32 %v2572_v29, %v2524_v30  ;;  %v5516_v29 = vld [vmem:[#allocation6 + $0xf4] sm:$0xf0] }
 0x1fa   : > { %2672 = vmatmul.bf16.gmra.mxu1 %v7765_v51  ;;  %v4931_v51 = vld [vmem:[#allocation6 + $0x3e8] sm:$0xf] }
 0x1fb   : > { %v2478_v31 = vadd.f32 %v2477_v32, %v2429_v9  ;;  %2623 = vmatmul.bf16.gmra.mxu0 %v7764_v23  ;;  %2721 = vmatmul.bf16.gmra.mxu2 %v7766_v22  ;;  %v4547_v9 = vld [vmem:[#allocation6 + $0xe8] sm:$0xf]  ;;  %v4932_v49 = vor.u32 %v5612_v18, %v4931_v51  ;;  %v5576_v18 = vld [vmem:[#allocation6 + $0x2d4] sm:$0xf0] }
 0x1fc   : > { %2770 = vmatmul.bf16.gmra.mxu3 %v7767_v34  ;;  %v4548_v22 = vor.u32 %v5516_v29, %v4547_v9  ;;  %v4675_v34 = vld [vmem:[#allocation6 + $0x1e8] sm:$0xf]  ;;  %v7770_v9 = vld [vmem:[#allocation39_spill] sm:$0xff] }
 0x1fd   : > { %v4676_v45 = vor.u32 %v5548_v12, %v4675_v34  ;;  %2948 = vmatpush.bf16.msra.mxu3 %v4932_v49  ;;  %v7771_v12 = vld [vmem:[#allocation40_spill] sm:$0xff]  ;;  %v4787_v49 = vld [vmem:[#allocation6 + $0x2c8] sm:$0xf] }
 0x1fe   : > { %v2526_v62 = vpop.f32.mrf.mxu2  ;;  %2801 = vmatpush.bf16.msra.mxu0 %v4548_v22  ;;  %v4788_v51 = vor.u32 %v5576_v18, %v4787_v49 }
 0x1ff   : > { %v2527_v17 = vadd.f32 %v2526_v62, %v2478_v31  ;;  %v2575_v48 = vpop.f32.mrf.mxu3  ;;  %v2479_v30 = vpop.f32.mrf.mxu1  ;;  %2850 = vmatpush.bf16.msra.mxu1 %v4676_v45 }
 0x200   : > { %v2430_v8 = vpop.f32.mrf.mxu0  ;;  %2900 = vmatpush.bf16.msra.mxu2 %v4788_v51 }
 0x201   : > { %v2431_v13 = vadd.f32 %v2430_v8, %v6769_v47  ;;  %v6799_v32 = vadd.f32 %v2575_v48, %v2527_v17 }
 0x203   : > { %v2480_v23 = vadd.f32 %v2479_v30, %v2431_v13  ;;  %v7768_v13 = vld [vmem:[#allocation37_spill] sm:$0xff]  ;;  %v7769_v30 = vld [vmem:[#allocation38_spill] sm:$0xff] }
 0x206   : > { %v2528_v31 = vpop.f32.mrf.mxu2 }
 0x207   : > { %v2529_v63 = vadd.f32 %v2528_v31, %v2480_v23  ;;  %v2577_v0 = vpop.f32.mrf.mxu3  ;;  %v2482_v17 = vpop.f32.mrf.mxu1 }
 0x208   : > { %v2433_v8 = vpop.f32.mrf.mxu0 }
 0x209   : > { %v2434_v62 = vadd.f32 %v2433_v8, %v6769_v47  ;;  %v6802_v48 = vadd.f32 %v2577_v0, %v2529_v63  ;;  %v4531_v0 = vld [vmem:[#allocation6 + $0xc8] sm:$0xf]  ;;  %v5512_v8 = vld [vmem:[#allocation6 + $0xd4] sm:$0xf0] }
 0x20a   : > { %2677 = vmatmul.bf16.gmra.mxu1 %v7769_v30  ;;  %v5608_v30 = vld [vmem:[#allocation6 + $0x3d4] sm:$0xf0] }
 0x20b   : > { %v2483_v5 = vadd.f32 %v2482_v17, %v2434_v62  ;;  %2628 = vmatmul.bf16.gmra.mxu0 %v7768_v13  ;;  %2726 = vmatmul.bf16.gmra.mxu2 %v7770_v9  ;;  %v4915_v62 = vld [vmem:[#allocation6 + $0x3c8] sm:$0xf]  ;;  %v4532_v9 = vor.u32 %v5512_v8, %v4531_v0  ;;  %v5544_v13 = vld [vmem:[#allocation6 + $0x1d4] sm:$0xf0] }
 0x20c   : > { %2775 = vmatmul.bf16.gmra.mxu3 %v7771_v12  ;;  %v4659_v12 = vld [vmem:[#allocation6 + $0x1c8] sm:$0xf]  ;;  %v4916_v7 = vor.u32 %v5608_v30, %v4915_v62  ;;  %v7774_v0 = vld [vmem:[#allocation43_spill] sm:$0xff] }
 0x20d   : > { %v4660_v49 = vor.u32 %v5544_v13, %v4659_v12  ;;  %2802 = vmatpush.bf16.msra.mxu0 %v4532_v9  ;;  %v7775_v13 = vld [vmem:[#allocation44_spill] sm:$0xff]  ;;  %v5572_v30 = vld [vmem:[#allocation6 + $0x2b4] sm:$0xf0] }
 0x20e   : > { %v2531_v23 = vpop.f32.mrf.mxu2  ;;  %2949 = vmatpush.bf16.msra.mxu3 %v4916_v7  ;;  %v4771_v7 = vld [vmem:[#allocation6 + $0x2a8] sm:$0xf] }
 0x20f   : > { %v2532_v22 = vadd.f32 %v2531_v23, %v2483_v5  ;;  %v2580_v34 = vpop.f32.mrf.mxu3  ;;  %v2484_v31 = vpop.f32.mrf.mxu1  ;;  %2851 = vmatpush.bf16.msra.mxu1 %v4660_v49  ;;  %v4772_v9 = vor.u32 %v5572_v30, %v4771_v7  ;;  %v4499_v30 = vld [vmem:[#allocation6 + $0x88] sm:$0xf] }
 0x210   : > { %v2435_v29 = vpop.f32.mrf.mxu0 }
 0x211   : > { %v2436_v45 = vadd.f32 %v2435_v29, %v6769_v47  ;;  %v6809_v63 = vadd.f32 %v2580_v34, %v2532_v22  ;;  %2901 = vmatpush.bf16.msra.mxu2 %v4772_v9  ;;  %v5504_v9 = vld [vmem:[#allocation6 + $0x94] sm:$0xf0] }
 0x212   : > { %v4500_v36 = vor.u32 %v5504_v9, %v4499_v30  ;;  %v4611_v30 = vld [vmem:[#allocation6 + $0x168] sm:$0xf]  ;;  %v7777_v9 = vld [vmem:[#allocation46_spill] sm:$0xff] }
 0x213   : > { %v2485_v17 = vadd.f32 %v2484_v31, %v2436_v45  ;;  %v7772_v45 = vld [vmem:[#allocation41_spill] sm:$0xff]  ;;  %v7773_v31 = vld [vmem:[#allocation42_spill] sm:$0xff] }
 0x216   : > { %v2533_v5 = vpop.f32.mrf.mxu2 }
 0x217   : > { %v2534_v18 = vadd.f32 %v2533_v5, %v2485_v17  ;;  %v2582_v51 = vpop.f32.mrf.mxu3  ;;  %v2487_v34 = vpop.f32.mrf.mxu1 }
 0x218   : > { %v2438_v23 = vpop.f32.mrf.mxu0 }
 0x219   : > { %v2439_v22 = vadd.f32 %v2438_v23, %v6769_v47  ;;  %v6812_v29 = vadd.f32 %v2582_v51, %v2534_v18  ;;  %v4515_v51 = vld [vmem:[#allocation6 + $0xa8] sm:$0xf]  ;;  %v5508_v23 = vld [vmem:[#allocation6 + $0xb4] sm:$0xf0] }
 0x21a   : > { %2682 = vmatmul.bf16.gmra.mxu1 %v7773_v31  ;;  %v5604_v31 = vld [vmem:[#allocation6 + $0x3b4] sm:$0xf0] }
 0x21b   : > { %v2488_v52 = vadd.f32 %v2487_v34, %v2439_v22  ;;  %2633 = vmatmul.bf16.gmra.mxu0 %v7772_v45  ;;  %2731 = vmatmul.bf16.gmra.mxu2 %v7774_v0  ;;  %v4899_v22 = vld [vmem:[#allocation6 + $0x3a8] sm:$0xf]  ;;  %v4516_v0 = vor.u32 %v5508_v23, %v4515_v51  ;;  %v5540_v45 = vld [vmem:[#allocation6 + $0x1b4] sm:$0xf0] }
 0x21c   : > { %2780 = vmatmul.bf16.gmra.mxu3 %v7775_v13  ;;  %v4643_v13 = vld [vmem:[#allocation6 + $0x1a8] sm:$0xf]  ;;  %v4900_v50 = vor.u32 %v5604_v31, %v4899_v22 }
 0x21d   : > { %v4644_v7 = vor.u32 %v5540_v45, %v4643_v13  ;;  %2803 = vmatpush.bf16.msra.mxu0 %v4516_v0  ;;  %v4883_v45 = vld [vmem:[#allocation6 + $0x388] sm:$0xf]  ;;  %v5600_v0 = vld [vmem:[#allocation6 + $0x394] sm:$0xf0] }
 0x21e   : > { %v2536_v12 = vpop.f32.mrf.mxu2  ;;  %2950 = vmatpush.bf16.msra.mxu3 %v4900_v50  ;;  %v4884_v13 = vor.u32 %v5600_v0, %v4883_v45  ;;  %v4467_v45 = vld [vmem:[#allocation6 + $0x48] sm:$0xf]  ;;  %v5496_v0 = vld [vmem:[#allocation6 + $0x54] sm:$0xf0] }
 0x21f   : > { %v2537_v8 = vadd.f32 %v2536_v12, %v2488_v52  ;;  %v2585_v62 = vpop.f32.mrf.mxu3  ;;  %v2489_v5 = vpop.f32.mrf.mxu1  ;;  %2852 = vmatpush.bf16.msra.mxu1 %v4644_v7  ;;  %v4627_v12 = vld [vmem:[#allocation6 + $0x188] sm:$0xf] }
 0x220   : > { %v2440_v17 = vpop.f32.mrf.mxu0  ;;  %v4628_v23 = vor.u32 %v5536_v33, %v4627_v12  ;;  %v7776_v7 = vld [vmem:[#allocation45_spill] sm:$0xff]  ;;  %v5532_v33 = vld [vmem:[#allocation6 + $0x174] sm:$0xf0] }
 0x221   : > { %v2441_v49 = vadd.f32 %v2440_v17, %v6769_v47  ;;  %v6819_v18 = vadd.f32 %v2585_v62, %v2537_v8  ;;  %2804 = vmatpush.bf16.msra.mxu0 %v4500_v36  ;;  %v5564_v12 = vld [vmem:[#allocation6 + $0x274] sm:$0xf0]  ;;  %v4612_v36 = vor.u32 %v5532_v33, %v4611_v30 }
 0x222   : > { %2951 = vmatpush.bf16.msra.mxu3 %v4884_v13 }
 0x223   : > { %v2490_v34 = vadd.f32 %v2489_v5, %v2441_v49  ;;  %v5568_v49 = vld [vmem:[#allocation6 + $0x294] sm:$0xf0]  ;;  %2853 = vmatpush.bf16.msra.mxu1 %v4628_v23 }
 0x224   : > { %v4756_v31 = vor.u32 %v5568_v49, %v4755_v14  ;;  %v4739_v14 = vld [vmem:[#allocation6 + $0x268] sm:$0xf]  ;;  %v7779_v49 = vld [vmem:[#allocation48_spill] sm:$0xff] }
 0x226   : > { %v2538_v52 = vpop.f32.mrf.mxu2  ;;  %2902 = vmatpush.bf16.msra.mxu2 %v4756_v31 }
 0x227   : > { %v2539_v17 = vadd.f32 %v2538_v52, %v2490_v34  ;;  %v2587_v8 = vpop.f32.mrf.mxu3  ;;  %v2492_v51 = vpop.f32.mrf.mxu1  ;;  %v4483_v34 = vld [vmem:[#allocation6 + $0x68] sm:$0xf]  ;;  %v5500_v52 = vld [vmem:[#allocation6 + $0x74] sm:$0xf0]  ;;  %2854 = vmatpush.bf16.msra.mxu1 %v4612_v36 }
 0x228   : > { %v2443_v62 = vpop.f32.mrf.mxu0 }
 0x229   : > { %v2444_v5 = vadd.f32 %v2443_v62, %v6769_v47  ;;  %v6822_v50 = vadd.f32 %v2587_v8, %v2539_v17  ;;  %v4484_v62 = vor.u32 %v5500_v52, %v4483_v34  ;;  %v4740_v17 = vor.u32 %v5564_v12, %v4739_v14  ;;  %v4867_v8 = vld [vmem:[#allocation6 + $0x368] sm:$0xf]  ;;  %v5592_v14 = vld [vmem:[#allocation6 + $0x354] sm:$0xf0] }
 0x22a   : > { %2687 = vmatmul.bf16.gmra.mxu1 %v7777_v9  ;;  %v4595_v9 = vld [vmem:[#allocation6 + $0x148] sm:$0xf] }
 0x22b   : > { %v2493_v22 = vadd.f32 %v2492_v51, %v2444_v5  ;;  %2638 = vmatmul.bf16.gmra.mxu0 %v7776_v7  ;;  %2736 = vmatmul.bf16.gmra.mxu2 %v7778_v11  ;;  %v5596_v5 = vld [vmem:[#allocation6 + $0x374] sm:$0xf0]  ;;  %v4468_v7 = vor.u32 %v5496_v0, %v4467_v45  ;;  %v4596_v33 = vor.u32 %v5528_v10, %v4595_v9 }
 0x22c   : > { %2785 = vmatmul.bf16.gmra.mxu3 %v7779_v49  ;;  %2805 = vmatpush.bf16.msra.mxu0 %v4484_v62  ;;  %v4868_v51 = vor.u32 %v5596_v5, %v4867_v8  ;;  %v5560_v49 = vld [vmem:[#allocation6 + $0x254] sm:$0xf0]  ;;  %v4851_v62 = vld [vmem:[#allocation6 + $0x348] sm:$0xf] }
 0x22d   : > { %2903 = vmatpush.bf16.msra.mxu2 %v4740_v17  ;;  %v4724_v13 = vor.u32 %v5560_v49, %v4723_v38  ;;  %v4852_v36 = vor.u32 %v5592_v14, %v4851_v62  ;;  %2855 = vmatpush.bf16.msra.mxu1 %v4596_v33  ;;  %v4451_v8 = vld [vmem:[#allocation6 + $0x28] sm:$0xf]  ;;  %v5492_v5 = vld [vmem:[#allocation6 + $0x34] sm:$0xf0] }
 0x22e   : > { %v2541_v23 = vpop.f32.mrf.mxu2  ;;  %2952 = vmatpush.bf16.msra.mxu3 %v4868_v51  ;;  %v4452_v45 = vor.u32 %v5492_v5, %v4451_v8  ;;  %v5524_v0 = vld [vmem:[#allocation6 + $0x134] sm:$0xf0]  ;;  %v4835_v38 = vld [vmem:[#allocation6 + $0x328] sm:$0xf] }
 0x22f   : > { %v2542_v11 = vadd.f32 %v2541_v23, %v2493_v22  ;;  %v2590_v34 = vpop.f32.mrf.mxu3  ;;  %v2494_v30 = vpop.f32.mrf.mxu1  ;;  %v4579_v23 = vld [vmem:[#allocation6 + $0x128] sm:$0xf]  ;;  %v5588_v9 = vld [vmem:[#allocation6 + $0x334] sm:$0xf0] }
 0x230   : > { %v2445_v52 = vpop.f32.mrf.mxu0  ;;  %2806 = vmatpush.bf16.msra.mxu0 %v4468_v7  ;;  %v4580_v17 = vor.u32 %v5524_v0, %v4579_v23  ;;  %v4435_v7 = vld [vmem:[#allocation6 + $0x8] sm:$0xf]  ;;  %v5488_v51 = vld [vmem:[#allocation6 + $0x14] sm:$0xf0] }
 0x231   : > { %v2446_v31 = vadd.f32 %v2445_v52, %v6769_v47  ;;  %v6829_v12 = vadd.f32 %v2590_v34, %v2542_v11  ;;  %v5556_v52 = vld [vmem:[#allocation6 + $0x234] sm:$0xf0]  ;;  %2904 = vmatpush.bf16.msra.mxu2 %v4724_v13  ;;  %v4836_v11 = vor.u32 %v5588_v9, %v4835_v38  ;;  %v4563_v34 = vld [vmem:[#allocation6 + $0x108] sm:$0xf]  ;;  %v4436_v62 = vor.u32 %v5488_v51, %v4435_v7 }
 0x232   : > { %v4708_v10 = vor.u32 %v5556_v52, %v4707_v37  ;;  %2953 = vmatpush.bf16.msra.mxu3 %v4852_v36  ;;  %2856 = vmatpush.bf16.msra.mxu1 %v4580_v17  ;;  %v5520_v14 = vld [vmem:[#allocation6 + $0x114] sm:$0xf0]  ;;  %v4691_v8 = vld [vmem:[#allocation6 + $0x208] sm:$0xf] }
 0x233   : > { %v2495_v22 = vadd.f32 %v2494_v30, %v2446_v31  ;;  %v5552_v5 = vld [vmem:[#allocation6 + $0x214] sm:$0xf0]  ;;  %v4564_v23 = vor.u32 %v5520_v14, %v4563_v34 }
 0x234   : > { %2807 = vmatpush.bf16.msra.mxu0 %v4452_v45  ;;  %v4692_v36 = vor.u32 %v5552_v5, %v4691_v8  ;;  %v4819_v45 = vld [vmem:[#allocation6 + $0x308] sm:$0xf]  ;;  %v5584_v0 = vld [vmem:[#allocation6 + $0x314] sm:$0xf0] }
 0x235   : > { %2905 = vmatpush.bf16.msra.mxu2 %v4708_v10  ;;  %v4820_v17 = vor.u32 %v5584_v0, %v4819_v45 }
 0x236   : > { %v2543_v49 = vpop.f32.mrf.mxu2  ;;  %2954 = vmatpush.bf16.msra.mxu3 %v4836_v11  ;;  %2857 = vmatpush.bf16.msra.mxu1 %v4564_v23 }
 0x237   : > { %v2544_v31 = vadd.f32 %v2543_v49, %v2495_v22  ;;  %v2592_v30 = vpop.f32.mrf.mxu3  ;;  %v2497_v37 = vpop.f32.mrf.mxu1 }
 0x238   : > { %v2448_v33 = vpop.f32.mrf.mxu0  ;;  %2808 = vmatpush.bf16.msra.mxu0 %v4436_v62 }
 0x239   : > { %v2449_v13 = vadd.f32 %v2448_v33, %v6769_v47  ;;  %v6832_v52 = vadd.f32 %v2592_v30, %v2544_v31  ;;  %2906 = vmatpush.bf16.msra.mxu2 %v4692_v36 }
 0x23a   : > { %2692 = vmatmul.bf16.gmra.mxu1 %v6647_v39  ;;  %2955 = vmatpush.bf16.msra.mxu3 %v4820_v17 }
 0x23b   : > { %v2498_v22 = vadd.f32 %v2497_v37, %v2449_v13  ;;  %2643 = vmatmul.bf16.gmra.mxu0 %v6645_v61  ;;  %2741 = vmatmul.bf16.gmra.mxu2 %v6649_v6 }
 0x23c   : > { %2790 = vmatmul.bf16.gmra.mxu3 %v6652_v24 }
 0x23e   : > { %v2546_v10 = vpop.f32.mrf.mxu2 }
 0x23f   : > { %v2547_v38 = vadd.f32 %v2546_v10, %v2498_v22  ;;  %v2595_v9 = vpop.f32.mrf.mxu3  ;;  %v2499_v7 = vpop.f32.mrf.mxu1 }
 0x240   : > { %v2450_v49 = vpop.f32.mrf.mxu0 }
 0x241   : > { %v2451_v11 = vadd.f32 %v2450_v49, %v6769_v47  ;;  %v6839_v51 = vadd.f32 %v2595_v9, %v2547_v38 }
 0x243   : > { %v2500_v34 = vadd.f32 %v2499_v7, %v2451_v11 }
 0x246   : > { %v2548_v31 = vpop.f32.mrf.mxu2 }
 0x247   : > { %v2549_v30 = vadd.f32 %v2548_v31, %v2500_v34  ;;  %v2597_v33 = vpop.f32.mrf.mxu3  ;;  %v2502_v8 = vpop.f32.mrf.mxu1 }
 0x248   : > { %v2453_v62 = vpop.f32.mrf.mxu0 }
 0x249   : > { %v2454_v14 = vadd.f32 %v2453_v62, %v6769_v47  ;;  %v6842_v5 = vadd.f32 %v2597_v33, %v2549_v30 }
 0x24a   : > { %2697 = vmatmul.bf16.gmra.mxu1 %v6673_v46 }
 0x24b   : > { %v2503_v13 = vadd.f32 %v2502_v8, %v2454_v14  ;;  %2648 = vmatmul.bf16.gmra.mxu0 %v6671_v20  ;;  %2746 = vmatmul.bf16.gmra.mxu2 %v6675_v21 }
 0x24c   : > { %2795 = vmatmul.bf16.gmra.mxu3 %v6678_v40 }
 0x24e   : > { %v2551_v37 = vpop.f32.mrf.mxu2 }
 0x24f   : > { %v2552_v23 = vadd.f32 %v2551_v37, %v2503_v13  ;;  %v2600_v36 = vpop.f32.mrf.mxu3  ;;  %v2504_v17 = vpop.f32.mrf.mxu1 }
 0x250   : > { %v2455_v45 = vpop.f32.mrf.mxu0 }
 0x251   : > { %v2456_v0 = vadd.f32 %v2455_v45, %v6769_v47  ;;  %v6849_v22 = vadd.f32 %v2600_v36, %v2552_v23 }
 0x253   : > { %v2505_v10 = vadd.f32 %v2504_v17, %v2456_v0 }
 0x256   : > { %v2553_v38 = vpop.f32.mrf.mxu2 }
 0x257   : > { %v2554_v9 = vadd.f32 %v2553_v38, %v2505_v10  ;;  %v2602_v49 = vpop.f32.mrf.mxu3  ;;  %v2663_v34 = vpop.f32.mrf.mxu1 }
 0x258   : > { %v2614_v11 = vpop.f32.mrf.mxu0 }
 0x259   : > { %v2615_v7 = vadd.f32 %v2614_v11, %v6779_v19  ;;  %v6852_v31 = vadd.f32 %v2602_v49, %v2554_v9 }
 0x25a   : > { %2858 = vmatmul.bf16.vlgmr.msra.gmra.mxu1 %v6331_v42 }
 0x25b   : > { %v2664_v30 = vadd.f32 %v2663_v34, %v2615_v7  ;;  %2809 = vmatmul.bf16.vlgmr.msra.gmra.mxu0 %v6329_v41  ;;  %2907 = vmatmul.bf16.vlgmr.msra.gmra.mxu2 %v6333_v43 }
 0x25c   : > { %2956 = vmatmul.bf16.vlgmr.msra.gmra.mxu3 %v6335_v44 }
 0x25e   : > { %v2712_v47 = vpop.f32.mrf.mxu2 }
 0x25f   : > { %v2713_v33 = vadd.f32 %v2712_v47, %v2664_v30  ;;  %v2761_v62 = vpop.f32.mrf.mxu3  ;;  %v2665_v13 = vpop.f32.mrf.mxu1 }
 0x260   : > { %v2616_v14 = vpop.f32.mrf.mxu0 }
 0x261   : > { %v2617_v8 = vadd.f32 %v2616_v14, %v6782_v35  ;;  %v6859_v19 = vadd.f32 %v2761_v62, %v2713_v33 }
 0x263   : > { %7780 = vst [vmem:[#allocation65_spill] sm:$0xff] %v6859_v19  ;;  %v2666_v37 = vadd.f32 %v2665_v13, %v2617_v8 }
 0x266   : > { %v2714_v23 = vpop.f32.mrf.mxu2 }
 0x267   : > { %v2715_v36 = vadd.f32 %v2714_v23, %v2666_v37  ;;  %v2763_v45 = vpop.f32.mrf.mxu3  ;;  %v2668_v10 = vpop.f32.mrf.mxu1 }
 0x268   : > { %v2619_v0 = vpop.f32.mrf.mxu0 }
 0x269   : > { %v2620_v17 = vadd.f32 %v2619_v0, %v6789_v15  ;;  %v6862_v38 = vadd.f32 %v2763_v45, %v2715_v36  ;;  %v5708_v45 = vld [vmem:[#allocation6 + $0x6f4] sm:$0xf0] }
 0x26a   : > { %2863 = vmatmul.bf16.gmra.mxu1 %v6351_v54 }
 0x26b   : > { %7781 = vst [vmem:[#allocation66_spill] sm:$0xff] %v6862_v38  ;;  %v2669_v9 = vadd.f32 %v2668_v10, %v2620_v17  ;;  %2814 = vmatmul.bf16.gmra.mxu0 %v6349_v53  ;;  %2912 = vmatmul.bf16.gmra.mxu2 %v6353_v55  ;;  %v7812_v38 = vld [vmem:[#allocation29_spill] sm:$0xff] }
 0x26c   : > { %2961 = vmatmul.bf16.gmra.mxu3 %v6355_v56 }
 0x26e   : > { %v2717_v35 = vpop.f32.mrf.mxu2 }
 0x26f   : > { %v2718_v49 = vadd.f32 %v2717_v35, %v2669_v9  ;;  %v2766_v11 = vpop.f32.mrf.mxu3  ;;  %v2670_v30 = vpop.f32.mrf.mxu1 }
 0x270   : > { %v2621_v7 = vpop.f32.mrf.mxu0 }
 0x271   : > { %v2622_v34 = vadd.f32 %v2621_v7, %v6792_v16  ;;  %v6869_v15 = vadd.f32 %v2766_v11, %v2718_v49  ;;  %v5315_v16 = vld [vmem:[#allocation6 + $0x6e8] sm:$0xf] }
 0x272   : > { %v5316_v0 = vor.u32 %v5708_v45, %v5315_v16 }
 0x273   : > { %7782 = vst [vmem:[#allocation67_spill] sm:$0xff] %v6869_v15  ;;  %v2671_v47 = vadd.f32 %v2670_v30, %v2622_v34  ;;  %v5059_v34 = vld [vmem:[#allocation6 + $0x4e8] sm:$0xf]  ;;  %v5644_v30 = vld [vmem:[#allocation6 + $0x4f4] sm:$0xf0] }
 0x274   : > { %3095 = vmatpush.bf16.msrb.mxu2 %v5316_v0  ;;  %v5219_v15 = vld [vmem:[#allocation6 + $0x628] sm:$0xf] }
 0x276   : > { %v2719_v33 = vpop.f32.mrf.mxu2 }
 0x277   : > { %v2720_v62 = vadd.f32 %v2719_v33, %v2671_v47  ;;  %v2768_v14 = vpop.f32.mrf.mxu3  ;;  %v2673_v37 = vpop.f32.mrf.mxu1  ;;  %v5443_v47 = vld [vmem:[#allocation6 + $0x7e8] sm:$0xf]  ;;  %v5060_v33 = vor.u32 %v5644_v30, %v5059_v34 }
 0x278   : > { %v2624_v8 = vpop.f32.mrf.mxu0 }
 0x279   : > { %v2625_v13 = vadd.f32 %v2624_v8, %v6799_v32  ;;  %v6872_v23 = vadd.f32 %v2768_v14, %v2720_v62  ;;  %v5740_v62 = vld [vmem:[#allocation6 + $0x7f4] sm:$0xf0]  ;;  %v5187_v14 = vld [vmem:[#allocation6 + $0x5e8] sm:$0xf]  ;;  %2997 = vmatpush.bf16.msrb.mxu0 %v5060_v33 }
 0x27a   : > { %2868 = vmatmul.bf16.gmra.mxu1 %v6371_v2  ;;  %v5676_v8 = vld [vmem:[#allocation6 + $0x5f4] sm:$0xf0] }
 0x27b   : > { %7783 = vst [vmem:[#allocation68_spill] sm:$0xff] %v6872_v23  ;;  %v2674_v36 = vadd.f32 %v2673_v37, %v2625_v13  ;;  %2819 = vmatmul.bf16.gmra.mxu0 %v6369_v1  ;;  %2917 = vmatmul.bf16.gmra.mxu2 %v6373_v3  ;;  %v5444_v13 = vor.u32 %v5740_v62, %v5443_v47  ;;  %v5688_v23 = vld [vmem:[#allocation6 + $0x654] sm:$0xf0] }
 0x27c   : > { %2966 = vmatmul.bf16.gmra.mxu3 %v6375_v4  ;;  %v5188_v37 = vor.u32 %v5676_v8, %v5187_v14  ;;  %v5043_v8 = vld [vmem:[#allocation6 + $0x4c8] sm:$0xf] }
 0x27d   : > { %3144 = vmatpush.bf16.msrb.mxu3 %v5444_v13  ;;  %v5640_v13 = vld [vmem:[#allocation6 + $0x4d4] sm:$0xf0] }
 0x27e   : > { %v2722_v17 = vpop.f32.mrf.mxu2  ;;  %3046 = vmatpush.bf16.msrb.mxu1 %v5188_v37  ;;  %v5427_v37 = vld [vmem:[#allocation6 + $0x7c8] sm:$0xf] }
 0x27f   : > { %v2723_v10 = vadd.f32 %v2722_v17, %v2674_v36  ;;  %v2771_v9 = vpop.f32.mrf.mxu3  ;;  %v2675_v49 = vpop.f32.mrf.mxu1 }
 0x280   : > { %v2626_v35 = vpop.f32.mrf.mxu0 }
 0x281   : > { %v2627_v32 = vadd.f32 %v2626_v35, %v6802_v48  ;;  %v6879_v11 = vadd.f32 %v2771_v9, %v2723_v10  ;;  %v5299_v35 = vld [vmem:[#allocation6 + $0x6c8] sm:$0xf] }
 0x283   : > { %7784 = vst [vmem:[#allocation69_spill] sm:$0xff] %v6879_v11  ;;  %v2676_v7 = vadd.f32 %v2675_v49, %v2627_v32  ;;  %v5704_v32 = vld [vmem:[#allocation6 + $0x6d4] sm:$0xf0]  ;;  %v5235_v11 = vld [vmem:[#allocation6 + $0x648] sm:$0xf] }
 0x284   : > { %v5300_v49 = vor.u32 %v5704_v32, %v5299_v35 }
 0x286   : > { %v2724_v16 = vpop.f32.mrf.mxu2  ;;  %3096 = vmatpush.bf16.msrb.mxu2 %v5300_v49 }
 0x287   : > { %v2725_v36 = vadd.f32 %v2724_v16, %v2676_v7  ;;  %v2773_v45 = vpop.f32.mrf.mxu3  ;;  %v2678_v17 = vpop.f32.mrf.mxu1  ;;  %v5044_v16 = vor.u32 %v5640_v13, %v5043_v8 }
 0x288   : > { %v2629_v0 = vpop.f32.mrf.mxu0 }
 0x289   : > { %v2630_v48 = vadd.f32 %v2629_v0, %v6809_v63  ;;  %v6882_v10 = vadd.f32 %v2773_v45, %v2725_v36  ;;  %v5736_v36 = vld [vmem:[#allocation6 + $0x7d4] sm:$0xf0]  ;;  %v5171_v45 = vld [vmem:[#allocation6 + $0x5c8] sm:$0xf]  ;;  %2998 = vmatpush.bf16.msrb.mxu0 %v5044_v16 }
 0x28a   : > { %2873 = vmatmul.bf16.gmra.mxu1 %v6391_v26  ;;  %v5672_v0 = vld [vmem:[#allocation6 + $0x5d4] sm:$0xf0] }
 0x28b   : > { %7785 = vst [vmem:[#allocation70_spill] sm:$0xff] %v6882_v10  ;;  %v2679_v9 = vadd.f32 %v2678_v17, %v2630_v48  ;;  %2824 = vmatmul.bf16.gmra.mxu0 %v6389_v25  ;;  %2922 = vmatmul.bf16.gmra.mxu2 %v6393_v27  ;;  %v5428_v48 = vor.u32 %v5736_v36, %v5427_v37  ;;  %v5656_v10 = vld [vmem:[#allocation6 + $0x554] sm:$0xf0] }
 0x28c   : > { %2971 = vmatmul.bf16.gmra.mxu3 %v6395_v28  ;;  %v5172_v17 = vor.u32 %v5672_v0, %v5171_v45  ;;  %v5027_v0 = vld [vmem:[#allocation6 + $0x4a8] sm:$0xf] }
 0x28d   : > { %3145 = vmatpush.bf16.msrb.mxu3 %v5428_v48  ;;  %v5636_v48 = vld [vmem:[#allocation6 + $0x4b4] sm:$0xf0] }
 0x28e   : > { %v2727_v7 = vpop.f32.mrf.mxu2  ;;  %3047 = vmatpush.bf16.msrb.mxu1 %v5172_v17  ;;  %v5411_v17 = vld [vmem:[#allocation6 + $0x7a8] sm:$0xf] }
 0x28f   : > { %v2728_v34 = vadd.f32 %v2727_v7, %v2679_v9  ;;  %v2776_v30 = vpop.f32.mrf.mxu3  ;;  %v2680_v33 = vpop.f32.mrf.mxu1 }
 0x290   : > { %v2631_v47 = vpop.f32.mrf.mxu0 }
 0x291   : > { %v2632_v63 = vadd.f32 %v2631_v47, %v6812_v29  ;;  %v6889_v62 = vadd.f32 %v2776_v30, %v2728_v34  ;;  %v5283_v47 = vld [vmem:[#allocation6 + $0x6a8] sm:$0xf] }
 0x293   : > { %7786 = vst [vmem:[#allocation71_spill] sm:$0xff] %v6889_v62  ;;  %v2681_v14 = vadd.f32 %v2680_v33, %v2632_v63  ;;  %v5700_v63 = vld [vmem:[#allocation6 + $0x6b4] sm:$0xf0] }
 0x294   : > { %v5284_v33 = vor.u32 %v5700_v63, %v5283_v47  ;;  %v5011_v47 = vld [vmem:[#allocation6 + $0x488] sm:$0xf]  ;;  %v5632_v63 = vld [vmem:[#allocation6 + $0x494] sm:$0xf0] }
 0x296   : > { %v2729_v35 = vpop.f32.mrf.mxu2  ;;  %3097 = vmatpush.bf16.msrb.mxu2 %v5284_v33 }
 0x297   : > { %v2730_v9 = vadd.f32 %v2729_v35, %v2681_v14  ;;  %v2778_v32 = vpop.f32.mrf.mxu3  ;;  %v2683_v7 = vpop.f32.mrf.mxu1  ;;  %v5028_v35 = vor.u32 %v5636_v48, %v5027_v0 }
 0x298   : > { %v2634_v49 = vpop.f32.mrf.mxu0 }
 0x299   : > { %v2635_v29 = vadd.f32 %v2634_v49, %v6819_v18  ;;  %v6892_v34 = vadd.f32 %v2778_v32, %v2730_v9  ;;  %v5732_v9 = vld [vmem:[#allocation6 + $0x7b4] sm:$0xf0]  ;;  %v5155_v32 = vld [vmem:[#allocation6 + $0x5a8] sm:$0xf]  ;;  %2999 = vmatpush.bf16.msrb.mxu0 %v5028_v35 }
 0x29a   : > { %2878 = vmatmul.bf16.gmra.mxu1 %v6411_v58  ;;  %v5668_v49 = vld [vmem:[#allocation6 + $0x5b4] sm:$0xf0] }
 0x29b   : > { %7787 = vst [vmem:[#allocation72_spill] sm:$0xff] %v6892_v34  ;;  %v2684_v30 = vadd.f32 %v2683_v7, %v2635_v29  ;;  %2829 = vmatmul.bf16.gmra.mxu0 %v6409_v57  ;;  %2927 = vmatmul.bf16.gmra.mxu2 %v6413_v59  ;;  %v5412_v29 = vor.u32 %v5732_v9, %v5411_v17  ;;  %v5395_v9 = vld [vmem:[#allocation6 + $0x788] sm:$0xf]  ;;  %v5728_v35 = vld [vmem:[#allocation6 + $0x794] sm:$0xf0] }
 0x29c   : > { %2976 = vmatmul.bf16.gmra.mxu3 %v6415_v60  ;;  %v5156_v7 = vor.u32 %v5668_v49, %v5155_v32  ;;  %v5396_v49 = vor.u32 %v5728_v35, %v5395_v9  ;;  %v7792_v34 = vld [vmem:[#allocation15_spill] sm:$0xff]  ;;  %v5107_v35 = vld [vmem:[#allocation6 + $0x548] sm:$0xf] }
 0x29d   : > { %3146 = vmatpush.bf16.msrb.mxu3 %v5412_v29  ;;  %v5624_v9 = vld [vmem:[#allocation6 + $0x454] sm:$0xf0] }
 0x29e   : > { %v2732_v14 = vpop.f32.mrf.mxu2  ;;  %3048 = vmatpush.bf16.msrb.mxu1 %v5156_v7  ;;  %v7790_v7 = vld [vmem:[#allocation13_spill] sm:$0xff] }
 0x29f   : > { %v2733_v8 = vadd.f32 %v2732_v14, %v2684_v30  ;;  %v2781_v13 = vpop.f32.mrf.mxu3  ;;  %v2685_v16 = vpop.f32.mrf.mxu1 }
 0x2a0   : > { %v2636_v37 = vpop.f32.mrf.mxu0 }
 0x2a1   : > { %v2637_v18 = vadd.f32 %v2636_v37, %v6822_v50  ;;  %v6899_v36 = vadd.f32 %v2781_v13, %v2733_v8  ;;  %v5139_v50 = vld [vmem:[#allocation6 + $0x588] sm:$0xf]  ;;  %v5012_v13 = vor.u32 %v5632_v63, %v5011_v47  ;;  %v5664_v37 = vld [vmem:[#allocation6 + $0x594] sm:$0xf0]  ;;  %v7791_v63 = vld [vmem:[#allocation14_spill] sm:$0xff]  ;;  %3147 = vmatpush.bf16.msrb.mxu3 %v5396_v49  ;;  %v5236_v49 = vor.u32 %v5688_v23, %v5235_v11 }
 0x2a2   : > { %v5123_v47 = vld [vmem:[#allocation6 + $0x568] sm:$0xf]  ;;  %v5716_v11 = vld [vmem:[#allocation6 + $0x734] sm:$0xf0] }
 0x2a3   : > { %7788 = vst [vmem:[#allocation73_spill] sm:$0xff] %v6899_v36  ;;  %v2686_v45 = vadd.f32 %v2685_v16, %v2637_v18  ;;  %v5267_v18 = vld [vmem:[#allocation6 + $0x688] sm:$0xf]  ;;  %v5696_v16 = vld [vmem:[#allocation6 + $0x694] sm:$0xf0]  ;;  %v5140_v36 = vor.u32 %v5664_v37, %v5139_v50  ;;  %3000 = vmatpush.bf16.msrb.mxu0 %v5012_v13 }
 0x2a4   : > { %v5268_v17 = vor.u32 %v5696_v16, %v5267_v18  ;;  %v5660_v50 = vld [vmem:[#allocation6 + $0x574] sm:$0xf0]  ;;  %v7793_v18 = vld [vmem:[#allocation16_spill] sm:$0xff]  ;;  %v5379_v13 = vld [vmem:[#allocation6 + $0x768] sm:$0xf] }
 0x2a5   : > { %3049 = vmatpush.bf16.msrb.mxu1 %v5140_v36  ;;  %v5692_v37 = vld [vmem:[#allocation6 + $0x674] sm:$0xf0]  ;;  %v5347_v23 = vld [vmem:[#allocation6 + $0x728] sm:$0xf] }
 0x2a6   : > { %v2734_v30 = vpop.f32.mrf.mxu2  ;;  %3098 = vmatpush.bf16.msrb.mxu2 %v5268_v17  ;;  %v5724_v16 = vld [vmem:[#allocation6 + $0x774] sm:$0xf0] }
 0x2a7   : > { %v2735_v33 = vadd.f32 %v2734_v30, %v2686_v45  ;;  %v2783_v14 = vpop.f32.mrf.mxu3  ;;  %v2688_v48 = vpop.f32.mrf.mxu1  ;;  %v4995_v45 = vld [vmem:[#allocation6 + $0x468] sm:$0xf]  ;;  %v5628_v30 = vld [vmem:[#allocation6 + $0x474] sm:$0xf0]  ;;  %v5380_v36 = vor.u32 %v5724_v16, %v5379_v13 }
 0x2a8   : > { %v2639_v8 = vpop.f32.mrf.mxu0  ;;  %v4963_v13 = vld [vmem:[#allocation6 + $0x428] sm:$0xf]  ;;  %v5620_v16 = vld [vmem:[#allocation6 + $0x434] sm:$0xf0] }
 0x2a9   : > { %v2640_v0 = vadd.f32 %v2639_v8, %v6829_v12  ;;  %v6902_v32 = vadd.f32 %v2783_v14, %v2735_v33  ;;  %v4996_v12 = vor.u32 %v5628_v30, %v4995_v45  ;;  %v5251_v8 = vld [vmem:[#allocation6 + $0x668] sm:$0xf]  ;;  %v5124_v33 = vor.u32 %v5660_v50, %v5123_v47  ;;  %3148 = vmatpush.bf16.msrb.mxu3 %v5380_v36 }
 0x2aa   : > { %2883 = vmatmul.bf16.gmra.mxu1 %v7791_v63  ;;  %v5252_v14 = vor.u32 %v5692_v37, %v5251_v8  ;;  %v5108_v50 = vor.u32 %v5656_v10, %v5107_v35  ;;  %v5720_v8 = vld [vmem:[#allocation6 + $0x754] sm:$0xf0]  ;;  %v5558_v63 = vld [vmem:[#allocation6 + $0x24c] sm:$0xf] }
 0x2ab   : > { %7789 = vst [vmem:[#allocation74_spill] sm:$0xff] %v6902_v32  ;;  %v2689_v29 = vadd.f32 %v2688_v48, %v2640_v0  ;;  %2834 = vmatmul.bf16.gmra.mxu0 %v7790_v7  ;;  %2932 = vmatmul.bf16.gmra.mxu2 %v7792_v34  ;;  %v4979_v48 = vld [vmem:[#allocation6 + $0x448] sm:$0xf]  ;;  %v5616_v35 = vld [vmem:[#allocation6 + $0x414] sm:$0xf0] }
 0x2ac   : > { %2981 = vmatmul.bf16.gmra.mxu3 %v7793_v18  ;;  %3001 = vmatpush.bf16.msrb.mxu0 %v4996_v12  ;;  %v4980_v62 = vor.u32 %v5624_v9, %v4979_v48  ;;  %v5363_v12 = vld [vmem:[#allocation6 + $0x748] sm:$0xf]  ;;  %v4964_v48 = vor.u32 %v5620_v16, %v4963_v13  ;;  %v5652_v9 = vld [vmem:[#allocation6 + $0x534] sm:$0xf0]  ;;  %v4597_v34 = vld [vmem:[#allocation6 + $0x158] sm:$0xf0] }
 0x2ad   : > { %3050 = vmatpush.bf16.msrb.mxu1 %v5124_v33  ;;  %3099 = vmatpush.bf16.msrb.mxu2 %v5252_v14  ;;  %v5364_v33 = vor.u32 %v5720_v8, %v5363_v12  ;;  %v5648_v12 = vld [vmem:[#allocation6 + $0x514] sm:$0xf0]  ;;  %v5203_v8 = vld [vmem:[#allocation6 + $0x608] sm:$0xf]  ;;  %v5554_v7 = vld [vmem:[#allocation6 + $0x22c] sm:$0xf] }
 0x2ae   : > { %v2737_v0 = vpop.f32.mrf.mxu2  ;;  %v5680_v13 = vld [vmem:[#allocation6 + $0x614] sm:$0xf0] }
 0x2af   : > { %v2738_v32 = vadd.f32 %v2737_v0, %v2689_v29  ;;  %v2786_v45 = vpop.f32.mrf.mxu3  ;;  %v2690_v47 = vpop.f32.mrf.mxu1  ;;  %v5091_v0 = vld [vmem:[#allocation6 + $0x528] sm:$0xf]  ;;  %3149 = vmatpush.bf16.msrb.mxu3 %v5364_v33  ;;  %v5204_v33 = vor.u32 %v5680_v13, %v5203_v8  ;;  %v7830_v18 = vld [vmem:[#allocation47_spill] sm:$0xff] }
 0x2b0   : > { %v2641_v30 = vpop.f32.mrf.mxu0  ;;  %3002 = vmatpush.bf16.msrb.mxu0 %v4980_v62  ;;  %v5092_v14 = vor.u32 %v5652_v9, %v5091_v0  ;;  %v4947_v62 = vld [vmem:[#allocation6 + $0x408] sm:$0xf] }
 0x2b1   : > { %v2642_v17 = vadd.f32 %v2641_v30, %v6832_v52  ;;  %v6909_v37 = vadd.f32 %v2786_v45, %v2738_v32  ;;  %3051 = vmatpush.bf16.msrb.mxu1 %v5108_v50  ;;  %v5684_v52 = vld [vmem:[#allocation6 + $0x634] sm:$0xf0]  ;;  %3100 = vmatpush.bf16.msrb.mxu2 %v5236_v49  ;;  %v5348_v32 = vor.u32 %v5716_v11, %v5347_v23  ;;  %v5075_v45 = vld [vmem:[#allocation6 + $0x508] sm:$0xf]  ;;  %v7797_v23 = vld [vmem:[#allocation18_spill] sm:$0xff] }
 0x2b2   : > { %v5220_v10 = vor.u32 %v5684_v52, %v5219_v15  ;;  %v4948_v50 = vor.u32 %v5616_v35, %v4947_v62  ;;  %v5076_v16 = vor.u32 %v5648_v12, %v5075_v45  ;;  %v5331_v0 = vld [vmem:[#allocation6 + $0x708] sm:$0xf]  ;;  %v7798_v11 = vld [vmem:[#allocation19_spill] sm:$0xff] }
 0x2b3   : > { %7794 = vst [vmem:[#allocation75_spill] sm:$0xff] %v6909_v37  ;;  %v2691_v29 = vadd.f32 %v2690_v47, %v2642_v17  ;;  %3150 = vmatpush.bf16.msrb.mxu3 %v5348_v32 }
 0x2b4   : > { %3003 = vmatpush.bf16.msrb.mxu0 %v4964_v48  ;;  %v5712_v48 = vld [vmem:[#allocation6 + $0x714] sm:$0xf0] }
 0x2b5   : > { %3052 = vmatpush.bf16.msrb.mxu1 %v5092_v14  ;;  %3101 = vmatpush.bf16.msrb.mxu2 %v5220_v10  ;;  %v5332_v52 = vor.u32 %v5712_v48, %v5331_v0  ;;  %v7796_v14 = vld [vmem:[#allocation17_spill] sm:$0xff]  ;;  %v7803_v0 = vld [vmem:[#allocation22_spill] sm:$0xff]  ;;  %v7804_v48 = vld [vmem:[#allocation23_spill] sm:$0xff] }
 0x2b6   : > { %v2739_v36 = vpop.f32.mrf.mxu2 }
 0x2b7   : > { %v2740_v30 = vadd.f32 %v2739_v36, %v2691_v29  ;;  %v2788_v17 = vpop.f32.mrf.mxu3  ;;  %v2693_v15 = vpop.f32.mrf.mxu1  ;;  %3151 = vmatpush.bf16.msrb.mxu3 %v5332_v52 }
 0x2b8   : > { %v2644_v47 = vpop.f32.mrf.mxu0  ;;  %3004 = vmatpush.bf16.msrb.mxu0 %v4948_v50 }
 0x2b9   : > { %v2645_v49 = vadd.f32 %v2644_v47, %v6839_v51  ;;  %v6912_v9 = vadd.f32 %v2788_v17, %v2740_v30  ;;  %3053 = vmatpush.bf16.msrb.mxu1 %v5076_v16  ;;  %v7799_v51 = vld [vmem:[#allocation20_spill] sm:$0xff]  ;;  %3102 = vmatpush.bf16.msrb.mxu2 %v5204_v33  ;;  %v7802_v33 = vld [vmem:[#allocation21_spill] sm:$0xff] }
 0x2ba   : > { %2888 = vmatmul.bf16.gmra.mxu1 %v7797_v23  ;;  %v4629_v23 = vld [vmem:[#allocation6 + $0x198] sm:$0xf0] }
 0x2bb   : > { %7795 = vst [vmem:[#allocation76_spill] sm:$0xff] %v6912_v9  ;;  %v2694_v29 = vadd.f32 %v2693_v15, %v2645_v49  ;;  %2839 = vmatmul.bf16.gmra.mxu0 %v7796_v14  ;;  %2937 = vmatmul.bf16.gmra.mxu2 %v7798_v11  ;;  %v5566_v14 = vld [vmem:[#allocation6 + $0x28c] sm:$0xf] }
 0x2bc   : > { %2986 = vmatmul.bf16.gmra.mxu3 %v7799_v51 }
 0x2be   : > { %v2742_v10 = vpop.f32.mrf.mxu2 }
 0x2bf   : > { %v2743_v36 = vadd.f32 %v2742_v10, %v2694_v29  ;;  %v2791_v62 = vpop.f32.mrf.mxu3  ;;  %v2695_v45 = vpop.f32.mrf.mxu1 }
 0x2c0   : > { %v2646_v35 = vpop.f32.mrf.mxu0 }
 0x2c1   : > { %v2647_v32 = vadd.f32 %v2646_v35, %v6842_v5  ;;  %v6919_v30 = vadd.f32 %v2791_v62, %v2743_v36  ;;  %v7805_v5 = vld [vmem:[#allocation24_spill] sm:$0xff] }
 0x2c3   : > { %7800 = vst [vmem:[#allocation77_spill] sm:$0xff] %v6919_v30  ;;  %v2696_v17 = vadd.f32 %v2695_v45, %v2647_v32  ;;  %v6007_v45 = vld [vmem:[#allocation8] sm:$0xf] }
 0x2c6   : > { %v2744_v47 = vpop.f32.mrf.mxu2 }
 0x2c7   : > { %v2745_v50 = vadd.f32 %v2744_v47, %v2696_v17  ;;  %v2793_v12 = vpop.f32.mrf.mxu3  ;;  %v2698_v49 = vpop.f32.mrf.mxu1  ;;  %v6931_v17 = vperm.slane %v6007_v45, 2 }
 0x2c8   : > { %v2649_v8 = vpop.f32.mrf.mxu0 }
 0x2c9   : > { %v2650_v13 = vadd.f32 %v2649_v8, %v6849_v22  ;;  %v6922_v15 = vadd.f32 %v2793_v12, %v2745_v50 }
 0x2ca   : > { %2893 = vmatmul.bf16.gmra.mxu1 %v7803_v0 }
 0x2cb   : > { %7801 = vst [vmem:[#allocation78_spill] sm:$0xff] %v6922_v15  ;;  %v2699_v16 = vadd.f32 %v2698_v49, %v2650_v13  ;;  %2844 = vmatmul.bf16.gmra.mxu0 %v7802_v33  ;;  %2942 = vmatmul.bf16.gmra.mxu2 %v7804_v48 }
 0x2cc   : > { %2991 = vmatmul.bf16.gmra.mxu3 %v7805_v5 }
 0x2ce   : > { %v2747_v52 = vpop.f32.mrf.mxu2 }
 0x2cf   : > { %v2748_v29 = vadd.f32 %v2747_v52, %v2699_v16  ;;  %v2796_v10 = vpop.f32.mrf.mxu3  ;;  %v2700_v35 = vpop.f32.mrf.mxu1  ;;  %v7808_v52 = vld [vmem:[#allocation25_spill] sm:$0xff] }
 0x2d0   : > { %v2651_v36 = vpop.f32.mrf.mxu0 }
 0x2d1   : > { %v2652_v62 = vadd.f32 %v2651_v36, %v6852_v31  ;;  %v6929_v22 = vadd.f32 %v2796_v10, %v2748_v29  ;;  %v7809_v31 = vld [vmem:[#allocation26_spill] sm:$0xff]  ;;  %v7810_v29 = vld [vmem:[#allocation27_spill] sm:$0xff]  ;;  %v7811_v10 = vld [vmem:[#allocation28_spill] sm:$0xff] }
 0x2d3   : > { %7806 = vst [vmem:[#allocation79_spill] sm:$0xff] %v6929_v22  ;;  %v2701_v32 = vadd.f32 %v2700_v35, %v2652_v62 }
 0x2d6   : > { %v2749_v47 = vpop.f32.mrf.mxu2 }
 0x2d7   : > { %v2750_v50 = vadd.f32 %v2749_v47, %v2701_v32  ;;  %v2798_v12 = vpop.f32.mrf.mxu3  ;;  %v2859_v49 = vpop.f32.mrf.mxu1 }
 0x2d8   : > { %v2810_v8 = vpop.f32.mrf.mxu0 }
 0x2d9   : > { %v2811_v13 = vadd.f32 %v2810_v8, %v6931_v17  ;;  %v6934_v15 = vadd.f32 %v2798_v12, %v2750_v50 }
 0x2da   : > { %3054 = vmatmul.bf16.vlgmr.msrb.gmra.mxu1 %v7809_v31  ;;  %v4933_v31 = vld [vmem:[#allocation6 + $0x3f8] sm:$0xf0] }
 0x2db   : > { %7807 = vst [vmem:[#allocation80_spill] sm:$0xff] %v6934_v15  ;;  %v2860_v16 = vadd.f32 %v2859_v49, %v2811_v13  ;;  %3005 = vmatmul.bf16.vlgmr.msrb.gmra.mxu0 %v7808_v52  ;;  %3103 = vmatmul.bf16.vlgmr.msrb.gmra.mxu2 %v7810_v29  ;;  %v4677_v52 = vld [vmem:[#allocation6 + $0x1f8] sm:$0xf0] }
 0x2dc   : > { %3152 = vmatmul.bf16.vlgmr.msrb.gmra.mxu3 %v7811_v10  ;;  %v7816_v10 = vld [vmem:[#allocation33_spill] sm:$0xff] }
 0x2de   : > { %v2908_v36 = vpop.f32.mrf.mxu2 }
 0x2df   : > { %v2909_v62 = vadd.f32 %v2908_v36, %v2860_v16  ;;  %v2957_v35 = vpop.f32.mrf.mxu3  ;;  %v2861_v47 = vpop.f32.mrf.mxu1  ;;  %v7813_v16 = vld [vmem:[#allocation30_spill] sm:$0xff]  ;;  %v7814_v36 = vld [vmem:[#allocation31_spill] sm:$0xff] }
 0x2e0   : > { %v2812_v32 = vpop.f32.mrf.mxu0 }
 0x2e1   : > { %v2813_v45 = vadd.f32 %v2812_v32, %v6931_v17  ;;  %v6941_v8 = vadd.f32 %v2957_v35, %v2909_v62  ;;  %v7815_v32 = vld [vmem:[#allocation32_spill] sm:$0xff] }
 0x2e3   : > { %v2862_v50 = vadd.f32 %v2861_v47, %v2813_v45 }
 0x2e6   : > { %v2910_v12 = vpop.f32.mrf.mxu2 }
 0x2e7   : > { %v2911_v13 = vadd.f32 %v2910_v12, %v2862_v50  ;;  %v2959_v49 = vpop.f32.mrf.mxu3  ;;  %v2864_v30 = vpop.f32.mrf.mxu1 }
 0x2e8   : > { %v2815_v15 = vpop.f32.mrf.mxu0 }
 0x2e9   : > { %v2816_v22 = vadd.f32 %v2815_v15, %v6931_v17  ;;  %v6944_v9 = vadd.f32 %v2959_v49, %v2911_v13 }
 0x2ea   : > { %3059 = vmatmul.bf16.gmra.mxu1 %v7813_v16 }
 0x2eb   : > { %v2865_v37 = vadd.f32 %v2864_v30, %v2816_v22  ;;  %3010 = vmatmul.bf16.gmra.mxu0 %v7812_v38  ;;  %3108 = vmatmul.bf16.gmra.mxu2 %v7814_v36 }
 0x2ec   : > { %3157 = vmatmul.bf16.gmra.mxu3 %v7815_v32 }
 0x2ee   : > { %v2913_v62 = vpop.f32.mrf.mxu2 }
 0x2ef   : > { %v2914_v35 = vadd.f32 %v2913_v62, %v2865_v37  ;;  %v2962_v45 = vpop.f32.mrf.mxu3  ;;  %v2866_v12 = vpop.f32.mrf.mxu1  ;;  %v7817_v37 = vld [vmem:[#allocation34_spill] sm:$0xff]  ;;  %v7818_v62 = vld [vmem:[#allocation35_spill] sm:$0xff] }
 0x2f0   : > { %v2817_v47 = vpop.f32.mrf.mxu0 }
 0x2f1   : > { %v2818_v50 = vadd.f32 %v2817_v47, %v6931_v17  ;;  %v6951_v15 = vadd.f32 %v2962_v45, %v2914_v35  ;;  %v7819_v47 = vld [vmem:[#allocation36_spill] sm:$0xff]  ;;  %v5578_v35 = vld [vmem:[#allocation6 + $0x2ec] sm:$0xf] }
 0x2f2   : > { %v4805_v45 = vld [vmem:[#allocation6 + $0x2f8] sm:$0xf0] }
 0x2f3   : > { %v2867_v13 = vadd.f32 %v2866_v12, %v2818_v50  ;;  %v4808_v50 = vor.u32 %v5578_v35, %v4805_v45 }
 0x2f5   : > { %3291 = vmatpush.bf16.msra.mxu2 %v4808_v50 }
 0x2f6   : > { %v2915_v49 = vpop.f32.mrf.mxu2 }
 0x2f7   : > { %v2916_v30 = vadd.f32 %v2915_v49, %v2867_v13  ;;  %v2964_v22 = vpop.f32.mrf.mxu3  ;;  %v2869_v38 = vpop.f32.mrf.mxu1 }
 0x2f8   : > { %v2820_v19 = vpop.f32.mrf.mxu0 }
 0x2f9   : > { %v2821_v16 = vadd.f32 %v2820_v19, %v6931_v17  ;;  %v6954_v36 = vadd.f32 %v2964_v22, %v2916_v30  ;;  %v4549_v22 = vld [vmem:[#allocation6 + $0xf8] sm:$0xf0] }
 0x2fa   : > { %3064 = vmatmul.bf16.gmra.mxu1 %v7817_v37  ;;  %v5610_v37 = vld [vmem:[#allocation6 + $0x3ec] sm:$0xf] }
 0x2fb   : > { %v2870_v32 = vadd.f32 %v2869_v38, %v2821_v16  ;;  %3015 = vmatmul.bf16.gmra.mxu0 %v7816_v10  ;;  %3113 = vmatmul.bf16.gmra.mxu2 %v7818_v62  ;;  %v5514_v16 = vld [vmem:[#allocation6 + $0xec] sm:$0xf]  ;;  %v4936_v5 = vor.u32 %v5610_v37, %v4933_v31  ;;  %v4789_v31 = vld [vmem:[#allocation6 + $0x2d8] sm:$0xf0] }
 0x2fc   : > { %3162 = vmatmul.bf16.gmra.mxu3 %v7819_v47  ;;  %v4552_v62 = vor.u32 %v5514_v16, %v4549_v22  ;;  %v5546_v47 = vld [vmem:[#allocation6 + $0x1ec] sm:$0xf]  ;;  %v7822_v16 = vld [vmem:[#allocation39_spill] sm:$0xff] }
 0x2fd   : > { %v4680_v35 = vor.u32 %v5546_v47, %v4677_v52  ;;  %3340 = vmatpush.bf16.msra.mxu3 %v4936_v5  ;;  %v7823_v52 = vld [vmem:[#allocation40_spill] sm:$0xff]  ;;  %v5574_v5 = vld [vmem:[#allocation6 + $0x2cc] sm:$0xf] }
 0x2fe   : > { %v2918_v12 = vpop.f32.mrf.mxu2  ;;  %3193 = vmatpush.bf16.msra.mxu0 %v4552_v62  ;;  %v4792_v37 = vor.u32 %v5574_v5, %v4789_v31 }
 0x2ff   : > { %v2919_v13 = vadd.f32 %v2918_v12, %v2870_v32  ;;  %v2967_v49 = vpop.f32.mrf.mxu3  ;;  %v2871_v30 = vpop.f32.mrf.mxu1  ;;  %3242 = vmatpush.bf16.msra.mxu1 %v4680_v35 }
 0x300   : > { %v2822_v29 = vpop.f32.mrf.mxu0  ;;  %3292 = vmatpush.bf16.msra.mxu2 %v4792_v37 }
 0x301   : > { %v2823_v19 = vadd.f32 %v2822_v29, %v6931_v17  ;;  %v6961_v38 = vadd.f32 %v2967_v49, %v2919_v13 }
 0x303   : > { %v2872_v10 = vadd.f32 %v2871_v30, %v2823_v19  ;;  %v7820_v19 = vld [vmem:[#allocation37_spill] sm:$0xff]  ;;  %v7821_v30 = vld [vmem:[#allocation38_spill] sm:$0xff] }
 0x306   : > { %v2920_v32 = vpop.f32.mrf.mxu2 }
 0x307   : > { %v2921_v45 = vadd.f32 %v2920_v32, %v2872_v10  ;;  %v2969_v50 = vpop.f32.mrf.mxu3  ;;  %v2874_v13 = vpop.f32.mrf.mxu1 }
 0x308   : > { %v2825_v29 = vpop.f32.mrf.mxu0 }
 0x309   : > { %v2826_v12 = vadd.f32 %v2825_v29, %v6931_v17  ;;  %v6964_v49 = vadd.f32 %v2969_v50, %v2921_v45  ;;  %v5510_v50 = vld [vmem:[#allocation6 + $0xcc] sm:$0xf]  ;;  %v4533_v29 = vld [vmem:[#allocation6 + $0xd8] sm:$0xf0] }
 0x30a   : > { %3069 = vmatmul.bf16.gmra.mxu1 %v7821_v30  ;;  %v4917_v30 = vld [vmem:[#allocation6 + $0x3d8] sm:$0xf0] }
 0x30b   : > { %v2875_v48 = vadd.f32 %v2874_v13, %v2826_v12  ;;  %3020 = vmatmul.bf16.gmra.mxu0 %v7820_v19  ;;  %3118 = vmatmul.bf16.gmra.mxu2 %v7822_v16  ;;  %v5606_v12 = vld [vmem:[#allocation6 + $0x3cc] sm:$0xf]  ;;  %v4536_v16 = vor.u32 %v5510_v50, %v4533_v29  ;;  %v4661_v19 = vld [vmem:[#allocation6 + $0x1d8] sm:$0xf0] }
 0x30c   : > { %3167 = vmatmul.bf16.gmra.mxu3 %v7823_v52  ;;  %v5542_v52 = vld [vmem:[#allocation6 + $0x1cc] sm:$0xf]  ;;  %v4920_v0 = vor.u32 %v5606_v12, %v4917_v30  ;;  %v7826_v50 = vld [vmem:[#allocation43_spill] sm:$0xff] }
 0x30d   : > { %v4664_v5 = vor.u32 %v5542_v52, %v4661_v19  ;;  %3194 = vmatpush.bf16.msra.mxu0 %v4536_v16  ;;  %v7827_v19 = vld [vmem:[#allocation44_spill] sm:$0xff] }
 0x30e   : > { %v2923_v10 = vpop.f32.mrf.mxu2  ;;  %3341 = vmatpush.bf16.msra.mxu3 %v4920_v0  ;;  %v5570_v0 = vld [vmem:[#allocation6 + $0x2ac] sm:$0xf]  ;;  %v4773_v30 = vld [vmem:[#allocation6 + $0x2b8] sm:$0xf0] }
 0x30f   : > { %v2924_v62 = vadd.f32 %v2923_v10, %v2875_v48  ;;  %v2972_v47 = vpop.f32.mrf.mxu3  ;;  %v2876_v32 = vpop.f32.mrf.mxu1  ;;  %3243 = vmatpush.bf16.msra.mxu1 %v4664_v5  ;;  %v4776_v16 = vor.u32 %v5570_v0, %v4773_v30  ;;  %v5502_v30 = vld [vmem:[#allocation6 + $0x8c] sm:$0xf] }
 0x310   : > { %v2827_v22 = vpop.f32.mrf.mxu0 }
 0x311   : > { %v2828_v35 = vadd.f32 %v2827_v22, %v6931_v17  ;;  %v6971_v45 = vadd.f32 %v2972_v47, %v2924_v62  ;;  %3293 = vmatpush.bf16.msra.mxu2 %v4776_v16  ;;  %v4501_v16 = vld [vmem:[#allocation6 + $0x98] sm:$0xf0] }
 0x312   : > { %v4504_v11 = vor.u32 %v5502_v30, %v4501_v16  ;;  %v5530_v30 = vld [vmem:[#allocation6 + $0x16c] sm:$0xf] }
 0x313   : > { %v2877_v13 = vadd.f32 %v2876_v32, %v2828_v35  ;;  %v7824_v35 = vld [vmem:[#allocation41_spill] sm:$0xff]  ;;  %v7825_v32 = vld [vmem:[#allocation42_spill] sm:$0xff] }
 0x314   : > { %v7829_v16 = vld [vmem:[#allocation46_spill] sm:$0xff] }
 0x316   : > { %v2925_v48 = vpop.f32.mrf.mxu2 }
 0x317   : > { %v2926_v31 = vadd.f32 %v2925_v48, %v2877_v13  ;;  %v2974_v37 = vpop.f32.mrf.mxu3  ;;  %v2879_v47 = vpop.f32.mrf.mxu1 }
 0x318   : > { %v2830_v10 = vpop.f32.mrf.mxu0 }
 0x319   : > { %v2831_v62 = vadd.f32 %v2830_v10, %v6931_v17  ;;  %v6974_v22 = vadd.f32 %v2974_v37, %v2926_v31  ;;  %v5506_v37 = vld [vmem:[#allocation6 + $0xac] sm:$0xf]  ;;  %v4517_v10 = vld [vmem:[#allocation6 + $0xb8] sm:$0xf0] }
 0x31a   : > { %3074 = vmatmul.bf16.gmra.mxu1 %v7825_v32  ;;  %v4901_v32 = vld [vmem:[#allocation6 + $0x3b8] sm:$0xf0] }
 0x31b   : > { %v2880_v33 = vadd.f32 %v2879_v47, %v2831_v62  ;;  %3025 = vmatmul.bf16.gmra.mxu0 %v7824_v35  ;;  %3123 = vmatmul.bf16.gmra.mxu2 %v7826_v50  ;;  %v5602_v62 = vld [vmem:[#allocation6 + $0x3ac] sm:$0xf]  ;;  %v4520_v50 = vor.u32 %v5506_v37, %v4517_v10  ;;  %v4645_v35 = vld [vmem:[#allocation6 + $0x1b8] sm:$0xf0] }
 0x31c   : > { %3172 = vmatmul.bf16.gmra.mxu3 %v7827_v19  ;;  %v5538_v19 = vld [vmem:[#allocation6 + $0x1ac] sm:$0xf]  ;;  %v4904_v51 = vor.u32 %v5602_v62, %v4901_v32 }
 0x31d   : > { %v4648_v0 = vor.u32 %v5538_v19, %v4645_v35  ;;  %3195 = vmatpush.bf16.msra.mxu0 %v4520_v50  ;;  %v5598_v35 = vld [vmem:[#allocation6 + $0x38c] sm:$0xf]  ;;  %v4885_v50 = vld [vmem:[#allocation6 + $0x398] sm:$0xf0] }
 0x31e   : > { %v2928_v52 = vpop.f32.mrf.mxu2  ;;  %3342 = vmatpush.bf16.msra.mxu3 %v4904_v51  ;;  %v4888_v19 = vor.u32 %v5598_v35, %v4885_v50  ;;  %v5494_v35 = vld [vmem:[#allocation6 + $0x4c] sm:$0xf]  ;;  %v4469_v50 = vld [vmem:[#allocation6 + $0x58] sm:$0xf0] }
 0x31f   : > { %v2929_v29 = vadd.f32 %v2928_v52, %v2880_v33  ;;  %v2977_v12 = vpop.f32.mrf.mxu3  ;;  %v2881_v48 = vpop.f32.mrf.mxu1  ;;  %3244 = vmatpush.bf16.msra.mxu1 %v4648_v0  ;;  %v5534_v52 = vld [vmem:[#allocation6 + $0x18c] sm:$0xf] }
 0x320   : > { %v2832_v13 = vpop.f32.mrf.mxu0  ;;  %v4632_v10 = vor.u32 %v5534_v52, %v4629_v23  ;;  %v7828_v0 = vld [vmem:[#allocation45_spill] sm:$0xff]  ;;  %v4613_v23 = vld [vmem:[#allocation6 + $0x178] sm:$0xf0] }
 0x321   : > { %v2833_v5 = vadd.f32 %v2832_v13, %v6931_v17  ;;  %v6981_v31 = vadd.f32 %v2977_v12, %v2929_v29  ;;  %3196 = vmatpush.bf16.msra.mxu0 %v4504_v11  ;;  %v4741_v52 = vld [vmem:[#allocation6 + $0x278] sm:$0xf0]  ;;  %v4616_v11 = vor.u32 %v5530_v30, %v4613_v23 }
 0x322   : > { %3343 = vmatpush.bf16.msra.mxu3 %v4888_v19 }
 0x323   : > { %v2882_v47 = vadd.f32 %v2881_v48, %v2833_v5  ;;  %v4757_v5 = vld [vmem:[#allocation6 + $0x298] sm:$0xf0]  ;;  %3245 = vmatpush.bf16.msra.mxu1 %v4632_v10 }
 0x324   : > { %v4760_v32 = vor.u32 %v5566_v14, %v4757_v5  ;;  %v5562_v14 = vld [vmem:[#allocation6 + $0x26c] sm:$0xf]  ;;  %v7831_v5 = vld [vmem:[#allocation48_spill] sm:$0xff] }
 0x326   : > { %v2930_v33 = vpop.f32.mrf.mxu2  ;;  %3294 = vmatpush.bf16.msra.mxu2 %v4760_v32 }
 0x327   : > { %v2931_v13 = vadd.f32 %v2930_v33, %v2882_v47  ;;  %v2979_v29 = vpop.f32.mrf.mxu3  ;;  %v2884_v37 = vpop.f32.mrf.mxu1  ;;  %v5498_v47 = vld [vmem:[#allocation6 + $0x6c] sm:$0xf]  ;;  %v4485_v33 = vld [vmem:[#allocation6 + $0x78] sm:$0xf0]  ;;  %3246 = vmatpush.bf16.msra.mxu1 %v4616_v11 }
 0x328   : > { %v2835_v12 = vpop.f32.mrf.mxu0 }
 0x329   : > { %v2836_v48 = vadd.f32 %v2835_v12, %v6931_v17  ;;  %v6984_v51 = vadd.f32 %v2979_v29, %v2931_v13  ;;  %v4488_v12 = vor.u32 %v5498_v47, %v4485_v33  ;;  %v4744_v13 = vor.u32 %v5562_v14, %v4741_v52  ;;  %v5594_v29 = vld [vmem:[#allocation6 + $0x36c] sm:$0xf]  ;;  %v4853_v14 = vld [vmem:[#allocation6 + $0x358] sm:$0xf0] }
 0x32a   : > { %3079 = vmatmul.bf16.gmra.mxu1 %v7829_v16  ;;  %v5526_v16 = vld [vmem:[#allocation6 + $0x14c] sm:$0xf] }
 0x32b   : > { %v2885_v62 = vadd.f32 %v2884_v37, %v2836_v48  ;;  %3030 = vmatmul.bf16.gmra.mxu0 %v7828_v0  ;;  %3128 = vmatmul.bf16.gmra.mxu2 %v7830_v18  ;;  %v4869_v48 = vld [vmem:[#allocation6 + $0x378] sm:$0xf0]  ;;  %v4472_v0 = vor.u32 %v5494_v35, %v4469_v50  ;;  %v4600_v23 = vor.u32 %v5526_v16, %v4597_v34 }
 0x32c   : > { %3177 = vmatmul.bf16.gmra.mxu3 %v7831_v5  ;;  %3197 = vmatpush.bf16.msra.mxu0 %v4488_v12  ;;  %v4872_v37 = vor.u32 %v5594_v29, %v4869_v48  ;;  %v4725_v5 = vld [vmem:[#allocation6 + $0x258] sm:$0xf0]  ;;  %v5590_v12 = vld [vmem:[#allocation6 + $0x34c] sm:$0xf] }
 0x32d   : > { %3295 = vmatpush.bf16.msra.mxu2 %v4744_v13  ;;  %v4728_v19 = vor.u32 %v5558_v63, %v4725_v5  ;;  %v4856_v11 = vor.u32 %v5590_v12, %v4853_v14  ;;  %3247 = vmatpush.bf16.msra.mxu1 %v4600_v23  ;;  %v5490_v29 = vld [vmem:[#allocation6 + $0x2c] sm:$0xf]  ;;  %v4453_v48 = vld [vmem:[#allocation6 + $0x38] sm:$0xf0] }
 0x32e   : > { %v2933_v10 = vpop.f32.mrf.mxu2  ;;  %3344 = vmatpush.bf16.msra.mxu3 %v4872_v37  ;;  %v4456_v35 = vor.u32 %v5490_v29, %v4453_v48  ;;  %v4581_v50 = vld [vmem:[#allocation6 + $0x138] sm:$0xf0]  ;;  %v5586_v63 = vld [vmem:[#allocation6 + $0x32c] sm:$0xf] }
 0x32f   : > { %v2934_v18 = vadd.f32 %v2933_v10, %v2885_v62  ;;  %v2982_v47 = vpop.f32.mrf.mxu3  ;;  %v2886_v30 = vpop.f32.mrf.mxu1  ;;  %v5522_v10 = vld [vmem:[#allocation6 + $0x12c] sm:$0xf]  ;;  %v4837_v16 = vld [vmem:[#allocation6 + $0x338] sm:$0xf0] }
 0x330   : > { %v2837_v33 = vpop.f32.mrf.mxu0  ;;  %3198 = vmatpush.bf16.msra.mxu0 %v4472_v0  ;;  %v4584_v13 = vor.u32 %v5522_v10, %v4581_v50  ;;  %v5486_v0 = vld [vmem:[#allocation6 + $0xc] sm:$0xf]  ;;  %v4437_v37 = vld [vmem:[#allocation6 + $0x18] sm:$0xf0] }
 0x331   : > { %v2838_v32 = vadd.f32 %v2837_v33, %v6931_v17  ;;  %v6991_v52 = vadd.f32 %v2982_v47, %v2934_v18  ;;  %v4709_v33 = vld [vmem:[#allocation6 + $0x238] sm:$0xf0]  ;;  %3296 = vmatpush.bf16.msra.mxu2 %v4728_v19  ;;  %v4840_v18 = vor.u32 %v5586_v63, %v4837_v16  ;;  %v5518_v47 = vld [vmem:[#allocation6 + $0x10c] sm:$0xf]  ;;  %v4440_v12 = vor.u32 %v5486_v0, %v4437_v37 }
 0x332   : > { %v4712_v34 = vor.u32 %v5554_v7, %v4709_v33  ;;  %3345 = vmatpush.bf16.msra.mxu3 %v4856_v11  ;;  %3248 = vmatpush.bf16.msra.mxu1 %v4584_v13  ;;  %v4565_v14 = vld [vmem:[#allocation6 + $0x118] sm:$0xf0]  ;;  %v5550_v29 = vld [vmem:[#allocation6 + $0x20c] sm:$0xf] }
 0x333   : > { %v2887_v62 = vadd.f32 %v2886_v30, %v2838_v32  ;;  %v4693_v48 = vld [vmem:[#allocation6 + $0x218] sm:$0xf0]  ;;  %v4568_v10 = vor.u32 %v5518_v47, %v4565_v14 }
 0x334   : > { %3199 = vmatpush.bf16.msra.mxu0 %v4456_v35  ;;  %v4696_v11 = vor.u32 %v5550_v29, %v4693_v48  ;;  %v5582_v35 = vld [vmem:[#allocation6 + $0x30c] sm:$0xf]  ;;  %v4821_v50 = vld [vmem:[#allocation6 + $0x318] sm:$0xf0] }
 0x335   : > { %3297 = vmatpush.bf16.msra.mxu2 %v4712_v34  ;;  %v4824_v13 = vor.u32 %v5582_v35, %v4821_v50 }
 0x336   : > { %v2935_v5 = vpop.f32.mrf.mxu2  ;;  %3346 = vmatpush.bf16.msra.mxu3 %v4840_v18  ;;  %3249 = vmatpush.bf16.msra.mxu1 %v4568_v10 }
 0x337   : > { %v2936_v32 = vadd.f32 %v2935_v5, %v2887_v62  ;;  %v2984_v30 = vpop.f32.mrf.mxu3  ;;  %v2889_v7 = vpop.f32.mrf.mxu1 }
 0x338   : > { %v2840_v23 = vpop.f32.mrf.mxu0  ;;  %3200 = vmatpush.bf16.msra.mxu0 %v4440_v12 }
 0x339   : > { %v2841_v19 = vadd.f32 %v2840_v23, %v6931_v17  ;;  %v6994_v33 = vadd.f32 %v2984_v30, %v2936_v32  ;;  %3298 = vmatpush.bf16.msra.mxu2 %v4696_v11 }
 0x33a   : > { %3084 = vmatmul.bf16.gmra.mxu1 %v6647_v39  ;;  %3347 = vmatpush.bf16.msra.mxu3 %v4824_v13 }
 0x33b   : > { %v2890_v62 = vadd.f32 %v2889_v7, %v2841_v19  ;;  %3035 = vmatmul.bf16.gmra.mxu0 %v6645_v61  ;;  %3133 = vmatmul.bf16.gmra.mxu2 %v6649_v6 }
 0x33c   : > { %3182 = vmatmul.bf16.gmra.mxu3 %v6652_v24 }
 0x33e   : > { %v2938_v34 = vpop.f32.mrf.mxu2 }
 0x33f   : > { %v2939_v63 = vadd.f32 %v2938_v34, %v2890_v62  ;;  %v2987_v16 = vpop.f32.mrf.mxu3  ;;  %v2891_v0 = vpop.f32.mrf.mxu1 }
 0x340   : > { %v2842_v5 = vpop.f32.mrf.mxu0 }
 0x341   : > { %v2843_v18 = vadd.f32 %v2842_v5, %v6931_v17  ;;  %v7001_v37 = vadd.f32 %v2987_v16, %v2939_v63 }
 0x343   : > { %v2892_v47 = vadd.f32 %v2891_v0, %v2843_v18 }
 0x346   : > { %v2940_v32 = vpop.f32.mrf.mxu2 }
 0x347   : > { %v2941_v30 = vadd.f32 %v2940_v32, %v2892_v47  ;;  %v2989_v23 = vpop.f32.mrf.mxu3  ;;  %v2894_v29 = vpop.f32.mrf.mxu1 }
 0x348   : > { %v2845_v12 = vpop.f32.mrf.mxu0 }
 0x349   : > { %v2846_v14 = vadd.f32 %v2845_v12, %v6931_v17  ;;  %v7004_v48 = vadd.f32 %v2989_v23, %v2941_v30 }
 0x34a   : > { %3089 = vmatmul.bf16.gmra.mxu1 %v6673_v46 }
 0x34b   : > { %v2895_v19 = vadd.f32 %v2894_v29, %v2846_v14  ;;  %3040 = vmatmul.bf16.gmra.mxu0 %v6671_v20  ;;  %3138 = vmatmul.bf16.gmra.mxu2 %v6675_v21 }
 0x34c   : > { %3187 = vmatmul.bf16.gmra.mxu3 %v6678_v40 }
 0x34e   : > { %v2943_v7 = vpop.f32.mrf.mxu2 }
 0x34f   : > { %v2944_v10 = vadd.f32 %v2943_v7, %v2895_v19  ;;  %v2992_v11 = vpop.f32.mrf.mxu3  ;;  %v2896_v13 = vpop.f32.mrf.mxu1 }
 0x350   : > { %v2847_v35 = vpop.f32.mrf.mxu0 }
 0x351   : > { %v2848_v50 = vadd.f32 %v2847_v35, %v6931_v17  ;;  %v7011_v62 = vadd.f32 %v2992_v11, %v2944_v10 }
 0x353   : > { %v2897_v34 = vadd.f32 %v2896_v13, %v2848_v50 }
 0x356   : > { %v2945_v63 = vpop.f32.mrf.mxu2 }
 0x357   : > { %v2946_v16 = vadd.f32 %v2945_v63, %v2897_v34  ;;  %v2994_v5 = vpop.f32.mrf.mxu3  ;;  %v3055_v47 = vpop.f32.mrf.mxu1 }
 0x358   : > { %v3006_v18 = vpop.f32.mrf.mxu0 }
 0x359   : > { %v3007_v0 = vadd.f32 %v3006_v18, %v6941_v8  ;;  %v7014_v32 = vadd.f32 %v2994_v5, %v2946_v16 }
 0x35a   : > { %3250 = vmatmul.bf16.vlgmr.msra.gmra.mxu1 %v6331_v42 }
 0x35b   : > { %v3056_v30 = vadd.f32 %v3055_v47, %v3007_v0  ;;  %3201 = vmatmul.bf16.vlgmr.msra.gmra.mxu0 %v6329_v41  ;;  %3299 = vmatmul.bf16.vlgmr.msra.gmra.mxu2 %v6333_v43 }
 0x35c   : > { %3348 = vmatmul.bf16.vlgmr.msra.gmra.mxu3 %v6335_v44 }
 0x35e   : > { %v3104_v17 = vpop.f32.mrf.mxu2 }
 0x35f   : > { %v3105_v23 = vadd.f32 %v3104_v17, %v3056_v30  ;;  %v3153_v12 = vpop.f32.mrf.mxu3  ;;  %v3057_v19 = vpop.f32.mrf.mxu1 }
 0x360   : > { %v3008_v14 = vpop.f32.mrf.mxu0 }
 0x361   : > { %v3009_v29 = vadd.f32 %v3008_v14, %v6944_v9  ;;  %v3154_v8 = vadd.f32 %v3153_v12, %v3105_v23 }
 0x363   : > { %v3058_v7 = vadd.f32 %v3057_v19, %v3009_v29  ;;  %v5449_v10 = vmul.f32 -1.442695, %v3154_v8 }
 0x365   : > { %5814 = vpow2.f32 %v5449_v10 }
 0x366   : > { %v3106_v11 = vpop.f32.mrf.mxu2 }
 0x367   : > { %v3107_v35 = vadd.f32 %v3106_v11, %v3058_v7  ;;  %v3155_v41 = vpop.f32.mrf.mxu3  ;;  %v3060_v43 = vpop.f32.mrf.mxu1  ;;  %v7832_v7 = vld [vmem:[#allocation49_spill] sm:$0xff] }
 0x368   : > { %v3011_v50 = vpop.f32.mrf.mxu0 }
 0x369   : > { %v3012_v42 = vadd.f32 %v3011_v50, %v6951_v15  ;;  %v3156_v13 = vadd.f32 %v3155_v41, %v3107_v35 }
 0x36a   : > { %3255 = vmatmul.bf16.gmra.mxu1 %v6351_v54 }
 0x36b   : > { %v3061_v44 = vadd.f32 %v3060_v43, %v3012_v42  ;;  %3206 = vmatmul.bf16.gmra.mxu0 %v6349_v53  ;;  %v5815_v34 = vpop.eup %5814  ;;  %v5451_v63 = vmul.f32 -1.442695, %v3156_v13  ;;  %3304 = vmatmul.bf16.gmra.mxu2 %v6353_v55 }
 0x36c   : > { %v3713_v9 = vadd.f32 1.0, %v5815_v34  ;;  %3353 = vmatmul.bf16.gmra.mxu3 %v6355_v56 }
 0x36d   : > { %5816 = vpow2.f32 %v5451_v63 }
 0x36e   : > { %5818 = vrcp.f32 %v3713_v9  ;;  %v3109_v16 = vpop.f32.mrf.mxu2  ;;  %v3756_v41 = vand.u32 2147483648, %v3713_v9  ;;  %v3754_v42 = vand.u32 2147483647, %v3713_v9  ;;  %vm3750_vm1 = vweird.f32 %v3713_v9 }
 0x36f   : > { %v3110_v5 = vadd.f32 %v3109_v16, %v3061_v44  ;;  %v3158_v18 = vpop.f32.mrf.mxu3  ;;  %v3062_v47 = vpop.f32.mrf.mxu1 }
 0x370   : > { %v3013_v15 = vpop.f32.mrf.mxu0  ;;  %vm3755_vm3 = vcmp.eq.f32.partialorder %v3754_v42, 8.507059e+37 }
 0x371   : > { %v3014_v0 = vadd.f32 %v3013_v15, %v6954_v36  ;;  %v3159_v30 = vadd.f32 %v3158_v18, %v3110_v5 }
 0x373   : > { %v3063_v53 = vadd.f32 %v3062_v47, %v3014_v0  ;;  %v5817_v17 = vpop.eup %5816  ;;  %v5453_v23 = vmul.f32 -1.442695, %v3159_v30  ;;  %v7833_v47 = vld [vmem:[#allocation50_spill] sm:$0xff] }
 0x374   : > { %v5819_v12 = vpop.eup %5818  ;;  %v7027_v54 = vadd.f32 1.0, %v5817_v17 }
 0x375   : > { %v3746_v55 = vmul.f32 %v5819_v12, %v3713_v9  ;;  %5820 = vpow2.f32 %v5453_v23  ;;  %vm3751_vm0 = vweird.f32 %v5819_v12 }
 0x376   : > { %5822 = vrcp.f32 %v7027_v54  ;;  %v3111_v56 = vpop.f32.mrf.mxu2  ;;  %vm3752_vm2 = vmor %vm3750_vm1, %vm3751_vm0  ;;  %vm3780_vm5 = vweird.f32 %v7027_v54 }
 0x377   : > { %v3747_v14 = vsub.f32 1.0, %v3746_v55  ;;  %v3112_v29 = vadd.f32 %v3111_v56, %v3063_v53  ;;  %v3160_v19 = vpop.f32.mrf.mxu3  ;;  %5824 = vtanh.f32 %v7832_v7  ;;  %v3065_v10 = vpop.f32.mrf.mxu1  ;;  %v3784_v56 = vand.u32 2147483647, %v7027_v54 }
 0x378   : > { %v3016_v8 = vpop.f32.mrf.mxu0 }
 0x379   : > { %v3017_v36 = vadd.f32 %v3016_v8, %v6961_v38  ;;  %v3161_v11 = vadd.f32 %v3160_v19, %v3112_v29  ;;  %v3748_v35 = vmul.f32 %v5819_v12, %v3747_v14  ;;  %vm3785_vm7 = vcmp.eq.f32.partialorder %v3784_v56, 8.507059e+37 }
 0x37a   : > { %3260 = vmatmul.bf16.gmra.mxu1 %v6371_v2 }
 0x37b   : > { %v3066_v50 = vadd.f32 %v3065_v10, %v3017_v36  ;;  %3211 = vmatmul.bf16.gmra.mxu0 %v6369_v1  ;;  %v5821_v43 = vpop.eup %5820  ;;  %v5455_v13 = vmul.f32 -1.442695, %v3161_v11  ;;  %3309 = vmatmul.bf16.gmra.mxu2 %v6373_v3  ;;  %v3749_v44 = vadd.f32 %v5819_v12, %v3748_v35  ;;  %v3757_v1 = vor.u32 1.1754944e-38, %v3756_v41 }
 0x37c   : > { %v5823_v34 = vpop.eup %5822  ;;  %v7035_v63 = vadd.f32 1.0, %v5821_v43  ;;  %3358 = vmatmul.bf16.gmra.mxu3 %v6375_v4 }
 0x37d   : > { %v3776_v38 = vmul.f32 %v5823_v34, %v7027_v54  ;;  %5826 = vpow2.f32 %v5455_v13  ;;  %v3753_v16 = vsel %vm3752_vm2, %v5819_v12, %v3749_v44  ;;  %v5825_v5 = vpop.eup %5824  ;;  %vm3781_vm4 = vweird.f32 %v5823_v34 }
 0x37e   : > { %5828 = vrcp.f32 %v7035_v63  ;;  %v3114_v18 = vpop.f32.mrf.mxu2  ;;  %v3758_v0 = vsel %vm3755_vm3, %v3757_v1, %v3753_v16  ;;  %v3786_v12 = vand.u32 2147483648, %v7027_v54  ;;  %vm3782_vm6 = vmor %vm3780_vm5, %vm3781_vm4  ;;  %vm3810_vm9 = vweird.f32 %v7035_v63 }
 0x37f   : > { %v3777_v2 = vsub.f32 1.0, %v3776_v38  ;;  %v3115_v3 = vadd.f32 %v3114_v18, %v3066_v50  ;;  %v3163_v15 = vpop.f32.mrf.mxu3  ;;  %5830 = vtanh.f32 %v7833_v47  ;;  %v3067_v30 = vpop.f32.mrf.mxu1  ;;  %v7042_v53 = vmul.f32 %v5825_v5, %v3758_v0  ;;  %v7834_v5 = vld [vmem:[#allocation51_spill] sm:$0xff] }
 0x380   : > { %v3018_v9 = vpop.f32.mrf.mxu0  ;;  %v3787_v10 = vor.u32 1.1754944e-38, %v3786_v12  ;;  %v5706_v12 = vld [vmem:[#allocation6 + $0x6ec] sm:$0xf] }
 0x381   : > { %v3019_v4 = vadd.f32 %v3018_v9, %v6964_v49  ;;  %v3164_v17 = vadd.f32 %v3163_v15, %v3115_v3  ;;  %v3778_v23 = vmul.f32 %v5823_v34, %v3777_v2  ;;  %v3814_v2 = vand.u32 2147483647, %v7035_v63 }
 0x383   : > { %v3068_v55 = vadd.f32 %v3067_v30, %v3019_v4  ;;  %v5827_v14 = vpop.eup %5826  ;;  %v5457_v29 = vmul.f32 -1.442695, %v3164_v17  ;;  %v3779_v19 = vadd.f32 %v5823_v34, %v3778_v23  ;;  %vm3815_vm11 = vcmp.eq.f32.partialorder %v3814_v2, 8.507059e+37 }
 0x384   : > { %v5829_v8 = vpop.eup %5828  ;;  %v7047_v7 = vadd.f32 1.0, %v5827_v14 }
 0x385   : > { %v3806_v49 = vmul.f32 %v5829_v8, %v7035_v63  ;;  %5832 = vpow2.f32 %v5457_v29  ;;  %v3783_v36 = vsel %vm3782_vm6, %v5823_v34, %v3779_v19  ;;  %v5831_v11 = vpop.eup %5830  ;;  %vm3811_vm8 = vweird.f32 %v5829_v8 }
 0x386   : > { %5834 = vrcp.f32 %v7047_v7  ;;  %v3116_v35 = vpop.f32.mrf.mxu2  ;;  %v3788_v13 = vsel %vm3785_vm7, %v3787_v10, %v3783_v36  ;;  %v3816_v34 = vand.u32 2147483648, %v7035_v63  ;;  %vm3812_vm10 = vmor %vm3810_vm9, %vm3811_vm8  ;;  %vm3840_vm13 = vweird.f32 %v7047_v7 }
 0x387   : > { %v3807_v41 = vsub.f32 1.0, %v3806_v49  ;;  %v3117_v50 = vadd.f32 %v3116_v35, %v3068_v55  ;;  %v3165_v42 = vpop.f32.mrf.mxu3  ;;  %v3070_v44 = vpop.f32.mrf.mxu1  ;;  %v7052_v38 = vmul.f32 %v5831_v11, %v3788_v13  ;;  %5836 = vtanh.f32 %v7834_v5  ;;  %v5317_v55 = vld [vmem:[#allocation6 + $0x6f8] sm:$0xf0] }
 0x388   : > { %v3021_v43 = vpop.f32.mrf.mxu0  ;;  %v3817_v30 = vor.u32 1.1754944e-38, %v3816_v34  ;;  %v5320_v49 = vor.u32 %v5706_v12, %v5317_v55  ;;  %v5674_v12 = vld [vmem:[#allocation6 + $0x5ec] sm:$0xf] }
 0x389   : > { %v3022_v54 = vadd.f32 %v3021_v43, %v6971_v45  ;;  %v3166_v16 = vadd.f32 %v3165_v42, %v3117_v50  ;;  %v3808_v1 = vmul.f32 %v5829_v8, %v3807_v41  ;;  %v4257_v3 = vpack.c.bf16 %v7052_v38, %v7042_v53 }
 0x38a   : > { %3265 = vmatmul.bf16.gmra.mxu1 %v6391_v26  ;;  %3487 = vmatpush.bf16.msrb.mxu2 %v5320_v49  ;;  %v3844_v41 = vand.u32 2147483647, %v7047_v7 }
 0x38b   : > { %v3071_v18 = vadd.f32 %v3070_v44, %v3022_v54  ;;  %3216 = vmatmul.bf16.gmra.mxu0 %v6389_v25  ;;  %v5833_v15 = vpop.eup %5832  ;;  %v5459_v45 = vmul.f32 -1.442695, %v3166_v16  ;;  %3314 = vmatmul.bf16.gmra.mxu2 %v6393_v27  ;;  %v3809_v9 = vadd.f32 %v5829_v8, %v3808_v1  ;;  %v5702_v54 = vld [vmem:[#allocation6 + $0x6cc] sm:$0xf] }
 0x38c   : > { %v5835_v0 = vpop.eup %5834  ;;  %v7063_v47 = vadd.f32 1.0, %v5833_v15  ;;  %3363 = vmatmul.bf16.gmra.mxu3 %v6395_v28  ;;  %v7835_v28 = vld [vmem:[#allocation52_spill] sm:$0xff]  ;;  %vm3845_vm15 = vcmp.eq.f32.partialorder %v3844_v41, 8.507059e+37 }
 0x38d   : > { %v3836_v25 = vmul.f32 %v5835_v0, %v7047_v7  ;;  %5838 = vpow2.f32 %v5459_v45  ;;  %v3813_v4 = vsel %vm3812_vm10, %v5829_v8, %v3809_v9  ;;  %v5837_v14 = vpop.eup %5836  ;;  %v3846_v8 = vand.u32 2147483648, %v7047_v7  ;;  %v5642_v9 = vld [vmem:[#allocation6 + $0x4ec] sm:$0xf] }
 0x38e   : > { %5840 = vrcp.f32 %v7063_v47  ;;  %v3119_v26 = vpop.f32.mrf.mxu2  ;;  %v3818_v56 = vsel %vm3815_vm11, %v3817_v30, %v3813_v4  ;;  %vm3841_vm12 = vweird.f32 %v5835_v0  ;;  %v3874_v5 = vand.u32 2147483647, %v7063_v47 }
 0x38f   : > { %v3837_v27 = vsub.f32 1.0, %v3836_v25  ;;  %v3120_v17 = vadd.f32 %v3119_v26, %v3071_v18  ;;  %v3168_v23 = vpop.f32.mrf.mxu3  ;;  %5842 = vtanh.f32 %v7835_v28  ;;  %v3072_v19 = vpop.f32.mrf.mxu1  ;;  %v7072_v11 = vmul.f32 %v5837_v14, %v3818_v56  ;;  %vm7080_vm14 = vmor %vm3840_vm13, %vm3841_vm12  ;;  %v5061_v25 = vld [vmem:[#allocation6 + $0x4f8] sm:$0xf0]  ;;  %v7838_v26 = vld [vmem:[#allocation53_spill] sm:$0xff] }
 0x390   : > { %v3023_v63 = vpop.f32.mrf.mxu0  ;;  %v3847_v1 = vor.u32 1.1754944e-38, %v3846_v8  ;;  %v3876_v4 = vand.u32 2147483648, %v7063_v47  ;;  %v5189_v28 = vld [vmem:[#allocation6 + $0x5f8] sm:$0xf0]  ;;  %vm3870_vm1 = vweird.f32 %v7063_v47  ;;  %vm3875_vm3 = vcmp.eq.f32.partialorder %v3874_v5, 8.507059e+37 }
 0x391   : > { %v3024_v29 = vadd.f32 %v3023_v63, %v6974_v22  ;;  %v3169_v36 = vadd.f32 %v3168_v23, %v3120_v17  ;;  %v3838_v10 = vmul.f32 %v5835_v0, %v3837_v27  ;;  %v5064_v17 = vor.u32 %v5642_v9, %v5061_v25  ;;  %v5738_v23 = vld [vmem:[#allocation6 + $0x7ec] sm:$0xf]  ;;  %v5445_v63 = vld [vmem:[#allocation6 + $0x7f8] sm:$0xf0] }
 0x392   : > { %v5448_v14 = vor.u32 %v5738_v23, %v5445_v63  ;;  %v5192_v49 = vor.u32 %v5674_v12, %v5189_v28  ;;  %v5698_v28 = vld [vmem:[#allocation6 + $0x6ac] sm:$0xf] }
 0x393   : > { %v3073_v35 = vadd.f32 %v3072_v19, %v3024_v29  ;;  %v5839_v50 = vpop.eup %5838  ;;  %v5461_v42 = vmul.f32 -1.442695, %v3169_v36  ;;  %v3839_v43 = vadd.f32 %v5835_v0, %v3838_v10  ;;  %3389 = vmatpush.bf16.msrb.mxu0 %v5064_v17 }
 0x394   : > { %v7076_v13 = vpop.eup %5840  ;;  %v7078_v22 = vadd.f32 1.0, %v5839_v50  ;;  %3536 = vmatpush.bf16.msrb.mxu3 %v5448_v14  ;;  %3438 = vmatpush.bf16.msrb.mxu1 %v5192_v49 }
 0x395   : > { %v3866_v44 = vmul.f32 %v7076_v13, %v7063_v47  ;;  %5844 = vpow2.f32 %v5461_v42  ;;  %v3843_v16 = vsel %vm7080_vm14, %v5835_v0, %v3839_v43  ;;  %v5843_v34 = vpop.eup %5842  ;;  %vm3871_vm0 = vweird.f32 %v7076_v13 }
 0x396   : > { %5846 = vrcp.f32 %v7078_v22  ;;  %v3121_v7 = vpop.f32.mrf.mxu2  ;;  %v3848_v30 = vsel %vm3845_vm15, %v3847_v1, %v3843_v16  ;;  %vm7112_vm2 = vmor %vm3870_vm1, %vm3871_vm0  ;;  %v5638_v16 = vld [vmem:[#allocation6 + $0x4cc] sm:$0xf]  ;;  %vm3900_vm6 = vweird.f32 %v7078_v22 }
 0x397   : > { %v3867_v18 = vsub.f32 1.0, %v3866_v44  ;;  %v3122_v2 = vadd.f32 %v3121_v7, %v3073_v35  ;;  %v3170_v15 = vpop.f32.mrf.mxu3  ;;  %5848 = vtanh.f32 %v7838_v26  ;;  %v3075_v27 = vpop.f32.mrf.mxu1  ;;  %v7093_v55 = vmul.f32 %v5843_v34, %v3848_v30  ;;  %v5301_v44 = vld [vmem:[#allocation6 + $0x6d8] sm:$0xf0] }
 0x398   : > { %v3026_v45 = vpop.f32.mrf.mxu0  ;;  %v3904_v35 = vand.u32 2147483647, %v7078_v22  ;;  %v5429_v26 = vld [vmem:[#allocation6 + $0x7d8] sm:$0xf0] }
 0x399   : > { %v3027_v0 = vadd.f32 %v3026_v45, %v6981_v31  ;;  %v3171_v56 = vadd.f32 %v3170_v15, %v3122_v2  ;;  %v3868_v29 = vmul.f32 %v7076_v13, %v3867_v18  ;;  %v4259_v31 = vpack.c.bf16 %v7093_v55, %v7072_v11  ;;  %v5045_v15 = vld [vmem:[#allocation6 + $0x4d8] sm:$0xf0]  ;;  %v5734_v45 = vld [vmem:[#allocation6 + $0x7cc] sm:$0xf] }
 0x39a   : > { %3270 = vmatmul.bf16.gmra.mxu1 %v6411_v58  ;;  %v3877_v58 = vor.u32 1.1754944e-38, %v3876_v4  ;;  %v5304_v2 = vor.u32 %v5702_v54, %v5301_v44  ;;  %vm7124_vm4 = vcmp.eq.f32.partialorder %v3904_v35, 8.507059e+37  ;;  %v5048_v30 = vor.u32 %v5638_v16, %v5045_v15  ;;  %v5029_v35 = vld [vmem:[#allocation6 + $0x4b8] sm:$0xf0]  ;;  %v5662_v15 = vld [vmem:[#allocation6 + $0x58c] sm:$0xf] }
 0x39b   : > { %v3076_v19 = vadd.f32 %v3075_v27, %v3027_v0  ;;  %3221 = vmatmul.bf16.gmra.mxu0 %v6409_v57  ;;  %v5845_v8 = vpop.eup %5844  ;;  %v5463_v36 = vmul.f32 -1.442695, %v3171_v56  ;;  %3319 = vmatmul.bf16.gmra.mxu2 %v6413_v59  ;;  %v3869_v10 = vadd.f32 %v7076_v13, %v3868_v29  ;;  %v5670_v0 = vld [vmem:[#allocation6 + $0x5cc] sm:$0xf]  ;;  %v5173_v27 = vld [vmem:[#allocation6 + $0x5d8] sm:$0xf0]  ;;  %v5432_v63 = vor.u32 %v5734_v45, %v5429_v26 }
 0x39c   : > { %v7105_v41 = vpop.eup %5846  ;;  %v7107_v50 = vadd.f32 1.0, %v5845_v8  ;;  %3368 = vmatmul.bf16.gmra.mxu3 %v6415_v60  ;;  %v3906_v60 = vand.u32 2147483648, %v7078_v22  ;;  %3488 = vmatpush.bf16.msrb.mxu2 %v5304_v2  ;;  %v5176_v12 = vor.u32 %v5670_v0, %v5173_v27  ;;  %v5285_v29 = vld [vmem:[#allocation6 + $0x6b8] sm:$0xf0]  ;;  %v7843_v8 = vld [vmem:[#allocation54_spill] sm:$0xff] }
 0x39d   : > { %v3896_v59 = vmul.f32 %v7105_v41, %v7078_v22  ;;  %5850 = vpow2.f32 %v5463_v36  ;;  %v3873_v47 = vsel %vm7112_vm2, %v7076_v13, %v3869_v10  ;;  %v5849_v42 = vpop.eup %5848  ;;  %3390 = vmatpush.bf16.msrb.mxu0 %v5048_v30  ;;  %vm3901_vm5 = vweird.f32 %v7105_v41  ;;  %3537 = vmatpush.bf16.msrb.mxu3 %v5432_v63  ;;  %v5730_v57 = vld [vmem:[#allocation6 + $0x7ac] sm:$0xf]  ;;  %v5013_v2 = vld [vmem:[#allocation6 + $0x498] sm:$0xf0] }
 0x39e   : > { %5852 = vrcp.f32 %v7107_v50  ;;  %v3124_v43 = vpop.f32.mrf.mxu2  ;;  %v3878_v1 = vsel %vm3875_vm3, %v3877_v58, %v3873_v47  ;;  %v3936_v9 = vand.u32 2147483648, %v7107_v50  ;;  %v3934_v56 = vand.u32 2147483647, %v7107_v50  ;;  %3439 = vmatpush.bf16.msrb.mxu1 %v5176_v12  ;;  %vm7149_vm8 = vmor %vm3900_vm6, %vm3901_vm5  ;;  %v5141_v27 = vld [vmem:[#allocation6 + $0x598] sm:$0xf0] }
 0x39f   : > { %v3897_v34 = vsub.f32 1.0, %v3896_v59  ;;  %v3125_v7 = vadd.f32 %v3124_v43, %v3076_v19  ;;  %v3173_v5 = vpop.f32.mrf.mxu3  ;;  %v3077_v4 = vpop.f32.mrf.mxu1  ;;  %v7129_v17 = vmul.f32 %v5849_v42, %v3878_v1  ;;  %v5634_v19 = vld [vmem:[#allocation6 + $0x4ac] sm:$0xf]  ;;  %5854 = vtanh.f32 %v7843_v8  ;;  %v5413_v42 = vld [vmem:[#allocation6 + $0x7b8] sm:$0xf0] }
 0x3a0   : > { %v3028_v18 = vpop.f32.mrf.mxu0  ;;  %v5288_v10 = vor.u32 %v5698_v28, %v5285_v29  ;;  %v5032_v47 = vor.u32 %v5634_v19, %v5029_v35  ;;  %v5666_v43 = vld [vmem:[#allocation6 + $0x5ac] sm:$0xf]  ;;  %v3907_v44 = vor.u32 1.1754944e-38, %v3906_v60  ;;  %v5416_v1 = vor.u32 %v5730_v57, %v5413_v42  ;;  %v5269_v29 = vld [vmem:[#allocation6 + $0x698] sm:$0xf0] }
 0x3a1   : > { %v3029_v25 = vadd.f32 %v3028_v18, %v6984_v51  ;;  %v3174_v23 = vadd.f32 %v3173_v5, %v3125_v7  ;;  %v3898_v51 = vmul.f32 %v7105_v41, %v3897_v34  ;;  %v5157_v34 = vld [vmem:[#allocation6 + $0x5b8] sm:$0xf0]  ;;  %vm7143_vm7 = vcmp.eq.f32.partialorder %v3934_v56, 8.507059e+37  ;;  %v5630_v18 = vld [vmem:[#allocation6 + $0x48c] sm:$0xf] }
 0x3a2   : > { %3489 = vmatpush.bf16.msrb.mxu2 %v5288_v10  ;;  %3391 = vmatpush.bf16.msrb.mxu0 %v5032_v47  ;;  %v5160_v5 = vor.u32 %v5666_v43, %v5157_v34  ;;  %v3937_v63 = vor.u32 1.1754944e-38, %v3936_v9  ;;  %v5016_v28 = vor.u32 %v5630_v18, %v5013_v2  ;;  %v5726_v19 = vld [vmem:[#allocation6 + $0x78c] sm:$0xf]  ;;  %v5144_v8 = vor.u32 %v5662_v15, %v5141_v27  ;;  %v4997_v57 = vld [vmem:[#allocation6 + $0x478] sm:$0xf0] }
 0x3a3   : > { %v3078_v14 = vadd.f32 %v3077_v4, %v3029_v25  ;;  %v5851_v49 = vpop.eup %5850  ;;  %v5465_v36 = vmul.f32 -1.442695, %v3174_v23  ;;  %v3899_v54 = vadd.f32 %v7105_v41, %v3898_v51  ;;  %v7848_v25 = vld [vmem:[#allocation55_spill] sm:$0xff]  ;;  %3538 = vmatpush.bf16.msrb.mxu3 %v5416_v1  ;;  %v5694_v23 = vld [vmem:[#allocation6 + $0x68c] sm:$0xf]  ;;  %vm3930_vm10 = vweird.f32 %v7107_v50  ;;  %v7852_v18 = vld [vmem:[#allocation16_spill] sm:$0xff] }
 0x3a4   : > { %v7136_v58 = vpop.eup %5852  ;;  %v7138_v59 = vadd.f32 1.0, %v5851_v49  ;;  %3440 = vmatpush.bf16.msrb.mxu1 %v5160_v5  ;;  %v5397_v51 = vld [vmem:[#allocation6 + $0x798] sm:$0xf0]  ;;  %v7849_v9 = vld [vmem:[#allocation13_spill] sm:$0xff]  ;;  %v7850_v1 = vld [vmem:[#allocation14_spill] sm:$0xff] }
 0x3a5   : > { %v3926_v16 = vmul.f32 %v7136_v58, %v7107_v50  ;;  %5856 = vpow2.f32 %v5465_v36  ;;  %v3903_v45 = vsel %vm7149_vm8, %v7105_v41, %v3899_v54  ;;  %vm3931_vm9 = vweird.f32 %v7136_v58  ;;  %v5626_v35 = vld [vmem:[#allocation6 + $0x46c] sm:$0xf]  ;;  %v7851_v13 = vld [vmem:[#allocation15_spill] sm:$0xff] }
 0x3a6   : > { %5858 = vrcp.f32 %v7138_v59  ;;  %v3126_v60 = vpop.f32.mrf.mxu2  ;;  %v3908_v41 = vsel %vm7124_vm4, %v3907_v44, %v3903_v45  ;;  %v5272_v36 = vor.u32 %v5694_v23, %v5269_v29  ;;  %v5658_v47 = vld [vmem:[#allocation6 + $0x56c] sm:$0xf]  ;;  %v5125_v44 = vld [vmem:[#allocation6 + $0x578] sm:$0xf0]  ;;  %3392 = vmatpush.bf16.msrb.mxu0 %v5016_v28  ;;  %v5000_v2 = vor.u32 %v5626_v35, %v4997_v57  ;;  %vm7177_vm11 = vmor %vm3930_vm10, %vm3931_vm9 }
 0x3a7   : > { %5860 = vtanh.f32 %v7848_v25  ;;  %v3927_v4 = vsub.f32 1.0, %v3926_v16  ;;  %v3127_v30 = vadd.f32 %v3126_v60, %v3078_v14  ;;  %v3175_v26 = vpop.f32.mrf.mxu3  ;;  %v3080_v56 = vpop.f32.mrf.mxu1  ;;  %v5690_v34 = vld [vmem:[#allocation6 + $0x66c] sm:$0xf]  ;;  %v5128_v15 = vor.u32 %v5658_v47, %v5125_v44  ;;  %v5253_v45 = vld [vmem:[#allocation6 + $0x678] sm:$0xf0] }
 0x3a8   : > { %v3031_v0 = vpop.f32.mrf.mxu0  ;;  %v5855_v14 = vpop.eup %5854  ;;  %v5722_v25 = vld [vmem:[#allocation6 + $0x76c] sm:$0xf]  ;;  %3441 = vmatpush.bf16.msrb.mxu1 %v5144_v8  ;;  %3490 = vmatpush.bf16.msrb.mxu2 %v5272_v36  ;;  %v5381_v27 = vld [vmem:[#allocation6 + $0x778] sm:$0xf0]  ;;  %vm3960_vm12 = vweird.f32 %v7138_v59 }
 0x3a9   : > { %v3032_v12 = vadd.f32 %v3031_v0, %v6991_v52  ;;  %v3176_v49 = vadd.f32 %v3175_v26, %v3127_v30  ;;  %v3928_v10 = vmul.f32 %v7136_v58, %v3927_v4  ;;  %v5400_v52 = vor.u32 %v5726_v19, %v5397_v51  ;;  %v5622_v28 = vld [vmem:[#allocation6 + $0x44c] sm:$0xf]  ;;  %v4981_v29 = vld [vmem:[#allocation6 + $0x458] sm:$0xf0] }
 0x3aa   : > { %v7164_v42 = vmul.f32 %v5855_v14, %v3908_v41  ;;  %3275 = vmatmul.bf16.gmra.mxu1 %v7850_v1  ;;  %v5256_v0 = vor.u32 %v5690_v34, %v5253_v45  ;;  %v5654_v19 = vld [vmem:[#allocation6 + $0x54c] sm:$0xf]  ;;  %v5109_v36 = vld [vmem:[#allocation6 + $0x558] sm:$0xf0]  ;;  %3393 = vmatpush.bf16.msrb.mxu0 %v5000_v2  ;;  %v4984_v35 = vor.u32 %v5622_v28, %v4981_v29 }
 0x3ab   : > { %3226 = vmatmul.bf16.gmra.mxu0 %v7849_v9  ;;  %v5857_v43 = vpop.eup %5856  ;;  %v5467_v54 = vmul.f32 -1.442695, %v3176_v49  ;;  %v3081_v16 = vadd.f32 %v3080_v56, %v3032_v12  ;;  %3324 = vmatmul.bf16.gmra.mxu2 %v7851_v13  ;;  %v3929_v22 = vadd.f32 %v7136_v58, %v3928_v10  ;;  %v5384_v56 = vor.u32 %v5722_v25, %v5381_v27  ;;  %v5686_v10 = vld [vmem:[#allocation6 + $0x64c] sm:$0xf]  ;;  %v5237_v57 = vld [vmem:[#allocation6 + $0x658] sm:$0xf0] }
 0x3ac   : > { %v7170_v60 = vpop.eup %5858  ;;  %v7172_v5 = vadd.f32 1.0, %v5857_v43  ;;  %3373 = vmatmul.bf16.gmra.mxu3 %v7852_v18  ;;  %v4261_v50 = vpack.c.bf16 %v7164_v42, %v7129_v17  ;;  %v5365_v47 = vld [vmem:[#allocation6 + $0x758] sm:$0xf0]  ;;  %3442 = vmatpush.bf16.msrb.mxu1 %v5128_v15  ;;  %v5112_v7 = vor.u32 %v5654_v19, %v5109_v36  ;;  %v5618_v1 = vld [vmem:[#allocation6 + $0x42c] sm:$0xf] }
 0x3ad   : > { %v5861_v30 = vpop.eup %5860  ;;  %v3956_v26 = vmul.f32 %v7170_v60, %v7138_v59  ;;  %5862 = vpow2.f32 %v5467_v54  ;;  %v3933_v23 = vsel %vm7177_vm11, %v7136_v58, %v3929_v22  ;;  %3539 = vmatpush.bf16.msrb.mxu3 %v5400_v52  ;;  %v5718_v52 = vld [vmem:[#allocation6 + $0x74c] sm:$0xf]  ;;  %3491 = vmatpush.bf16.msrb.mxu2 %v5256_v0  ;;  %v4965_v13 = vld [vmem:[#allocation6 + $0x438] sm:$0xf0]  ;;  %vm3961_vm13 = vweird.f32 %v7170_v60 }
 0x3ae   : > { %5864 = vrcp.f32 %v7172_v5  ;;  %v3129_v12 = vpop.f32.mrf.mxu2  ;;  %v3938_v51 = vsel %vm7143_vm7, %v3937_v63, %v3933_v23  ;;  %v5240_v63 = vor.u32 %v5686_v10, %v5237_v57  ;;  %v5650_v44 = vld [vmem:[#allocation6 + $0x52c] sm:$0xf]  ;;  %v5093_v18 = vld [vmem:[#allocation6 + $0x538] sm:$0xf0]  ;;  %3394 = vmatpush.bf16.msrb.mxu0 %v4984_v35  ;;  %v4968_v15 = vor.u32 %v5618_v1, %v4965_v13  ;;  %vm7221_vm15 = vmor %vm3960_vm12, %vm3961_vm13 }
 0x3af   : > { %v3957_v41 = vsub.f32 1.0, %v3956_v26  ;;  %v3130_v14 = vadd.f32 %v3129_v12, %v3081_v16  ;;  %v3178_v49 = vpop.f32.mrf.mxu3  ;;  %v3082_v58 = vpop.f32.mrf.mxu1  ;;  %v7192_v43 = vmul.f32 %v5861_v30, %v3938_v51  ;;  %v5368_v16 = vor.u32 %v5718_v52, %v5365_v47  ;;  %v5682_v2 = vld [vmem:[#allocation6 + $0x62c] sm:$0xf]  ;;  %v5221_v30 = vld [vmem:[#allocation6 + $0x638] sm:$0xf0] }
 0x3b0   : > { %v3033_v8 = vpop.f32.mrf.mxu0  ;;  %v5714_v26 = vld [vmem:[#allocation6 + $0x72c] sm:$0xf]  ;;  %3443 = vmatpush.bf16.msrb.mxu1 %v5112_v7  ;;  %v5096_v23 = vor.u32 %v5650_v44, %v5093_v18  ;;  %v5224_v12 = vor.u32 %v5682_v2, %v5221_v30  ;;  %v4949_v51 = vld [vmem:[#allocation6 + $0x418] sm:$0xf0]  ;;  %v3994_v18 = vand.u32 2147483647, %v7172_v5  ;;  %vm3990_vm0 = vweird.f32 %v7172_v5 }
 0x3b1   : > { %v3034_v9 = vadd.f32 %v3033_v8, %v6994_v33  ;;  %v3179_v54 = vadd.f32 %v3178_v49, %v3130_v14  ;;  %3540 = vmatpush.bf16.msrb.mxu3 %v5384_v56  ;;  %v7855_v33 = vld [vmem:[#allocation56_spill] sm:$0xff]  ;;  %v3958_v0 = vmul.f32 %v7170_v60, %v3957_v41  ;;  %3492 = vmatpush.bf16.msrb.mxu2 %v5240_v63  ;;  %v5614_v19 = vld [vmem:[#allocation6 + $0x40c] sm:$0xf]  ;;  %v3996_v2 = vand.u32 2147483648, %v7172_v5 }
 0x3b2   : > { %5866 = vtanh.f32 %v7855_v33  ;;  %v5349_v56 = vld [vmem:[#allocation6 + $0x738] sm:$0xf0]  ;;  %v5646_v14 = vld [vmem:[#allocation6 + $0x50c] sm:$0xf]  ;;  %3395 = vmatpush.bf16.msrb.mxu0 %v4968_v15  ;;  %v4952_v52 = vor.u32 %v5614_v19, %v4949_v51  ;;  %vm3995_vm2 = vcmp.eq.f32.partialorder %v3994_v18, 8.507059e+37 }
 0x3b3   : > { %v5863_v34 = vpop.eup %5862  ;;  %v5469_v22 = vmul.f32 -1.442695, %v3179_v54  ;;  %v3083_v4 = vadd.f32 %v3082_v58, %v3034_v9  ;;  %v5352_v29 = vor.u32 %v5714_v26, %v5349_v56  ;;  %v7856_v49 = vld [vmem:[#allocation57_spill] sm:$0xff]  ;;  %v5077_v9 = vld [vmem:[#allocation6 + $0x518] sm:$0xf0]  ;;  %v3959_v63 = vadd.f32 %v7170_v60, %v3958_v0  ;;  %v7858_v15 = vld [vmem:[#allocation58_spill] sm:$0xff] }
 0x3b4   : > { %v7195_v45 = vpop.eup %5864  ;;  %v7197_v25 = vadd.f32 1.0, %v5863_v34  ;;  %v5678_v58 = vld [vmem:[#allocation6 + $0x60c] sm:$0xf]  ;;  %v5205_v47 = vld [vmem:[#allocation6 + $0x618] sm:$0xf0]  ;;  %3444 = vmatpush.bf16.msrb.mxu1 %v5096_v23  ;;  %v5080_v13 = vor.u32 %v5646_v14, %v5077_v9  ;;  %v3966_v34 = vand.u32 2147483648, %v7138_v59 }
 0x3b5   : > { %v3986_v27 = vmul.f32 %v7195_v45, %v7172_v5  ;;  %5868 = vpow2.f32 %v5469_v22  ;;  %3541 = vmatpush.bf16.msrb.mxu3 %v5368_v16  ;;  %v5710_v54 = vld [vmem:[#allocation6 + $0x70c] sm:$0xf]  ;;  %v5333_v7 = vld [vmem:[#allocation6 + $0x718] sm:$0xf0]  ;;  %3493 = vmatpush.bf16.msrb.mxu2 %v5224_v12  ;;  %v5208_v44 = vor.u32 %v5678_v58, %v5205_v47  ;;  %vm3991_vm14 = vweird.f32 %v7195_v45 }
 0x3b6   : > { %5870 = vrcp.f32 %v7197_v25  ;;  %v3131_v28 = vpop.f32.mrf.mxu2  ;;  %v7857_v33 = vld [vmem:[#allocation17_spill] sm:$0xff]  ;;  %v7859_v26 = vld [vmem:[#allocation18_spill] sm:$0xff]  ;;  %v7860_v0 = vld [vmem:[#allocation19_spill] sm:$0xff]  ;;  %v3964_v23 = vand.u32 2147483647, %v7138_v59  ;;  %3396 = vmatpush.bf16.msrb.mxu0 %v4952_v52  ;;  %v3963_v19 = vsel %vm7221_vm15, %v7170_v60, %v3959_v63  ;;  %v3967_v59 = vor.u32 1.1754944e-38, %v3966_v34 }
 0x3b7   : > { %5872 = vtanh.f32 %v7856_v49  ;;  %v3987_v41 = vsub.f32 1.0, %v3986_v27  ;;  %v3132_v8 = vadd.f32 %v3131_v28, %v3083_v4  ;;  %v3180_v36 = vpop.f32.mrf.mxu3  ;;  %v3085_v57 = vpop.f32.mrf.mxu1  ;;  %v7863_v28 = vld [vmem:[#allocation20_spill] sm:$0xff]  ;;  %vm3992_vm1 = vmor %vm3990_vm0, %vm3991_vm14  ;;  %v3997_v5 = vor.u32 1.1754944e-38, %v3996_v2 }
 0x3b8   : > { %v3036_v10 = vpop.f32.mrf.mxu0  ;;  %v5867_v16 = vpop.eup %5866  ;;  %5874 = vtanh.f32 %v7858_v15  ;;  %3445 = vmatpush.bf16.msrb.mxu1 %v5080_v13  ;;  %vm3965_vm3 = vcmp.eq.f32.partialorder %v3964_v23, 8.507059e+37  ;;  %v4026_v47 = vand.u32 2147483648, %v7197_v25  ;;  %vm4020_vm5 = vweird.f32 %v7197_v25  ;;  %v7864_v23 = vld [vmem:[#allocation59_spill] sm:$0xff] }
 0x3b9   : > { %v3037_v35 = vadd.f32 %v3036_v10, %v7001_v37  ;;  %v3181_v1 = vadd.f32 %v3180_v36, %v3132_v8  ;;  %3542 = vmatpush.bf16.msrb.mxu3 %v5352_v29  ;;  %v5336_v37 = vor.u32 %v5710_v54, %v5333_v7  ;;  %v3988_v22 = vmul.f32 %v7195_v45, %v3987_v41 }
 0x3ba   : > { %3280 = vmatmul.bf16.gmra.mxu1 %v7859_v26  ;;  %3494 = vmatpush.bf16.msrb.mxu2 %v5208_v44  ;;  %v3968_v58 = vsel %vm3965_vm3, %v3967_v59, %v3963_v19  ;;  %v4024_v44 = vand.u32 2147483647, %v7197_v25  ;;  %v4027_v18 = vor.u32 1.1754944e-38, %v4026_v47 }
 0x3bb   : > { %3231 = vmatmul.bf16.gmra.mxu0 %v7857_v33  ;;  %v5869_v4 = vpop.eup %5868  ;;  %v5471_v30 = vmul.f32 -1.442695, %v3181_v1  ;;  %3329 = vmatmul.bf16.gmra.mxu2 %v7860_v0  ;;  %v3989_v29 = vadd.f32 %v7195_v45, %v3988_v22  ;;  %v3086_v49 = vadd.f32 %v3085_v57, %v3037_v35  ;;  %v7243_v13 = vmul.f32 %v5867_v16, %v3968_v58  ;;  %v7868_v58 = vld [vmem:[#allocation24_spill] sm:$0xff] }
 0x3bc   : > { %v5871_v12 = vpop.eup %5870  ;;  %v7226_v56 = vadd.f32 1.0, %v5869_v4  ;;  %3378 = vmatmul.bf16.gmra.mxu3 %v7863_v28  ;;  %vm4025_vm7 = vcmp.eq.f32.partialorder %v4024_v44, 8.507059e+37 }
 0x3bd   : > { %v5873_v51 = vpop.eup %5872  ;;  %v4016_v14 = vmul.f32 %v5871_v12, %v7197_v25  ;;  %5876 = vpow2.f32 %v5471_v30  ;;  %3543 = vmatpush.bf16.msrb.mxu3 %v5336_v37  ;;  %v3993_v9 = vsel %vm3992_vm1, %v7195_v45, %v3989_v29  ;;  %vm4021_vm4 = vweird.f32 %v5871_v12 }
 0x3be   : > { %5878 = vrcp.f32 %v7226_v56  ;;  %v3134_v41 = vpop.f32.mrf.mxu2  ;;  %v3998_v52 = vsel %vm3995_vm2, %v3997_v5, %v3993_v9  ;;  %v5875_v54 = vpop.eup %5874  ;;  %vm4022_vm6 = vmor %vm4020_vm5, %vm4021_vm4  ;;  %v4056_v29 = vand.u32 2147483648, %v7226_v56  ;;  %v4054_v59 = vand.u32 2147483647, %v7226_v56 }
 0x3bf   : > { %v4017_v8 = vsub.f32 1.0, %v4016_v14  ;;  %v3135_v60 = vadd.f32 %v3134_v41, %v3086_v49  ;;  %v3183_v36 = vpop.f32.mrf.mxu3  ;;  %v3087_v57 = vpop.f32.mrf.mxu1  ;;  %v7241_v1 = vmul.f32 %v5873_v51, %v3998_v52  ;;  %v7865_v49 = vld [vmem:[#allocation21_spill] sm:$0xff]  ;;  %vm4050_vm9 = vweird.f32 %v7226_v56 }
 0x3c0   : > { %v3038_v10 = vpop.f32.mrf.mxu0  ;;  %vm4055_vm11 = vcmp.eq.f32.partialorder %v4054_v59, 8.507059e+37 }
 0x3c1   : > { %v3039_v35 = vadd.f32 %v3038_v10, %v7004_v48  ;;  %v3184_v7 = vadd.f32 %v3183_v36, %v3135_v60  ;;  %v4018_v63 = vmul.f32 %v5871_v12, %v4017_v8  ;;  %v4263_v48 = vpack.c.bf16 %v7243_v13, %v7192_v43  ;;  %v7866_v60 = vld [vmem:[#allocation22_spill] sm:$0xff]  ;;  %v7867_v36 = vld [vmem:[#allocation23_spill] sm:$0xff] }
 0x3c3   : > { %v5877_v34 = vpop.eup %5876  ;;  %v5473_v33 = vmul.f32 -1.442695, %v3184_v7  ;;  %v4019_v45 = vadd.f32 %v5871_v12, %v4018_v63  ;;  %v3088_v16 = vadd.f32 %v3087_v57, %v3039_v35  ;;  %v4057_v35 = vor.u32 1.1754944e-38, %v4056_v29 }
 0x3c4   : > { %v5879_v37 = vpop.eup %5878  ;;  %v7249_v22 = vadd.f32 1.0, %v5877_v34 }
 0x3c5   : > { %v4046_v2 = vmul.f32 %v5879_v37, %v7226_v56  ;;  %5880 = vpow2.f32 %v5473_v33  ;;  %v4023_v4 = vsel %vm4022_vm6, %v5871_v12, %v4019_v45  ;;  %vm4051_vm8 = vweird.f32 %v5879_v37  ;;  %v7869_v45 = vld [vmem:[#allocation60_spill] sm:$0xff] }
 0x3c6   : > { %5882 = vrcp.f32 %v7249_v22  ;;  %v3136_v15 = vpop.f32.mrf.mxu2  ;;  %v4028_v27 = vsel %vm4025_vm7, %v4027_v18, %v4023_v4  ;;  %vm4052_vm10 = vmor %vm4050_vm9, %vm4051_vm8  ;;  %vm4080_vm13 = vweird.f32 %v7249_v22 }
 0x3c7   : > { %v4047_v30 = vsub.f32 1.0, %v4046_v2  ;;  %v3137_v25 = vadd.f32 %v3136_v15, %v3088_v16  ;;  %v3185_v26 = vpop.f32.mrf.mxu3  ;;  %5884 = vtanh.f32 %v7864_v23  ;;  %v3090_v28 = vpop.f32.mrf.mxu1  ;;  %v7256_v19 = vmul.f32 %v5875_v54, %v4028_v27 }
 0x3c8   : > { %v3041_v0 = vpop.f32.mrf.mxu0  ;;  %v4086_v2 = vand.u32 2147483648, %v7249_v22 }
 0x3c9   : > { %v3186_v51 = vadd.f32 %v3185_v26, %v3137_v25  ;;  %v3042_v14 = vadd.f32 %v3041_v0, %v7011_v62  ;;  %v4048_v12 = vmul.f32 %v5879_v37, %v4047_v30  ;;  %v4265_v41 = vpack.c.bf16 %v7256_v19, %v7241_v1 }
 0x3ca   : > { %3285 = vmatmul.bf16.gmra.mxu1 %v7866_v60  ;;  %v4084_v30 = vand.u32 2147483647, %v7249_v22 }
 0x3cb   : > { %3236 = vmatmul.bf16.gmra.mxu0 %v7865_v49  ;;  %v5881_v5 = vpop.eup %5880  ;;  %v5475_v8 = vmul.f32 -1.442695, %v3186_v51  ;;  %3334 = vmatmul.bf16.gmra.mxu2 %v7867_v36  ;;  %v4049_v10 = vadd.f32 %v5879_v37, %v4048_v12  ;;  %v3091_v52 = vadd.f32 %v3090_v28, %v3042_v14  ;;  %v6008_v28 = vld [vmem:[#allocation8] sm:$0xf]  ;;  %v4087_v51 = vor.u32 1.1754944e-38, %v4086_v2 }
 0x3cc   : > { %v5883_v9 = vpop.eup %5882  ;;  %v7266_v62 = vadd.f32 1.0, %v5881_v5  ;;  %3383 = vmatmul.bf16.gmra.mxu3 %v7868_v58  ;;  %v7280_v29 = vperm.slane %v6008_v28, 3  ;;  %vm4085_vm15 = vcmp.eq.f32.partialorder %v4084_v30, 8.507059e+37 }
 0x3cd   : > { %v4076_v57 = vmul.f32 %v5883_v9, %v7249_v22  ;;  %5886 = vpow2.f32 %v5475_v8  ;;  %v4053_v47 = vsel %vm4052_vm10, %v5879_v37, %v4049_v10  ;;  %v5885_v54 = vpop.eup %5884  ;;  %vm4081_vm12 = vweird.f32 %v5883_v9  ;;  %v7870_v10 = vld [vmem:[#allocation61_spill] sm:$0xff] }
 0x3ce   : > { %5888 = vrcp.f32 %v7266_v62  ;;  %v3139_v7 = vpop.f32.mrf.mxu2  ;;  %v4058_v33 = vsel %vm4055_vm11, %v4057_v35, %v4053_v47  ;;  %vm4082_vm14 = vmor %vm4080_vm13, %vm4081_vm12  ;;  %vm4110_vm1 = vweird.f32 %v7266_v62 }
 0x3cf   : > { %v4077_v63 = vsub.f32 1.0, %v4076_v57  ;;  %v3140_v44 = vadd.f32 %v3139_v7, %v3091_v52  ;;  %v3188_v56 = vpop.f32.mrf.mxu3  ;;  %5890 = vtanh.f32 %v7869_v45  ;;  %v3092_v18 = vpop.f32.mrf.mxu1  ;;  %v7273_v16 = vmul.f32 %v5885_v54, %v4058_v33  ;;  %v7871_v7 = vld [vmem:[#allocation25_spill] sm:$0xff]  ;;  %v7872_v33 = vld [vmem:[#allocation26_spill] sm:$0xff]  ;;  %v7873_v45 = vld [vmem:[#allocation27_spill] sm:$0xff] }
 0x3d0   : > { %v3043_v34 = vpop.f32.mrf.mxu0 }
 0x3d1   : > { %v3189_v4 = vadd.f32 %v3188_v56, %v3140_v44  ;;  %v3044_v37 = vadd.f32 %v3043_v34, %v7014_v32  ;;  %v4078_v15 = vmul.f32 %v5883_v9, %v4077_v63  ;;  %v4114_v63 = vand.u32 2147483647, %v7266_v62 }
 0x3d3   : > { %v5887_v25 = vpop.eup %5886  ;;  %v5477_v26 = vmul.f32 -1.442695, %v3189_v4  ;;  %v4079_v0 = vadd.f32 %v5883_v9, %v4078_v15  ;;  %v3093_v32 = vadd.f32 %v3092_v18, %v3044_v37  ;;  %v7874_v37 = vld [vmem:[#allocation28_spill] sm:$0xff]  ;;  %vm4115_vm3 = vcmp.eq.f32.partialorder %v4114_v63, 8.507059e+37 }
 0x3d4   : > { %v5889_v27 = vpop.eup %5888  ;;  %v7278_v23 = vadd.f32 1.0, %v5887_v25 }
 0x3d5   : > { %v4106_v14 = vmul.f32 %v5889_v27, %v7266_v62  ;;  %5892 = vpow2.f32 %v5477_v26  ;;  %v4083_v12 = vsel %vm4082_vm14, %v5883_v9, %v4079_v0  ;;  %v5891_v49 = vpop.eup %5890  ;;  %vm4111_vm0 = vweird.f32 %v5889_v27 }
 0x3d6   : > { %5894 = vrcp.f32 %v7278_v23  ;;  %v3141_v59 = vpop.f32.mrf.mxu2  ;;  %v4088_v36 = vsel %vm4085_vm15, %v4087_v51, %v4083_v12  ;;  %v4116_v9 = vand.u32 2147483648, %v7266_v62  ;;  %vm4112_vm2 = vmor %vm4110_vm1, %vm4111_vm0  ;;  %v7875_v12 = vld [vmem:[#allocation62_spill] sm:$0xff]  ;;  %vm4140_vm5 = vweird.f32 %v7278_v23 }
 0x3d7   : > { %v4107_v5 = vsub.f32 1.0, %v4106_v14  ;;  %v3142_v22 = vadd.f32 %v3141_v59, %v3093_v32  ;;  %v3190_v8 = vpop.f32.mrf.mxu3  ;;  %5896 = vtanh.f32 %v7870_v10  ;;  %v3251_v35 = vpop.f32.mrf.mxu1  ;;  %v7286_v57 = vmul.f32 %v5891_v49, %v4088_v36 }
 0x3d8   : > { %v3202_v60 = vpop.f32.mrf.mxu0  ;;  %v4117_v25 = vor.u32 1.1754944e-38, %v4116_v9  ;;  %v4144_v36 = vand.u32 2147483647, %v7278_v23 }
 0x3d9   : > { %v3203_v58 = vadd.f32 %v3202_v60, %v7280_v29  ;;  %v3191_v52 = vadd.f32 %v3190_v8, %v3142_v22  ;;  %v4108_v47 = vmul.f32 %v5889_v27, %v4107_v5  ;;  %v4267_v44 = vpack.c.bf16 %v7286_v57, %v7273_v16 }
 0x3da   : > { %3446 = vmatmul.bf16.vlgmr.msrb.gmra.mxu1 %v7872_v33  ;;  %v4146_v8 = vand.u32 2147483648, %v7278_v23  ;;  %vm4145_vm7 = vcmp.eq.f32.partialorder %v4144_v36, 8.507059e+37 }
 0x3db   : > { %v3252_v54 = vadd.f32 %v3251_v35, %v3203_v58  ;;  %3397 = vmatmul.bf16.vlgmr.msrb.gmra.mxu0 %v7871_v7  ;;  %v5893_v56 = vpop.eup %5892  ;;  %v5479_v34 = vmul.f32 -1.442695, %v3191_v52  ;;  %3495 = vmatmul.bf16.vlgmr.msrb.gmra.mxu2 %v7873_v45  ;;  %v4109_v18 = vadd.f32 %v5889_v27, %v4108_v47 }
 0x3dc   : > { %v5895_v2 = vpop.eup %5894  ;;  %v7296_v4 = vadd.f32 1.0, %v5893_v56  ;;  %3544 = vmatmul.bf16.vlgmr.msrb.gmra.mxu3 %v7874_v37  ;;  %v7876_v37 = vld [vmem:[#allocation63_spill] sm:$0xff] }
 0x3dd   : > { %v4136_v15 = vmul.f32 %v5895_v2, %v7278_v23  ;;  %5898 = vpow2.f32 %v5479_v34  ;;  %v4113_v30 = vsel %vm4112_vm2, %v5889_v27, %v4109_v18  ;;  %v5897_v26 = vpop.eup %5896  ;;  %vm4141_vm4 = vweird.f32 %v5895_v2 }
 0x3de   : > { %5900 = vrcp.f32 %v7296_v4  ;;  %v3300_v0 = vpop.f32.mrf.mxu2  ;;  %v4118_v32 = vsel %vm4115_vm3, %v4117_v25, %v4113_v30  ;;  %vm4142_vm6 = vmor %vm4140_vm5, %vm4141_vm4  ;;  %v4176_v30 = vand.u32 2147483648, %v7296_v4  ;;  %vm4170_vm9 = vweird.f32 %v7296_v4 }
 0x3df   : > { %v4137_v28 = vsub.f32 1.0, %v4136_v15  ;;  %v3301_v51 = vadd.f32 %v3300_v0, %v3252_v54  ;;  %v3349_v62 = vpop.f32.mrf.mxu3  ;;  %5902 = vtanh.f32 %v7875_v12  ;;  %v3253_v59 = vpop.f32.mrf.mxu1  ;;  %v7304_v5 = vmul.f32 %v5897_v26, %v4118_v32  ;;  %v7879_v32 = vld [vmem:[#allocation31_spill] sm:$0xff] }
 0x3e0   : > { %v3204_v14 = vpop.f32.mrf.mxu0  ;;  %v4147_v54 = vor.u32 1.1754944e-38, %v4146_v8  ;;  %v4174_v0 = vand.u32 2147483647, %v7296_v4 }
 0x3e1   : > { %v3205_v49 = vadd.f32 %v3204_v14, %v7280_v29  ;;  %v7306_v22 = vadd.f32 %v3349_v62, %v3301_v51  ;;  %v4138_v27 = vmul.f32 %v5895_v2, %v4137_v28  ;;  %v7877_v51 = vld [vmem:[#allocation29_spill] sm:$0xff]  ;;  %v7878_v14 = vld [vmem:[#allocation30_spill] sm:$0xff] }
 0x3e2   : > { %vm4175_vm11 = vcmp.eq.f32.partialorder %v4174_v0, 8.507059e+37 }
 0x3e3   : > { %v3254_v60 = vadd.f32 %v3253_v59, %v3205_v49  ;;  %v5899_v10 = vpop.eup %5898  ;;  %v4139_v58 = vadd.f32 %v5895_v2, %v4138_v27  ;;  %v7880_v59 = vld [vmem:[#allocation32_spill] sm:$0xff]  ;;  %v4177_v27 = vor.u32 1.1754944e-38, %v4176_v30 }
 0x3e4   : > { %v5901_v35 = vpop.eup %5900  ;;  %v3743_v52 = vadd.f32 1.0, %v5899_v10 }
 0x3e5   : > { %v4166_v47 = vmul.f32 %v5901_v35, %v7296_v4  ;;  %v4143_v9 = vsel %vm4142_vm6, %v5895_v2, %v4139_v58  ;;  %v5903_v7 = vpop.eup %5902  ;;  %vm4171_vm8 = vweird.f32 %v5901_v35 }
 0x3e6   : > { %5904 = vrcp.f32 %v3743_v52  ;;  %v3302_v63 = vpop.f32.mrf.mxu2  ;;  %v4148_v18 = vsel %vm4145_vm7, %v4147_v54, %v4143_v9  ;;  %vm4172_vm10 = vmor %vm4170_vm9, %vm4171_vm8  ;;  %vm4200_vm13 = vweird.f32 %v3743_v52 }
 0x3e7   : > { %v4167_v56 = vsub.f32 1.0, %v4166_v47  ;;  %v3303_v34 = vadd.f32 %v3302_v63, %v3254_v60  ;;  %v3351_v33 = vpop.f32.mrf.mxu3  ;;  %5906 = vtanh.f32 %v7876_v37  ;;  %v3256_v15 = vpop.f32.mrf.mxu1  ;;  %v7315_v25 = vmul.f32 %v5903_v7, %v4148_v18  ;;  %v7881_v7 = vld [vmem:[#allocation64_spill] sm:$0xff] }
 0x3e8   : > { %v3207_v45 = vpop.f32.mrf.mxu0  ;;  %5908 = vtanh.f32 %v7881_v7 }
 0x3e9   : > { %v3208_v23 = vadd.f32 %v3207_v45, %v7280_v29  ;;  %v4168_v2 = vmul.f32 %v5901_v35, %v4167_v56  ;;  %v7317_v26 = vadd.f32 %v3351_v33, %v3303_v34  ;;  %v4269_v62 = vpack.c.bf16 %v7315_v25, %v7304_v5 }
 0x3ea   : > { %3451 = vmatmul.bf16.gmra.mxu1 %v7878_v14  ;;  %v4206_v34 = vand.u32 2147483648, %v3743_v52 }
 0x3eb   : > { %v3257_v28 = vadd.f32 %v3256_v15, %v3208_v23  ;;  %3402 = vmatmul.bf16.gmra.mxu0 %v7877_v51  ;;  %3500 = vmatmul.bf16.gmra.mxu2 %v7879_v32  ;;  %v4169_v12 = vadd.f32 %v5901_v35, %v4168_v2 }
 0x3ec   : > { %v5905_v49 = vpop.eup %5904  ;;  %3549 = vmatmul.bf16.gmra.mxu3 %v7880_v59  ;;  %v4207_v23 = vor.u32 1.1754944e-38, %v4206_v34 }
 0x3ed   : > { %v4196_v8 = vmul.f32 %v5905_v49, %v3743_v52  ;;  %v4173_v60 = vsel %vm4172_vm10, %v5901_v35, %v4169_v12  ;;  %v5907_v36 = vpop.eup %5906  ;;  %vm4201_vm12 = vweird.f32 %v5905_v49  ;;  %v4204_v35 = vand.u32 2147483647, %v3743_v52  ;;  %v7883_v52 = vld [vmem:[#allocation34_spill] sm:$0xff] }
 0x3ee   : > { %v3305_v10 = vpop.f32.mrf.mxu2  ;;  %v4178_v58 = vsel %vm4175_vm11, %v4177_v27, %v4173_v60  ;;  %vm4202_vm14 = vmor %vm4200_vm13, %vm4201_vm12  ;;  %v5909_v30 = vpop.eup %5908  ;;  %v7882_v60 = vld [vmem:[#allocation33_spill] sm:$0xff] }
 0x3ef   : > { %v4197_v47 = vsub.f32 1.0, %v4196_v8  ;;  %v3306_v5 = vadd.f32 %v3305_v10, %v3257_v28  ;;  %v3354_v9 = vpop.f32.mrf.mxu3  ;;  %v4253_v54 = vmul.f32 %v5907_v36, %v4178_v58  ;;  %v3258_v56 = vpop.f32.mrf.mxu1  ;;  %vm4205_vm15 = vcmp.eq.f32.partialorder %v4204_v35, 8.507059e+37  ;;  %v7885_v36 = vld [vmem:[#allocation36_spill] sm:$0xff] }
 0x3f0   : > { %v3209_v4 = vpop.f32.mrf.mxu0 }
 0x3f1   : > { %v3210_v63 = vadd.f32 %v3209_v4, %v7280_v29  ;;  %v7329_v33 = vadd.f32 %v3354_v9, %v3306_v5  ;;  %v4198_v45 = vmul.f32 %v5905_v49, %v4197_v47 }
 0x3f3   : > { %v3259_v18 = vadd.f32 %v3258_v56, %v3210_v63  ;;  %v4199_v37 = vadd.f32 %v5905_v49, %v4198_v45 }
 0x3f5   : > { %v4203_v15 = vsel %vm4202_vm14, %v5905_v49, %v4199_v37  ;;  %v7884_v49 = vld [vmem:[#allocation35_spill] sm:$0xff] }
 0x3f6   : > { %v3307_v25 = vpop.f32.mrf.mxu2  ;;  %v4208_v2 = vsel %vm4205_vm15, %v4207_v23, %v4203_v15  ;;  %v7886_v15 = vld [vmem:[#allocation37_spill] sm:$0xff] }
 0x3f7   : > { %v3308_v0 = vadd.f32 %v3307_v25, %v3259_v18  ;;  %v3356_v28 = vpop.f32.mrf.mxu3  ;;  %v4255_v14 = vmul.f32 %v5909_v30, %v4208_v2  ;;  %v3261_v12 = vpop.f32.mrf.mxu1  ;;  %v7887_v30 = vld [vmem:[#allocation38_spill] sm:$0xff]  ;;  %v7888_v25 = vld [vmem:[#allocation39_spill] sm:$0xff]  ;;  %v7889_v2 = vld [vmem:[#allocation40_spill] sm:$0xff] }
 0x3f8   : > { %v3212_v51 = vpop.f32.mrf.mxu0 }
 0x3f9   : > { %v3213_v32 = vadd.f32 %v3212_v51, %v7280_v29  ;;  %v7332_v59 = vadd.f32 %v3356_v28, %v3308_v0  ;;  %v4271_v27 = vpack.c.bf16 %v4255_v14, %v4253_v54 }
 0x3fa   : > { %3456 = vmatmul.bf16.gmra.mxu1 %v7883_v52 }
 0x3fb   : > { %v3262_v8 = vadd.f32 %v3261_v12, %v3213_v32  ;;  %3407 = vmatmul.bf16.gmra.mxu0 %v7882_v60  ;;  %3505 = vmatmul.bf16.gmra.mxu2 %v7884_v49 }
 0x3fc   : > { %3554 = vmatmul.bf16.gmra.mxu3 %v7885_v36  ;;  %4287 = vmatpush.bf16.xpose.msra.mxu0 %v4271_v27 }
 0x3fe   : > { %v3310_v10 = vpop.f32.mrf.mxu2 }
 0x3ff   : > { %v3311_v58 = vadd.f32 %v3310_v10, %v3262_v8  ;;  %v3359_v47 = vpop.f32.mrf.mxu3  ;;  %v3263_v4 = vpop.f32.mrf.mxu1  ;;  %v7890_v10 = vld [vmem:[#allocation41_spill] sm:$0xff] }
 0x400   : > { %v3214_v5 = vpop.f32.mrf.mxu0 }
 0x401   : > { %v3215_v9 = vadd.f32 %v3214_v5, %v7280_v29  ;;  %v7339_v7 = vadd.f32 %v3359_v47, %v3311_v58  ;;  %v7891_v58 = vld [vmem:[#allocation42_spill] sm:$0xff]  ;;  %v7892_v47 = vld [vmem:[#allocation43_spill] sm:$0xff]  ;;  %v7893_v5 = vld [vmem:[#allocation44_spill] sm:$0xff] }
 0x403   : > { %v3264_v54 = vadd.f32 %v3263_v4, %v3215_v9 }
 0x404   : > { %4288 = vmatpush.bf16.xpose.msra.mxu0 %v4269_v62 }
 0x406   : > { %v3312_v63 = vpop.f32.mrf.mxu2 }
 0x407   : > { %v3313_v56 = vadd.f32 %v3312_v63, %v3264_v54  ;;  %v3361_v34 = vpop.f32.mrf.mxu3  ;;  %v3266_v18 = vpop.f32.mrf.mxu1 }
 0x408   : > { %v3217_v45 = vpop.f32.mrf.mxu0 }
 0x409   : > { %v3218_v35 = vadd.f32 %v3217_v45, %v7280_v29  ;;  %v7342_v37 = vadd.f32 %v3361_v34, %v3313_v56 }
 0x40a   : > { %3461 = vmatmul.bf16.gmra.mxu1 %v7887_v30  ;;  %v7895_v30 = vld [vmem:[#allocation46_spill] sm:$0xff] }
 0x40b   : > { %v3267_v23 = vadd.f32 %v3266_v18, %v3218_v35  ;;  %3412 = vmatmul.bf16.gmra.mxu0 %v7886_v15  ;;  %3510 = vmatmul.bf16.gmra.mxu2 %v7888_v25  ;;  %v7894_v15 = vld [vmem:[#allocation45_spill] sm:$0xff]  ;;  %v7896_v25 = vld [vmem:[#allocation47_spill] sm:$0xff] }
 0x40c   : > { %3559 = vmatmul.bf16.gmra.mxu3 %v7889_v2  ;;  %4289 = vmatpush.bf16.xpose.msra.mxu0 %v4267_v44  ;;  %v7897_v2 = vld [vmem:[#allocation48_spill] sm:$0xff] }
 0x40e   : > { %v3315_v62 = vpop.f32.mrf.mxu2 }
 0x40f   : > { %v3316_v0 = vadd.f32 %v3315_v62, %v3267_v23  ;;  %v3364_v28 = vpop.f32.mrf.mxu3  ;;  %v3268_v32 = vpop.f32.mrf.mxu1 }
 0x410   : > { %v3219_v51 = vpop.f32.mrf.mxu0 }
 0x411   : > { %v3220_v14 = vadd.f32 %v3219_v51, %v7280_v29  ;;  %v7352_v12 = vadd.f32 %v3364_v28, %v3316_v0 }
 0x413   : > { %v3269_v27 = vadd.f32 %v3268_v32, %v3220_v14 }
 0x414   : > { %4290 = vmatpush.bf16.xpose.msra.mxu0 %v4265_v41 }
 0x416   : > { %v3317_v8 = vpop.f32.mrf.mxu2 }
 0x417   : > { %v3318_v60 = vadd.f32 %v3317_v8, %v3269_v27  ;;  %v3366_v52 = vpop.f32.mrf.mxu3  ;;  %v3271_v57 = vpop.f32.mrf.mxu1 }
 0x418   : > { %v3222_v49 = vpop.f32.mrf.mxu0 }
 0x419   : > { %v3223_v16 = vadd.f32 %v3222_v49, %v7280_v29  ;;  %v7358_v44 = vadd.f32 %v3366_v52, %v3318_v60 }
 0x41a   : > { %3466 = vmatmul.bf16.gmra.mxu1 %v7891_v58 }
 0x41b   : > { %v3272_v36 = vadd.f32 %v3271_v57, %v3223_v16  ;;  %3417 = vmatmul.bf16.gmra.mxu0 %v7890_v10  ;;  %3515 = vmatmul.bf16.gmra.mxu2 %v7892_v47 }
 0x41c   : > { %3564 = vmatmul.bf16.gmra.mxu3 %v7893_v5  ;;  %4291 = vmatpush.bf16.xpose.msra.mxu0 %v4263_v48 }
 0x41e   : > { %v3320_v1 = vpop.f32.mrf.mxu2 }
 0x41f   : > { %v3321_v19 = vadd.f32 %v3320_v1, %v3272_v36  ;;  %v3369_v41 = vpop.f32.mrf.mxu3  ;;  %v3273_v4 = vpop.f32.mrf.mxu1 }
 0x420   : > { %v3224_v9 = vpop.f32.mrf.mxu0 }
 0x421   : > { %v7367_v54 = vadd.f32 %v3369_v41, %v3321_v19  ;;  %v3225_v63 = vadd.f32 %v3224_v9, %v7280_v29 }
 0x423   : > { %v3274_v56 = vadd.f32 %v3273_v4, %v3225_v63 }
 0x424   : > { %4292 = vmatpush.bf16.xpose.msra.mxu0 %v4261_v50 }
 0x426   : > { %v3322_v34 = vpop.f32.mrf.mxu2 }
 0x427   : > { %v3323_v45 = vadd.f32 %v3322_v34, %v3274_v56  ;;  %v3371_v35 = vpop.f32.mrf.mxu3  ;;  %v3276_v13 = vpop.f32.mrf.mxu1 }
 0x428   : > { %v3227_v18 = vpop.f32.mrf.mxu0 }
 0x429   : > { %v3228_v43 = vadd.f32 %v3227_v18, %v7280_v29  ;;  %v7374_v48 = vadd.f32 %v3371_v35, %v3323_v45 }
 0x42a   : > { %3471 = vmatmul.bf16.gmra.mxu1 %v7895_v30 }
 0x42b   : > { %v3277_v23 = vadd.f32 %v3276_v13, %v3228_v43  ;;  %3422 = vmatmul.bf16.gmra.mxu0 %v7894_v15  ;;  %3520 = vmatmul.bf16.gmra.mxu2 %v7896_v25 }
 0x42c   : > { %3569 = vmatmul.bf16.gmra.mxu3 %v7897_v2  ;;  %4293 = vmatpush.bf16.xpose.msra.mxu0 %v4259_v31 }
 0x42e   : > { %v3325_v17 = vpop.f32.mrf.mxu2 }
 0x42f   : > { %v3326_v42 = vadd.f32 %v3325_v17, %v3277_v23  ;;  %v3374_v50 = vpop.f32.mrf.mxu3  ;;  %v3278_v28 = vpop.f32.mrf.mxu1 }
 0x430   : > { %v3229_v62 = vpop.f32.mrf.mxu0 }
 0x431   : > { %v3230_v0 = vadd.f32 %v3229_v62, %v7280_v29  ;;  %v7384_v51 = vadd.f32 %v3374_v50, %v3326_v42 }
 0x433   : > { %v3279_v14 = vadd.f32 %v3278_v28, %v3230_v0 }
 0x434   : > { %4294 = vmatpush.bf16.xpose.msra.mxu0 %v4257_v3 }
 0x436   : > { %v3327_v32 = vpop.f32.mrf.mxu2 }
 0x437   : > { %v3328_v27 = vadd.f32 %v3327_v32, %v3279_v14  ;;  %v3376_v8 = vpop.f32.mrf.mxu3  ;;  %v3281_v55 = vpop.f32.mrf.mxu1 }
 0x438   : > { %v3232_v60 = vpop.f32.mrf.mxu0 }
 0x439   : > { %v3233_v11 = vadd.f32 %v3232_v60, %v7280_v29  ;;  %v7390_v31 = vadd.f32 %v3376_v8, %v3328_v27 }
 0x43a   : > { %3476 = vmatmul.bf16.gmra.mxu1 %v6647_v39 }
 0x43b   : > { %v3282_v52 = vadd.f32 %v3281_v55, %v3233_v11  ;;  %3427 = vmatmul.bf16.gmra.mxu0 %v6645_v61  ;;  %3525 = vmatmul.bf16.gmra.mxu2 %v6649_v6 }
 0x43c   : > { %3574 = vmatmul.bf16.gmra.mxu3 %v6652_v24 }
 0x43e   : > { %v3330_v53 = vpop.f32.mrf.mxu2 }
 0x43f   : > { %v3331_v38 = vadd.f32 %v3330_v53, %v3282_v52  ;;  %v3379_v3 = vpop.f32.mrf.mxu3  ;;  %v3283_v57 = vpop.f32.mrf.mxu1 }
 0x440   : > { %v3234_v49 = vpop.f32.mrf.mxu0 }
 0x441   : > { %v3235_v16 = vadd.f32 %v3234_v49, %v7280_v29  ;;  %v7397_v36 = vadd.f32 %v3379_v3, %v3331_v38 }
 0x443   : > { %v3284_v10 = vadd.f32 %v3283_v57, %v3235_v16 }
 0x446   : > { %v3332_v58 = vpop.f32.mrf.mxu2 }
 0x447   : > { %v3333_v47 = vadd.f32 %v3332_v58, %v3284_v10  ;;  %v3381_v5 = vpop.f32.mrf.mxu3  ;;  %v3286_v1 = vpop.f32.mrf.mxu1 }
 0x448   : > { %v3237_v61 = vpop.f32.mrf.mxu0 }
 0x449   : > { %v3238_v39 = vadd.f32 %v3237_v61, %v7280_v29  ;;  %v7400_v6 = vadd.f32 %v3381_v5, %v3333_v47 }
 0x44a   : > { %3481 = vmatmul.bf16.gmra.mxu1 %v6673_v46 }
 0x44b   : > { %v3287_v24 = vadd.f32 %v3286_v1, %v3238_v39  ;;  %3432 = vmatmul.bf16.gmra.mxu0 %v6671_v20  ;;  %3530 = vmatmul.bf16.gmra.mxu2 %v6675_v21 }
 0x44c   : > { %3579 = vmatmul.bf16.gmra.mxu3 %v6678_v40 }
 0x44e   : > { %v3335_v19 = vpop.f32.mrf.mxu2 }
 0x44f   : > { %v3336_v41 = vadd.f32 %v3335_v19, %v3287_v24  ;;  %v3384_v9 = vpop.f32.mrf.mxu3  ;;  %v3288_v56 = vpop.f32.mrf.mxu1 }
 0x450   : > { %v3239_v4 = vpop.f32.mrf.mxu0 }
 0x451   : > { %v3240_v63 = vadd.f32 %v3239_v4, %v7280_v29  ;;  %v7407_v34 = vadd.f32 %v3384_v9, %v3336_v41  ;;  %v7898_v41 = vld [vmem:[#allocation65_spill] sm:$0xff] }
 0x453   : > { %v3289_v45 = vadd.f32 %v3288_v56, %v3240_v63 }
 0x456   : > { %v3337_v35 = vpop.f32.mrf.mxu2 }
 0x457   : > { %v3338_v18 = vadd.f32 %v3337_v35, %v3289_v45  ;;  %v3386_v43 = vpop.f32.mrf.mxu3  ;;  %v3447_v13 = vpop.f32.mrf.mxu1 }
 0x458   : > { %v3398_v20 = vpop.f32.mrf.mxu0 }
 0x459   : > { %v3399_v46 = vadd.f32 %v3398_v20, %v7306_v22  ;;  %v7410_v21 = vadd.f32 %v3386_v43, %v3338_v18 }
 0x45b   : > { %v3448_v40 = vadd.f32 %v3447_v13, %v3399_v46 }
 0x45e   : > { %v3496_v23 = vpop.f32.mrf.mxu2 }
 0x45f   : > { %v3497_v15 = vadd.f32 %v3496_v23, %v3448_v40  ;;  %v3545_v30 = vpop.f32.mrf.mxu3  ;;  %v3449_v2 = vpop.f32.mrf.mxu1 }
 0x460   : > { %v3400_v25 = vpop.f32.mrf.mxu0 }
 0x461   : > { %v3401_v29 = vadd.f32 %v3400_v25, %v7317_v26  ;;  %v3546_v17 = vadd.f32 %v3545_v30, %v3497_v15 }
 0x463   : > { %v3450_v42 = vadd.f32 %v3449_v2, %v3401_v29  ;;  %v5450_v50 = vmul.f32 -1.442695, %v3546_v17 }
 0x465   : > { %5910 = vpow2.f32 %v5450_v50  ;;  %v7899_v50 = vld [vmem:[#allocation66_spill] sm:$0xff] }
 0x466   : > { %v3498_v62 = vpop.f32.mrf.mxu2 }
 0x467   : > { %v3499_v0 = vadd.f32 %v3498_v62, %v3450_v42  ;;  %v3547_v28 = vpop.f32.mrf.mxu3  ;;  %v3452_v32 = vpop.f32.mrf.mxu1 }
 0x468   : > { %v3403_v14 = vpop.f32.mrf.mxu0 }
 0x469   : > { %v3404_v22 = vadd.f32 %v3403_v14, %v7329_v33  ;;  %v3548_v27 = vadd.f32 %v3547_v28, %v3499_v0 }
 0x46b   : > { %v3453_v8 = vadd.f32 %v3452_v32, %v3404_v22  ;;  %v5911_v60 = vpop.eup %5910  ;;  %v5452_v11 = vmul.f32 -1.442695, %v3548_v27 }
 0x46c   : > { %v3714_v55 = vadd.f32 1.0, %v5911_v60 }
 0x46d   : > { %5912 = vpow2.f32 %v5452_v11 }
 0x46e   : > { %5914 = vrcp.f32 %v3714_v55  ;;  %v3501_v26 = vpop.f32.mrf.mxu2  ;;  %v3771_v56 = vand.u32 2147483648, %v3714_v55  ;;  %v3769_v35 = vand.u32 2147483647, %v3714_v55  ;;  %vm3765_vm1 = vweird.f32 %v3714_v55 }
 0x46f   : > { %v3502_v52 = vadd.f32 %v3501_v26, %v3453_v8  ;;  %v3550_v53 = vpop.f32.mrf.mxu3  ;;  %v3454_v49 = vpop.f32.mrf.mxu1 }
 0x470   : > { %v3405_v38 = vpop.f32.mrf.mxu0  ;;  %v3772_v15 = vor.u32 1.1754944e-38, %v3771_v56  ;;  %vm3770_vm3 = vcmp.eq.f32.partialorder %v3769_v35, 8.507059e+37 }
 0x471   : > { %v3406_v3 = vadd.f32 %v3405_v38, %v7332_v59  ;;  %v3551_v16 = vadd.f32 %v3550_v53, %v3502_v52 }
 0x473   : > { %v3455_v57 = vadd.f32 %v3454_v49, %v3406_v3  ;;  %v5913_v10 = vpop.eup %5912  ;;  %v5454_v58 = vmul.f32 -1.442695, %v3551_v16 }
 0x474   : > { %v5915_v33 = vpop.eup %5914  ;;  %v3716_v47 = vadd.f32 1.0, %v5913_v10 }
 0x475   : > { %v3761_v5 = vmul.f32 %v5915_v33, %v3714_v55  ;;  %5916 = vpow2.f32 %v5454_v58  ;;  %vm3766_vm0 = vweird.f32 %v5915_v33 }
 0x476   : > { %5918 = vrcp.f32 %v3716_v47  ;;  %v3503_v61 = vpop.f32.mrf.mxu2  ;;  %vm3767_vm2 = vmor %vm3765_vm1, %vm3766_vm0  ;;  %v3801_v32 = vand.u32 2147483648, %v3716_v47  ;;  %v3799_v8 = vand.u32 2147483647, %v3716_v47  ;;  %vm3795_vm5 = vweird.f32 %v3716_v47 }
 0x477   : > { %v3762_v39 = vsub.f32 1.0, %v3761_v5  ;;  %v3504_v1 = vadd.f32 %v3503_v61, %v3455_v57  ;;  %v3552_v24 = vpop.f32.mrf.mxu3  ;;  %5920 = vtanh.f32 %v7898_v41  ;;  %v3457_v59 = vpop.f32.mrf.mxu1 }
 0x478   : > { %v3408_v19 = vpop.f32.mrf.mxu0  ;;  %v3802_v38 = vor.u32 1.1754944e-38, %v3801_v32  ;;  %vm3800_vm7 = vcmp.eq.f32.partialorder %v3799_v8, 8.507059e+37 }
 0x479   : > { %v3409_v9 = vadd.f32 %v3408_v19, %v7339_v7  ;;  %v3553_v4 = vadd.f32 %v3552_v24, %v3504_v1  ;;  %v3763_v63 = vmul.f32 %v5915_v33, %v3762_v39 }
 0x47b   : > { %v3458_v45 = vadd.f32 %v3457_v59, %v3409_v9  ;;  %v5917_v18 = vpop.eup %5916  ;;  %v5456_v43 = vmul.f32 -1.442695, %v3553_v4  ;;  %v3764_v20 = vadd.f32 %v5915_v33, %v3763_v63 }
 0x47c   : > { %v5919_v46 = vpop.eup %5918  ;;  %v7417_v13 = vadd.f32 1.0, %v5917_v18 }
 0x47d   : > { %v3791_v40 = vmul.f32 %v5919_v46, %v3716_v47  ;;  %5922 = vpow2.f32 %v5456_v43  ;;  %v3768_v23 = vsel %vm3767_vm2, %v5915_v33, %v3764_v20  ;;  %v5921_v7 = vpop.eup %5920  ;;  %vm3796_vm4 = vweird.f32 %v5919_v46  ;;  %v7900_v47 = vld [vmem:[#allocation67_spill] sm:$0xff] }
 0x47e   : > { %5924 = vrcp.f32 %v7417_v13  ;;  %v3506_v30 = vpop.f32.mrf.mxu2  ;;  %v3773_v42 = vsel %vm3770_vm3, %v3772_v15, %v3768_v23  ;;  %vm3797_vm6 = vmor %vm3795_vm5, %vm3796_vm4  ;;  %v3831_v19 = vand.u32 2147483648, %v7417_v13  ;;  %v3829_v9 = vand.u32 2147483647, %v7417_v13 }
 0x47f   : > { %v3792_v25 = vsub.f32 1.0, %v3791_v40  ;;  %v3507_v29 = vadd.f32 %v3506_v30, %v3458_v45  ;;  %v3555_v2 = vpop.f32.mrf.mxu3  ;;  %5926 = vtanh.f32 %v7899_v50  ;;  %v3459_v0 = vpop.f32.mrf.mxu1  ;;  %v7422_v28 = vmul.f32 %v5921_v7, %v3773_v42 }
 0x480   : > { %v3410_v17 = vpop.f32.mrf.mxu0  ;;  %vm3825_vm9 = vweird.f32 %v7417_v13  ;;  %v3832_v43 = vor.u32 1.1754944e-38, %v3831_v19  ;;  %vm3830_vm11 = vcmp.eq.f32.partialorder %v3829_v9, 8.507059e+37 }
 0x481   : > { %v3411_v62 = vadd.f32 %v3410_v17, %v7342_v37  ;;  %v3556_v14 = vadd.f32 %v3555_v2, %v3507_v29  ;;  %v3793_v22 = vmul.f32 %v5919_v46, %v3792_v25 }
 0x483   : > { %v3460_v27 = vadd.f32 %v3459_v0, %v3411_v62  ;;  %v5923_v60 = vpop.eup %5922  ;;  %v5458_v11 = vmul.f32 -1.442695, %v3556_v14  ;;  %v3794_v55 = vadd.f32 %v5919_v46, %v3793_v22 }
 0x484   : > { %v5925_v26 = vpop.eup %5924  ;;  %v7424_v52 = vadd.f32 1.0, %v5923_v60 }
 0x485   : > { %v3821_v53 = vmul.f32 %v5925_v26, %v7417_v13  ;;  %5928 = vpow2.f32 %v5458_v11  ;;  %v3798_v37 = vsel %vm3797_vm6, %v5919_v46, %v3794_v55  ;;  %v5927_v3 = vpop.eup %5926  ;;  %vm3826_vm8 = vweird.f32 %v5925_v26  ;;  %v7901_v13 = vld [vmem:[#allocation68_spill] sm:$0xff] }
 0x486   : > { %5930 = vrcp.f32 %v7424_v52  ;;  %v3508_v49 = vpop.f32.mrf.mxu2  ;;  %v3803_v33 = vsel %vm3800_vm7, %v3802_v38, %v3798_v37  ;;  %vm3827_vm10 = vmor %vm3825_vm9, %vm3826_vm8  ;;  %v3861_v50 = vand.u32 2147483648, %v7424_v52  ;;  %v3859_v0 = vand.u32 2147483647, %v7424_v52 }
 0x487   : > { %v3822_v16 = vsub.f32 1.0, %v3821_v53  ;;  %v3509_v57 = vadd.f32 %v3508_v49, %v3460_v27  ;;  %v3557_v10 = vpop.f32.mrf.mxu3  ;;  %5932 = vtanh.f32 %v7900_v47  ;;  %v3462_v61 = vpop.f32.mrf.mxu1  ;;  %v7430_v39 = vmul.f32 %v5927_v3, %v3803_v33 }
 0x488   : > { %v3413_v58 = vpop.f32.mrf.mxu0  ;;  %vm3855_vm13 = vweird.f32 %v7424_v52  ;;  %v3862_v11 = vor.u32 1.1754944e-38, %v3861_v50  ;;  %vm3860_vm15 = vcmp.eq.f32.partialorder %v3859_v0, 8.507059e+37 }
 0x489   : > { %v3414_v5 = vadd.f32 %v3413_v58, %v7352_v12  ;;  %v3558_v1 = vadd.f32 %v3557_v10, %v3509_v57  ;;  %v3823_v24 = vmul.f32 %v5925_v26, %v3822_v16  ;;  %v4258_v59 = vpack.c.bf16 %v7430_v39, %v7422_v28 }
 0x48b   : > { %v3463_v41 = vadd.f32 %v3462_v61, %v3414_v5  ;;  %v5929_v4 = vpop.eup %5928  ;;  %v5460_v63 = vmul.f32 -1.442695, %v3558_v1  ;;  %v3824_v56 = vadd.f32 %v5925_v26, %v3823_v24 }
 0x48c   : > { %v5931_v12 = vpop.eup %5930  ;;  %v7437_v45 = vadd.f32 1.0, %v5929_v4 }
 0x48d   : > { %v3851_v35 = vmul.f32 %v5931_v12, %v7424_v52  ;;  %5934 = vpow2.f32 %v5460_v63  ;;  %v3828_v18 = vsel %vm3827_vm10, %v5925_v26, %v3824_v56  ;;  %v5933_v20 = vpop.eup %5932  ;;  %vm3856_vm12 = vweird.f32 %v5931_v12  ;;  %v7902_v52 = vld [vmem:[#allocation69_spill] sm:$0xff] }
 0x48e   : > { %5936 = vrcp.f32 %v7437_v45  ;;  %v3511_v46 = vpop.f32.mrf.mxu2  ;;  %v3833_v30 = vsel %vm3830_vm11, %v3832_v43, %v3828_v18  ;;  %vm3857_vm14 = vmor %vm3855_vm13, %vm3856_vm12  ;;  %v3891_v47 = vand.u32 2147483648, %v7437_v45  ;;  %v3889_v61 = vand.u32 2147483647, %v7437_v45 }
 0x48f   : > { %v3852_v40 = vsub.f32 1.0, %v3851_v35  ;;  %v3512_v23 = vadd.f32 %v3511_v46, %v3463_v41  ;;  %v3560_v15 = vpop.f32.mrf.mxu3  ;;  %5938 = vtanh.f32 %v7901_v13  ;;  %v3464_v29 = vpop.f32.mrf.mxu1  ;;  %v7443_v2 = vmul.f32 %v5933_v20, %v3833_v30 }
 0x490   : > { %v3415_v7 = vpop.f32.mrf.mxu0  ;;  %vm3885_vm1 = vweird.f32 %v7437_v45  ;;  %v3892_v56 = vor.u32 1.1754944e-38, %v3891_v47  ;;  %vm3890_vm3 = vcmp.eq.f32.partialorder %v3889_v61, 8.507059e+37 }
 0x491   : > { %v3416_v25 = vadd.f32 %v3415_v7, %v7358_v44  ;;  %v3561_v17 = vadd.f32 %v3560_v15, %v3512_v23  ;;  %v3853_v42 = vmul.f32 %v5931_v12, %v3852_v40 }
 0x493   : > { %v3465_v62 = vadd.f32 %v3464_v29, %v3416_v25  ;;  %v5935_v14 = vpop.eup %5934  ;;  %v5462_v22 = vmul.f32 -1.442695, %v3561_v17  ;;  %v3854_v32 = vadd.f32 %v5931_v12, %v3853_v42 }
 0x494   : > { %v5937_v27 = vpop.eup %5936  ;;  %v7448_v8 = vadd.f32 1.0, %v5935_v14 }
 0x495   : > { %v3881_v44 = vmul.f32 %v5937_v27, %v7437_v45  ;;  %5940 = vpow2.f32 %v5462_v22  ;;  %v3858_v60 = vsel %vm3857_vm14, %v5931_v12, %v3854_v32  ;;  %v5939_v55 = vpop.eup %5938  ;;  %vm3886_vm0 = vweird.f32 %v5937_v27  ;;  %v7903_v45 = vld [vmem:[#allocation70_spill] sm:$0xff] }
 0x496   : > { %5942 = vrcp.f32 %v7448_v8  ;;  %v3513_v26 = vpop.f32.mrf.mxu2  ;;  %v3863_v49 = vsel %vm3860_vm15, %v3862_v11, %v3858_v60  ;;  %vm3887_vm2 = vmor %vm3885_vm1, %vm3886_vm0  ;;  %v3921_v25 = vand.u32 2147483648, %v7448_v8  ;;  %v3919_v17 = vand.u32 2147483647, %v7448_v8 }
 0x497   : > { %v3882_v53 = vsub.f32 1.0, %v3881_v44  ;;  %v3514_v37 = vadd.f32 %v3513_v26, %v3465_v62  ;;  %v3562_v38 = vpop.f32.mrf.mxu3  ;;  %5944 = vtanh.f32 %v7902_v52  ;;  %v3467_v57 = vpop.f32.mrf.mxu1  ;;  %v7454_v10 = vmul.f32 %v5939_v55, %v3863_v49 }
 0x498   : > { %v3418_v3 = vpop.f32.mrf.mxu0  ;;  %vm3915_vm5 = vweird.f32 %v7448_v8  ;;  %v3922_v32 = vor.u32 1.1754944e-38, %v3921_v25  ;;  %vm3920_vm7 = vcmp.eq.f32.partialorder %v3919_v17, 8.507059e+37 }
 0x499   : > { %v3419_v16 = vadd.f32 %v3418_v3, %v7367_v54  ;;  %v3563_v58 = vadd.f32 %v3562_v38, %v3514_v37  ;;  %v3883_v33 = vmul.f32 %v5937_v27, %v3882_v53  ;;  %v4260_v1 = vpack.c.bf16 %v7454_v10, %v7443_v2 }
 0x49b   : > { %v3468_v5 = vadd.f32 %v3467_v57, %v3419_v16  ;;  %v5941_v24 = vpop.eup %5940  ;;  %v5464_v19 = vmul.f32 -1.442695, %v3563_v58  ;;  %v3884_v41 = vadd.f32 %v5937_v27, %v3883_v33 }
 0x49c   : > { %v5943_v54 = vpop.eup %5942  ;;  %v7461_v9 = vadd.f32 1.0, %v5941_v24 }
 0x49d   : > { %v3911_v4 = vmul.f32 %v5943_v54, %v7448_v8  ;;  %5946 = vpow2.f32 %v5464_v19  ;;  %v3888_v63 = vsel %vm3887_vm2, %v5937_v27, %v3884_v41  ;;  %v5945_v12 = vpop.eup %5944  ;;  %vm3916_vm4 = vweird.f32 %v5943_v54  ;;  %v7904_v8 = vld [vmem:[#allocation71_spill] sm:$0xff] }
 0x49e   : > { %5948 = vrcp.f32 %v7461_v9  ;;  %v3516_v35 = vpop.f32.mrf.mxu2  ;;  %v3893_v40 = vsel %vm3890_vm3, %v3892_v56, %v3888_v63  ;;  %vm3917_vm6 = vmor %vm3915_vm5, %vm3916_vm4  ;;  %v3951_v38 = vand.u32 2147483648, %v7461_v9  ;;  %v3949_v57 = vand.u32 2147483647, %v7461_v9 }
 0x49f   : > { %v3912_v18 = vsub.f32 1.0, %v3911_v4  ;;  %v3517_v43 = vadd.f32 %v3516_v35, %v3468_v5  ;;  %v3565_v20 = vpop.f32.mrf.mxu3  ;;  %5950 = vtanh.f32 %v7903_v45  ;;  %v3469_v15 = vpop.f32.mrf.mxu1  ;;  %v7467_v7 = vmul.f32 %v5945_v12, %v3893_v40 }
 0x4a0   : > { %v3420_v46 = vpop.f32.mrf.mxu0  ;;  %vm3945_vm9 = vweird.f32 %v7461_v9  ;;  %v3952_v19 = vor.u32 1.1754944e-38, %v3951_v38  ;;  %vm3950_vm11 = vcmp.eq.f32.partialorder %v3949_v57, 8.507059e+37 }
 0x4a1   : > { %v3421_v23 = vadd.f32 %v3420_v46, %v7374_v48  ;;  %v3566_v30 = vadd.f32 %v3565_v20, %v3517_v43  ;;  %v3913_v13 = vmul.f32 %v5943_v54, %v3912_v18  ;;  %v7905_v43 = vld [vmem:[#allocation72_spill] sm:$0xff] }
 0x4a3   : > { %v3470_v29 = vadd.f32 %v3469_v15, %v3421_v23  ;;  %v5947_v42 = vpop.eup %5946  ;;  %v5466_v50 = vmul.f32 -1.442695, %v3566_v30  ;;  %v3914_v62 = vadd.f32 %v5943_v54, %v3913_v13 }
 0x4a4   : > { %v5949_v0 = vpop.eup %5948  ;;  %v7472_v14 = vadd.f32 1.0, %v5947_v42 }
 0x4a5   : > { %v3941_v48 = vmul.f32 %v5949_v0, %v7461_v9  ;;  %5952 = vpow2.f32 %v5466_v50  ;;  %v3918_v22 = vsel %vm3917_vm6, %v5943_v54, %v3914_v62  ;;  %v5951_v27 = vpop.eup %5950  ;;  %vm3946_vm8 = vweird.f32 %v5949_v0 }
 0x4a6   : > { %5954 = vrcp.f32 %v7472_v14  ;;  %v3518_v44 = vpop.f32.mrf.mxu2  ;;  %v3923_v53 = vsel %vm3920_vm7, %v3922_v32, %v3918_v22  ;;  %vm3947_vm10 = vmor %vm3945_vm9, %vm3946_vm8  ;;  %v3981_v46 = vand.u32 2147483648, %v7472_v14  ;;  %v3979_v30 = vand.u32 2147483647, %v7472_v14 }
 0x4a7   : > { %v3942_v60 = vsub.f32 1.0, %v3941_v48  ;;  %v3519_v11 = vadd.f32 %v3518_v44, %v3470_v29  ;;  %v3567_v55 = vpop.f32.mrf.mxu3  ;;  %5956 = vtanh.f32 %v7904_v8  ;;  %v3472_v37 = vpop.f32.mrf.mxu1  ;;  %v7478_v3 = vmul.f32 %v5951_v27, %v3923_v53 }
 0x4a8   : > { %v3423_v26 = vpop.f32.mrf.mxu0  ;;  %vm3975_vm13 = vweird.f32 %v7472_v14  ;;  %v3982_v50 = vor.u32 1.1754944e-38, %v3981_v46  ;;  %vm3980_vm15 = vcmp.eq.f32.partialorder %v3979_v30, 8.507059e+37 }
 0x4a9   : > { %v3568_v49 = vadd.f32 %v3567_v55, %v3519_v11  ;;  %v3424_v52 = vadd.f32 %v3423_v26, %v7384_v51  ;;  %v3943_v16 = vmul.f32 %v5949_v0, %v3942_v60  ;;  %v4262_v58 = vpack.c.bf16 %v7478_v3, %v7467_v7  ;;  %v7906_v11 = vld [vmem:[#allocation73_spill] sm:$0xff] }
 0x4ab   : > { %v5953_v33 = vpop.eup %5952  ;;  %v5468_v47 = vmul.f32 -1.442695, %v3568_v49  ;;  %v3944_v5 = vadd.f32 %v5949_v0, %v3943_v16  ;;  %v3473_v51 = vadd.f32 %v3472_v37, %v3424_v52 }
 0x4ac   : > { %v5955_v61 = vpop.eup %5954  ;;  %v7485_v24 = vadd.f32 1.0, %v5953_v33 }
 0x4ad   : > { %v3971_v41 = vmul.f32 %v5955_v61, %v7472_v14  ;;  %5958 = vpow2.f32 %v5468_v47  ;;  %v3948_v54 = vsel %vm3947_vm10, %v5949_v0, %v3944_v5  ;;  %v5957_v4 = vpop.eup %5956  ;;  %vm3976_vm12 = vweird.f32 %v5955_v61 }
 0x4ae   : > { %5960 = vrcp.f32 %v7485_v24  ;;  %v3521_v63 = vpop.f32.mrf.mxu2  ;;  %v3953_v9 = vsel %vm3950_vm11, %v3952_v19, %v3948_v54  ;;  %vm3977_vm14 = vmor %vm3975_vm13, %vm3976_vm12  ;;  %v4011_v26 = vand.u32 2147483648, %v7485_v24  ;;  %v4009_v49 = vand.u32 2147483647, %v7485_v24 }
 0x4af   : > { %v3972_v56 = vsub.f32 1.0, %v3971_v41  ;;  %v3522_v12 = vadd.f32 %v3521_v63, %v3473_v51  ;;  %v3570_v35 = vpop.f32.mrf.mxu3  ;;  %5962 = vtanh.f32 %v7905_v43  ;;  %v3474_v20 = vpop.f32.mrf.mxu1  ;;  %v7491_v40 = vmul.f32 %v5957_v4, %v3953_v9 }
 0x4b0   : > { %v3425_v18 = vpop.f32.mrf.mxu0  ;;  %vm4005_vm1 = vweird.f32 %v7485_v24  ;;  %vm4010_vm3 = vcmp.eq.f32.partialorder %v4009_v49, 8.507059e+37 }
 0x4b1   : > { %v3571_v45 = vadd.f32 %v3570_v35, %v3522_v12  ;;  %v3426_v23 = vadd.f32 %v3425_v18, %v7390_v31  ;;  %v3973_v15 = vmul.f32 %v5955_v61, %v3972_v56  ;;  %v7907_v35 = vld [vmem:[#allocation74_spill] sm:$0xff] }
 0x4b3   : > { %v5959_v13 = vpop.eup %5958  ;;  %v5470_v25 = vmul.f32 -1.442695, %v3571_v45  ;;  %v3974_v29 = vadd.f32 %v5955_v61, %v3973_v15  ;;  %v3475_v0 = vadd.f32 %v3474_v20, %v3426_v23 }
 0x4b4   : > { %v5961_v17 = vpop.eup %5960  ;;  %v7496_v42 = vadd.f32 1.0, %v5959_v13 }
 0x4b5   : > { %v4001_v62 = vmul.f32 %v5961_v17, %v7485_v24  ;;  %5964 = vpow2.f32 %v5470_v25  ;;  %v3978_v48 = vsel %vm3977_vm14, %v5955_v61, %v3974_v29  ;;  %v5963_v31 = vpop.eup %5962  ;;  %vm4006_vm0 = vweird.f32 %v5961_v17 }
 0x4b6   : > { %5966 = vrcp.f32 %v7496_v42  ;;  %v3523_v22 = vpop.f32.mrf.mxu2  ;;  %v3983_v14 = vsel %vm3980_vm15, %v3982_v50, %v3978_v48  ;;  %vm4007_vm2 = vmor %vm4005_vm1, %vm4006_vm0  ;;  %v4012_v61 = vor.u32 1.1754944e-38, %v4011_v26  ;;  %v4041_v9 = vand.u32 2147483648, %v7496_v42 }
 0x4b7   : > { %v4002_v32 = vsub.f32 1.0, %v4001_v62  ;;  %v3524_v27 = vadd.f32 %v3523_v22, %v3475_v0  ;;  %v3572_v44 = vpop.f32.mrf.mxu3  ;;  %5968 = vtanh.f32 %v7906_v11  ;;  %v3477_v55 = vpop.f32.mrf.mxu1  ;;  %v7502_v53 = vmul.f32 %v5963_v31, %v3983_v14 }
 0x4b8   : > { %v3428_v60 = vpop.f32.mrf.mxu0  ;;  %v4039_v23 = vand.u32 2147483647, %v7496_v42  ;;  %vm4035_vm5 = vweird.f32 %v7496_v42 }
 0x4b9   : > { %v3573_v8 = vadd.f32 %v3572_v44, %v3524_v27  ;;  %v3429_v37 = vadd.f32 %v3428_v60, %v7397_v36  ;;  %v4003_v38 = vmul.f32 %v5961_v17, %v4002_v32  ;;  %v4264_v52 = vpack.c.bf16 %v7502_v53, %v7491_v40  ;;  %v7908_v44 = vld [vmem:[#allocation75_spill] sm:$0xff] }
 0x4ba   : > { %vm4040_vm7 = vcmp.eq.f32.partialorder %v4039_v23, 8.507059e+37 }
 0x4bb   : > { %v5965_v16 = vpop.eup %5964  ;;  %v5472_v57 = vmul.f32 -1.442695, %v3573_v8  ;;  %v4004_v33 = vadd.f32 %v5961_v17, %v4003_v38  ;;  %v3478_v36 = vadd.f32 %v3477_v55, %v3429_v37 }
 0x4bc   : > { %v5967_v47 = vpop.eup %5966  ;;  %v7509_v5 = vadd.f32 1.0, %v5965_v16 }
 0x4bd   : > { %v4031_v19 = vmul.f32 %v5967_v47, %v7496_v42  ;;  %5970 = vpow2.f32 %v5472_v57  ;;  %v4008_v41 = vsel %vm4007_vm2, %v5961_v17, %v4004_v33  ;;  %v5969_v51 = vpop.eup %5968  ;;  %vm4036_vm4 = vweird.f32 %v5967_v47 }
 0x4be   : > { %5972 = vrcp.f32 %v7509_v5  ;;  %v3526_v54 = vpop.f32.mrf.mxu2  ;;  %v4013_v24 = vsel %vm4010_vm3, %v4012_v61, %v4008_v41  ;;  %vm4037_vm6 = vmor %vm4035_vm5, %vm4036_vm4  ;;  %v4042_v17 = vor.u32 1.1754944e-38, %v4041_v9  ;;  %v4071_v60 = vand.u32 2147483648, %v7509_v5 }
 0x4bf   : > { %v4032_v4 = vsub.f32 1.0, %v4031_v19  ;;  %v3527_v63 = vadd.f32 %v3526_v54, %v3478_v36  ;;  %v3575_v56 = vpop.f32.mrf.mxu3  ;;  %5974 = vtanh.f32 %v7907_v35  ;;  %v3479_v18 = vpop.f32.mrf.mxu1  ;;  %v7515_v43 = vmul.f32 %v5969_v51, %v4013_v24 }
 0x4c0   : > { %v3430_v12 = vpop.f32.mrf.mxu0  ;;  %v4069_v37 = vand.u32 2147483647, %v7509_v5  ;;  %vm4065_vm9 = vweird.f32 %v7509_v5  ;;  %v4072_v61 = vor.u32 1.1754944e-38, %v4071_v60 }
 0x4c1   : > { %v3576_v20 = vadd.f32 %v3575_v56, %v3527_v63  ;;  %v3431_v46 = vadd.f32 %v3430_v12, %v7400_v6  ;;  %v4033_v45 = vmul.f32 %v5967_v47, %v4032_v4  ;;  %v7909_v12 = vld [vmem:[#allocation76_spill] sm:$0xff] }
 0x4c2   : > { %vm4070_vm11 = vcmp.eq.f32.partialorder %v4069_v37, 8.507059e+37 }
 0x4c3   : > { %v5971_v15 = vpop.eup %5970  ;;  %v5474_v30 = vmul.f32 -1.442695, %v3576_v20  ;;  %v4034_v13 = vadd.f32 %v5967_v47, %v4033_v45  ;;  %v3480_v62 = vadd.f32 %v3479_v18, %v3431_v46 }
 0x4c4   : > { %v5973_v25 = vpop.eup %5972  ;;  %v7520_v29 = vadd.f32 1.0, %v5971_v15 }
 0x4c5   : > { %v4061_v50 = vmul.f32 %v5973_v25, %v7509_v5  ;;  %5976 = vpow2.f32 %v5474_v30  ;;  %v4038_v0 = vsel %vm4037_vm6, %v5967_v47, %v4034_v13  ;;  %v5975_v6 = vpop.eup %5974  ;;  %vm4066_vm8 = vweird.f32 %v5973_v25 }
 0x4c6   : > { %5978 = vrcp.f32 %v7520_v29  ;;  %v3528_v48 = vpop.f32.mrf.mxu2  ;;  %v4043_v42 = vsel %vm4040_vm7, %v4042_v17, %v4038_v0  ;;  %vm4067_vm10 = vmor %vm4065_vm9, %vm4066_vm8  ;;  %v4101_v24 = vand.u32 2147483648, %v7520_v29  ;;  %v4099_v46 = vand.u32 2147483647, %v7520_v29 }
 0x4c7   : > { %v4062_v31 = vsub.f32 1.0, %v4061_v50  ;;  %v3529_v22 = vadd.f32 %v3528_v48, %v3480_v62  ;;  %v3577_v32 = vpop.f32.mrf.mxu3  ;;  %5980 = vtanh.f32 %v7908_v44  ;;  %v7526_v14 = vmul.f32 %v5975_v6, %v4043_v42  ;;  %v3482_v8 = vpop.f32.mrf.mxu1 }
 0x4c8   : > { %v3433_v27 = vpop.f32.mrf.mxu0  ;;  %vm4095_vm13 = vweird.f32 %v7520_v29  ;;  %v4102_v17 = vor.u32 1.1754944e-38, %v4101_v24  ;;  %vm4100_vm15 = vcmp.eq.f32.partialorder %v4099_v46, 8.507059e+37 }
 0x4c9   : > { %v3578_v11 = vadd.f32 %v3577_v32, %v3529_v22  ;;  %v3434_v55 = vadd.f32 %v3433_v27, %v7407_v34  ;;  %v4063_v26 = vmul.f32 %v5973_v25, %v4062_v31  ;;  %v4266_v38 = vpack.c.bf16 %v7526_v14, %v7515_v43  ;;  %v7910_v32 = vld [vmem:[#allocation77_spill] sm:$0xff] }
 0x4cb   : > { %v5977_v49 = vpop.eup %5976  ;;  %v5476_v16 = vmul.f32 -1.442695, %v3578_v11  ;;  %v4064_v57 = vadd.f32 %v5973_v25, %v4063_v26  ;;  %v3483_v19 = vadd.f32 %v3482_v8, %v3434_v55 }
 0x4cc   : > { %v5979_v33 = vpop.eup %5978  ;;  %v7533_v47 = vadd.f32 1.0, %v5977_v49 }
 0x4cd   : > { %v4091_v34 = vmul.f32 %v5979_v33, %v7520_v29  ;;  %5982 = vpow2.f32 %v5476_v16  ;;  %v4068_v36 = vsel %vm4067_vm10, %v5973_v25, %v4064_v57  ;;  %v5981_v41 = vpop.eup %5980  ;;  %vm4096_vm12 = vweird.f32 %v5979_v33 }
 0x4ce   : > { %5984 = vrcp.f32 %v7533_v47  ;;  %v3531_v51 = vpop.f32.mrf.mxu2  ;;  %v4073_v5 = vsel %vm4070_vm11, %v4072_v61, %v4068_v36  ;;  %vm4097_vm14 = vmor %vm4095_vm13, %vm4096_vm12  ;;  %v4131_v60 = vand.u32 2147483648, %v7533_v47  ;;  %v4129_v11 = vand.u32 2147483647, %v7533_v47 }
 0x4cf   : > { %v4092_v54 = vsub.f32 1.0, %v4091_v34  ;;  %v3532_v4 = vadd.f32 %v3531_v51, %v3483_v19  ;;  %v3580_v63 = vpop.f32.mrf.mxu3  ;;  %5986 = vtanh.f32 %v7909_v12  ;;  %v7539_v35 = vmul.f32 %v5981_v41, %v4073_v5  ;;  %v3484_v25 = vpop.f32.mrf.mxu1  ;;  %v7911_v51 = vld [vmem:[#allocation78_spill] sm:$0xff] }
 0x4d0   : > { %v3435_v56 = vpop.f32.mrf.mxu0  ;;  %vm4125_vm1 = vweird.f32 %v7533_v47  ;;  %v4132_v61 = vor.u32 1.1754944e-38, %v4131_v60  ;;  %vm4130_vm3 = vcmp.eq.f32.partialorder %v4129_v11, 8.507059e+37 }
 0x4d1   : > { %v3581_v18 = vadd.f32 %v3580_v63, %v3532_v4  ;;  %v3436_v9 = vadd.f32 %v3435_v56, %v7410_v21  ;;  %v4093_v20 = vmul.f32 %v5979_v33, %v4092_v54 }
 0x4d3   : > { %v5983_v45 = vpop.eup %5982  ;;  %v5478_v23 = vmul.f32 -1.442695, %v3581_v18  ;;  %v4094_v15 = vadd.f32 %v5979_v33, %v4093_v20  ;;  %v3485_v62 = vadd.f32 %v3484_v25, %v3436_v9 }
 0x4d4   : > { %v5985_v30 = vpop.eup %5984  ;;  %v3740_v13 = vadd.f32 1.0, %v5983_v45 }
 0x4d5   : > { %v4121_v50 = vmul.f32 %v5985_v30, %v7533_v47  ;;  %5988 = vpow2.f32 %v5478_v23  ;;  %v4098_v0 = vsel %vm4097_vm14, %v5979_v33, %v4094_v15  ;;  %v5987_v21 = vpop.eup %5986  ;;  %vm4126_vm0 = vweird.f32 %v5985_v30  ;;  %v7912_v23 = vld [vmem:[#allocation79_spill] sm:$0xff] }
 0x4d6   : > { %5990 = vrcp.f32 %v3740_v13  ;;  %v3533_v6 = vpop.f32.mrf.mxu2  ;;  %v4103_v22 = vsel %vm4100_vm15, %v4102_v17, %v4098_v0  ;;  %vm4127_vm2 = vmor %vm4125_vm1, %vm4126_vm0  ;;  %v4161_v4 = vand.u32 2147483648, %v3740_v13  ;;  %v4159_v63 = vand.u32 2147483647, %v3740_v13 }
 0x4d7   : > { %v4122_v48 = vsub.f32 1.0, %v4121_v50  ;;  %v3534_v31 = vadd.f32 %v3533_v6, %v3485_v62  ;;  %5992 = vtanh.f32 %v7910_v32  ;;  %v3582_v29 = vpop.f32.mrf.mxu3  ;;  %v7546_v27 = vmul.f32 %v5987_v21, %v4103_v22 }
 0x4d8   : > { %vm4155_vm5 = vweird.f32 %v3740_v13  ;;  %v4162_v9 = vor.u32 1.1754944e-38, %v4161_v4  ;;  %vm4160_vm7 = vcmp.eq.f32.partialorder %v4159_v63, 8.507059e+37 }
 0x4d9   : > { %v3583_v42 = vadd.f32 %v3582_v29, %v3534_v31  ;;  %v4123_v44 = vmul.f32 %v5985_v30, %v4122_v48  ;;  %v4268_v55 = vpack.c.bf16 %v7546_v27, %v7539_v35  ;;  %v7913_v29 = vld [vmem:[#allocation80_spill] sm:$0xff] }
 0x4db   : > { %v5989_v26 = vpop.eup %5988  ;;  %v5480_v8 = vmul.f32 -1.442695, %v3583_v42  ;;  %v4124_v37 = vadd.f32 %v5985_v30, %v4123_v44 }
 0x4dc   : > { %v5991_v49 = vpop.eup %5990  ;;  %v3742_v16 = vadd.f32 1.0, %v5989_v26 }
 0x4dd   : > { %v4151_v57 = vmul.f32 %v5991_v49, %v3740_v13  ;;  %5994 = vpow2.f32 %v5480_v8  ;;  %v4128_v33 = vsel %vm4127_vm2, %v5985_v30, %v4124_v37  ;;  %v5993_v34 = vpop.eup %5992  ;;  %vm4156_vm4 = vweird.f32 %v5991_v49 }
 0x4de   : > { %5996 = vrcp.f32 %v3742_v16  ;;  %v4133_v36 = vsel %vm4130_vm3, %v4132_v61, %v4128_v33  ;;  %vm4157_vm6 = vmor %vm4155_vm5, %vm4156_vm4  ;;  %v4191_v15 = vand.u32 2147483648, %v3742_v16  ;;  %v4189_v17 = vand.u32 2147483647, %v3742_v16  ;;  %v4273_v33 = vld [vmem:[%s7614_s3] sm:$0x3] }
 0x4df   : > { %v4152_v19 = vsub.f32 1.0, %v4151_v57  ;;  %v4250_v41 = vmul.f32 %v5993_v34, %v4133_v36  ;;  %5998 = vtanh.f32 %v7911_v51  ;;  %vm4185_vm9 = vweird.f32 %v3742_v16  ;;  %4282 = vst [vmem:[#allocation1] ss:$9 sm:$0xff] %v4273_v33  ;;  %v4274_v61 = vld [vmem:[#allocation2] sm:$0x1] }
 0x4e0   : > { %v4192_v0 = vor.u32 1.1754944e-38, %v4191_v15  ;;  %vm4190_vm11 = vcmp.eq.f32.partialorder %v4189_v17, 8.507059e+37 }
 0x4e1   : > { %v4153_v54 = vmul.f32 %v5991_v49, %v4152_v19  ;;  %v6177_v19 = vmov 0  }
 0x4e2   : > { %5813 = vset.pattern.permute.xlu0 %v6177_v19 }
 0x4e3   : > { %v5995_v47 = vpop.eup %5994  ;;  %v4154_v56 = vadd.f32 %v5991_v49, %v4153_v54  ;;  %4277 = vperm.xlu0 %5813, %v4274_v61  }
 0x4e4   : > { %v5997_v5 = vpop.eup %5996  ;;  %v3744_v12 = vadd.f32 1.0, %v5995_v47 }
 0x4e5   : > { %v4181_v24 = vmul.f32 %v5997_v5, %v3742_v16  ;;  %v4158_v18 = vsel %vm4157_vm6, %v5991_v49, %v4154_v56  ;;  %v5999_v20 = vpop.eup %5998  ;;  %vm4186_vm8 = vweird.f32 %v5997_v5 }
 0x4e6   : > { %6000 = vrcp.f32 %v3744_v12  ;;  %v4163_v45 = vsel %vm4160_vm7, %v4162_v9, %v4158_v18  ;;  %vm4187_vm10 = vmor %vm4185_vm9, %vm4186_vm8  ;;  %v4221_v42 = vand.u32 2147483648, %v3744_v12  ;;  %v4219_v60 = vand.u32 2147483647, %v3744_v12  ;;  %v4283_v34 = vld [vmem:[#allocation1] sm:$0xff]  ;;  %v4284_v40 = vld [vmem:[#allocation1 + $0x9] sm:$0xff] }
 0x4e7   : > { %v4182_v46 = vsub.f32 1.0, %v4181_v24  ;;  %6002 = vtanh.f32 %v7912_v23  ;;  %v4252_v30 = vmul.f32 %v5999_v20, %v4163_v45  ;;  %vm4215_vm13 = vweird.f32 %v3744_v12  ;;  %4295 = vmatmul.bf16.vlgmr.msra.gmra.mxu0 %v4283_v34 }
 0x4e8   : > { %6004 = vtanh.f32 %v7913_v29  ;;  %v4222_v26 = vor.u32 1.1754944e-38, %v4221_v42  ;;  %vm4220_vm15 = vcmp.eq.f32.partialorder %v4219_v60, 8.507059e+37 }
 0x4e9   : > { %v4183_v25 = vmul.f32 %v5997_v5, %v4182_v46  ;;  %v4270_v50 = vpack.c.bf16 %v4252_v30, %v4250_v41 }
 0x4eb   : > { %v4184_v13 = vadd.f32 %v5997_v5, %v4183_v25 }
 0x4ec   : > { %v6001_v62 = vpop.eup %6000 }
 0x4ed   : > { %v4211_v21 = vmul.f32 %v6001_v62, %v3744_v12  ;;  %v4188_v6 = vsel %vm4187_vm10, %v5997_v5, %v4184_v13  ;;  %v6003_v48 = vpop.eup %6002  ;;  %vm4216_vm12 = vweird.f32 %v6001_v62 }
 0x4ee   : > { %v4193_v31 = vsel %vm4190_vm11, %v4192_v0, %v4188_v6  ;;  %vm4217_vm14 = vmor %vm4215_vm13, %vm4216_vm12  ;;  %v6005_v37 = vpop.eup %6004 }
 0x4ef   : > { %v4212_v22 = vsub.f32 1.0, %v4211_v21  ;;  %v4254_v32 = vmul.f32 %v6003_v48, %v4193_v31 }
 0x4f1   : > { %v4213_v44 = vmul.f32 %v6001_v62, %v4212_v22 }
 0x4f3   : > { %v4214_v11 = vadd.f32 %v6001_v62, %v4213_v44 }
 0x4f5   : > { %v4218_v8 = vsel %vm4217_vm14, %v6001_v62, %v4214_v11 }
 0x4f6   : > { %v4223_v49 = vsel %vm4220_vm15, %v4222_v26, %v4218_v8 }
 0x4f7   : > { %v4256_v16 = vmul.f32 %v6005_v37, %v4223_v49 }
 0x4f9   : > { %v4272_v57 = vpack.c.bf16 %v4256_v16, %v4254_v32 }
 0x4fb   : > { %4300 = vmatpush.bf16.xpose.msra.mxu1 %v4272_v57 }
 0x503   : > { %4301 = vmatpush.bf16.xpose.msra.mxu1 %v4270_v50 }
 0x50b   : > { %4302 = vmatpush.bf16.xpose.msra.mxu1 %v4268_v55 }
 0x513   : > { %4303 = vmatpush.bf16.xpose.msra.mxu1 %v4266_v38 }
 0x51b   : > { %4304 = vmatpush.bf16.xpose.msra.mxu1 %v4264_v52 }
 0x523   : > { %4305 = vmatpush.bf16.xpose.msra.mxu1 %v4262_v58 }
 0x52b   : > { %4306 = vmatpush.bf16.xpose.msra.mxu1 %v4260_v1 }
 0x533   : > { %4307 = vmatpush.bf16.xpose.msra.mxu1 %v4258_v59 }
 0x53a   : > { %4308 = vmatmul.bf16.vlgmr.msra.gmra.mxu1 %v4284_v40 }
 0x555   : > { %v4278_v43 = vpop.permute.xlu0 %4277 }
 0x556   : > { %v4280_v14 = vperm.slane %v4278_v43, 0 }
 0x564   : > { %v4296_v53 = vpop.f32.mrf.mxu0 }
 0x565   : > { %v4297_v7 = vadd.f32 %v4296_v53, %v4280_v14 }
 0x56c   : > { %v4298_v52 = vpop.f32.mrf.mxu0 }
 0x5b7   : > { %v4309_v2 = vpop.f32.mrf.mxu1 }
 0x5b8   : > { %v4310_v10 = vadd.f32 %v4309_v2, %v4297_v7 }
 0x5ba   : > { %4313 = vst [vmem:[%s277_s12] sm:$0x1] %v4310_v10 }
 0x5bb   : > { %6126 = shalt.err (!%p6123_p10)
}
 0x5bc   : > { %5751 = dma.vmem_to_hbm [thread:$0]  (%p6277_p3), %s4326_s16, 16, %s4328_s17, %s4315_s27  }
 0x5bf   : > { %v4311_v28 = vpop.f32.mrf.mxu1 }
 0x5c0 PF: > { %s4339_s7 = sand.u32 1, %s6157_s20   ;;  %p7914_p12 = scmp.ge.s32.totalorder %s6169_s23, 2 }
 0x5c1   : > { %s4340_s14 = scalar_lea.sflag [#allocation5], %s4339_s7 }
 0x5c2   : > { %p5765_p13 = pnand %p7914_p12, %p6246_p6 }
 0x5c4   : > { %p5766_p0 = pneg %p5765_p13 }
 0x5c6   : > { %6152 = dma.done.wait (%p5766_p0), %s4340_s14, 16  }
 0x5c7   : > { %6154 = vsyncadd (%p5766_p0), %s4340_s14, 4294967280  ;;  %p21_p5 = scmp.ge.s32.totalorder %s6267_s15, 4   ;;  %s7915_s20 = smov %s6161_s21 }
 0x5c8   : > { %s7916_s21 = smov %s6165_s22  ;;  %s7917_s22 = smov %s6283_s19 }
 0x5c9   : > { %s7918_s23 = smov %s6267_s15  ;;  %23 = sbr.rel (!%p21_p5) target bundleno = 9 (0x9), region = 93 }
 0x5ce   :  { %4345 = vsyncpa [#allocation4], 1 }
 0x5cf   :  { %4347 = vsyncpa [#allocation4 + $0x1], 1 }
 0x5d0   :  { %4348 = vsyncpa [#allocation7], 1 }
 0x5d1   :  { %4349 = vsyncpa [#allocation5], 1 }
 0x5d2   :  { %4351 = vsyncpa [#allocation5 + $0x1], 1 }

</bundles_post_ra>
